<compile_context>
chip_gen: v7x
topology: tpu7x:2x2x1
jax: 0.10.0
libtpu: 0.0.40
codegen_flags: <defaults>
</compile_context>

<pallas_src>
import functools

import numpy as np

import jax
import jax.numpy as jnp
from jax.experimental import pallas as pl
from jax.experimental.pallas import tpu as pltpu


# Tap order matches the (ky, kx) row-major order of a 3x3 conv kernel.
_TAP_OFFSETS = tuple((dy, dx) for dy in (-1, 0, 1) for dx in (-1, 0, 1))


@functools.lru_cache(maxsize=None)
def _build_tap_masks(M3, H, W):
    """(M3, 9) f32 0/1 validity mask per 3x3 tap (padding=1), row-major rows."""
    r = np.arange(M3)
    y = (r // W) % H
    x = r % W
    m = np.zeros((M3, 9), np.float32)
    for t, (dy, dx) in enumerate(_TAP_OFFSETS):
        m[:, t] = ((y + dy >= 0) & (y + dy < H) &
                   (x + dx >= 0) & (x + dx < W)).astype(np.float32)
    return m


def _elu(x):
    # nn.ELU(alpha=1.0); min() keeps the unselected exp branch finite.
    return jnp.where(x > 0, x, jnp.exp(jnp.minimum(x, 0.0)) - 1.0)


def _head(x, bn1s, bn1t, w1, b1, bn2s, bn2t, w2, b2):
    # BN1d -> ELU -> Linear -> BN1d -> ELU -> Linear (eval mode, BN folded).
    h = _elu(x * bn1s[...] + bn1t[...])
    h = jnp.dot(h.astype(w1.dtype), w1[...],
                preferred_element_type=jnp.float32) + b1[...]
    h = _elu(h * bn2s[...] + bn2t[...])
    return jnp.dot(h.astype(w2.dtype), w2[...],
                   preferred_element_type=jnp.float32) + b2[...]


# ---------------------------------------------------------------------------
# Single fused kernel: conv_block1 (both convs, all 3 streams batched)
#   -> AdaptiveMaxPool2d((1,1)) -> gating (map1/map2/sigmoid)
#   -> classifier1/2/3 (self+other stacked) -> classifier_concat
# ---------------------------------------------------------------------------
def _pmgi_kernel(*refs, N, H, W, F, C, PAD):
    (x_ref, mask_ref, w1_ref, s1_ref, t1_ref, w9_ref, s2_ref, t2_ref,
     wm1_ref, bm1_ref, wm2_ref, bm2_ref) = refs[:12]
    heads = [refs[12 + 8 * i: 20 + 8 * i] for i in range(4)]
    out_ref, hp_ref, col_ref = refs[44:47]

    M3 = 3 * N * H * W
    HW = H * W

    # --- conv_block1 stage 1: 1x1 conv (single full-K matmul) + BN + ReLU ---
    h = jnp.dot(x_ref[...], w1_ref[...], preferred_element_type=jnp.float32)
    h = jnp.maximum(h * s1_ref[...] + t1_ref[...], 0.0)          # (M3, F) f32

    # Zero-padded copy along the row axis so each 3x3 tap is a static slice;
    # in-image boundary validity handled by the precomputed 0/1 mask.
    hp_ref[0:PAD, :] = jnp.zeros((PAD, F), jnp.float32)
    hp_ref[PAD:PAD + M3, :] = h
    hp_ref[PAD + M3:PAD + M3 + PAD, :] = jnp.zeros((PAD, F), jnp.float32)

    # --- conv_block1 stage 2: 3x3 conv (padding=1) via im2col in scratch ---
    for t, (dy, dx) in enumerate(_TAP_OFFSETS):
        start = PAD + dy * W + dx                                 # static
        tap = hp_ref[start:start + M3, :] * mask_ref[:, t:t + 1]  # (M3, F) f32
        col_ref[:, t * F:(t + 1) * F] = tap.astype(col_ref.dtype)

    y = jnp.dot(col_ref[...], w9_ref[...], preferred_element_type=jnp.float32)
    y = jnp.maximum(y * s2_ref[...] + t2_ref[...], 0.0)           # (M3, F) f32

    # --- AdaptiveMaxPool2d((1,1)) per image -> xl: (3N, F) ---
    xl = jnp.max(y.reshape(3 * N, HW, F), axis=1)

    x1 = xl[0:N]
    x2 = xl[N:2 * N]
    x3 = xl[2 * N:3 * N]

    # --- gating: map1 -> dropout (identity in eval) -> map2 -> sigmoid ---
    xcat3 = jnp.concatenate([x1, x2, x3], axis=1)                 # (N, 3F)
    feas = jnp.dot(xcat3.astype(wm1_ref.dtype), wm1_ref[...],
                   preferred_element_type=jnp.float32) + bm1_ref[...]
    feas = jnp.dot(feas.astype(wm2_ref.dtype), wm2_ref[...],
                   preferred_element_type=jnp.float32) + bm2_ref[...]

    g1 = jax.nn.sigmoid(feas * x1) * x1
    g2 = jax.nn.sigmoid(feas * x2) * x2
    g3 = jax.nn.sigmoid(feas * x3) * x3

    x1s, x1o = g1 + x1, x1 + g2 + g3
    x2s, x2o = g2 + x2, x2 + g1 + g3
    x3s, x3o = g3 + x3, x3 + g1 + g2

    # --- classifier heads: self/other stacked so each head matmuls once ---
    h1 = _head(jnp.concatenate([x1s, x1o], axis=0), *heads[0])    # (2N, C)
    h2 = _head(jnp.concatenate([x2s, x2o], axis=0), *heads[1])
    h3 = _head(jnp.concatenate([x3s, x3o], axis=0), *heads[2])
    feat = jnp.concatenate([x1s, x1o, x2s, x2o, x3s, x3o], axis=1)  # (N, 6F)
    hc = _head(feat, *heads[3])                                   # (N, C)

    # Packed output: rows [0,2N)=xc1, [2N,4N)=xc2, [4N,6N)=xc3, [6N,7N)=concat
    out_ref[...] = jnp.concatenate([h1, h2, h3, hc],
                                   axis=0).astype(out_ref.dtype)


# ---------------------------------------------------------------------------
# Parameter initialization (deterministic, synthetic; BN folded to scale/shift)
# Matmul weights stored bf16, BN scale/shift and biases in f32.
# ---------------------------------------------------------------------------
def init_params(key, Cin, F, C):
    keys = iter(jax.random.split(key, 128))

    def nrm(shape, scale=0.02, dtype=jnp.float32):
        w = jax.random.normal(next(keys), shape, jnp.float32) * scale
        return w.astype(dtype)

    def bn(n, eps=1e-5):
        gamma = 1.0 + 0.1 * jax.random.normal(next(keys), (n,), jnp.float32)
        beta = 0.1 * jax.random.normal(next(keys), (n,), jnp.float32)
        mean = 0.1 * jax.random.normal(next(keys), (n,), jnp.float32)
        var = jnp.abs(jax.random.normal(next(keys), (n,), jnp.float32)) + 0.5
        scale = gamma / jnp.sqrt(var + eps)
        shift = beta - mean * scale
        return scale.reshape(1, n), shift.reshape(1, n)

    def head(fin):
        return dict(bn1=bn(fin),
                    w1=nrm((fin, F), dtype=jnp.bfloat16), b1=nrm((1, F)),
                    bn2=bn(F),
                    w2=nrm((F, C), dtype=jnp.bfloat16), b2=nrm((1, C)))

    return dict(
        cb1_w1=nrm((Cin, F), dtype=jnp.bfloat16),      # 1x1 conv (Cin, F)
        cb1_bn1=bn(F),
        cb1_w2=nrm((9 * F, F), dtype=jnp.bfloat16),    # 3x3 conv, tap-major
        cb1_bn2=bn(F),
        map1_w=nrm((3 * F, F), dtype=jnp.bfloat16), map1_b=nrm((1, F)),
        map2_w=nrm((F, F), dtype=jnp.bfloat16), map2_b=nrm((1, F)),
        cls1=head(F), cls2=head(F), cls3=head(F),
        cls_cat=head(6 * F),   # TODO(synk): reference declares 3F (shape bug)
    )


# ---------------------------------------------------------------------------
# Full forward (one pallas_call)
# ---------------------------------------------------------------------------
def pmgi_v8_forward(params, x1, x2, x3, train_flag=False, *, N, H, W, F, C):
    del train_flag  # forward semantics identical in eval; dropout = identity
    Cin = x1.shape[1]
    M3 = 3 * N * H * W
    PAD = -(-(W + 1) // 8) * 8            # >= W+1, multiple of 8 sublanes

    # NCHW -> channels-last rows; cast to bf16 BEFORE the layout change so the
    # standalone XLA transpose moves half the bytes.
    x = jnp.stack([x1, x2, x3], axis=0).astype(jnp.bfloat16)   # (3,N,Cin,H,W)
    x = jnp.transpose(x, (0, 1, 3, 4, 2)).reshape(M3, Cin)     # (M3, Cin)

    masks = jnp.asarray(_build_tap_masks(M3, H, W))            # (M3, 9) f32

    s1, t1 = params["cb1_bn1"]
    s2, t2 = params["cb1_bn2"]
    head_args = []
    for name in ("cls1", "cls2", "cls3", "cls_cat"):
        p = params[name]
        head_args += [p["bn1"][0], p["bn1"][1], p["w1"], p["b1"],
                      p["bn2"][0], p["bn2"][1], p["w2"], p["b2"]]
    args = [x, masks, params["cb1_w1"], s1, t1, params["cb1_w2"], s2, t2,
            params["map1_w"], params["map1_b"],
            params["map2_w"], params["map2_b"]] + head_args

    kernel = functools.partial(_pmgi_kernel, N=N, H=H, W=W, F=F, C=C, PAD=PAD)
    vmem = pltpu.MemorySpace.VMEM
    out = pl.pallas_call(
        kernel,
        out_shape=jax.ShapeDtypeStruct((7 * N, C), jnp.float32),
        in_specs=[pl.BlockSpec(memory_space=vmem)] * len(args),
        out_specs=pl.BlockSpec(memory_space=vmem),
        scratch_shapes=[
            pltpu.VMEM((M3 + 2 * PAD, F), jnp.float32),   # zero-padded h
            pltpu.VMEM((M3, 9 * F), jnp.bfloat16),        # im2col columns
        ],
    )(*args)

    xc1 = out[0:2 * N]            # == torch.cat([xc1_self, xc1_other], dim=0)
    xc2 = out[2 * N:4 * N]
    xc3 = out[4 * N:6 * N]
    x_concat = out[6 * N:7 * N]
    return xc1, xc2, xc3, x_concat


if __name__ == "__main__":
    N, H, W = 2, 4, 4
    Cin = 2048          # self.num_ftrs (hardcoded in the module)
    F = 128             # feature_size
    C = 8               # classes_num

    key = jax.random.PRNGKey(0)
    k1, k2, k3, kp = jax.random.split(key, 4)
    # Inputs are the backbone's final 2048-channel feature maps (NCHW).
    # TODO(synk): the ResNet-style backbone `self.features` is an external
    # module argument and is not re-implemented here.
    x1 = jax.random.normal(k1, (N, Cin, H, W), jnp.float32)
    x2 = jax.random.normal(k2, (N, Cin, H, W), jnp.float32)
    x3 = jax.random.normal(k3, (N, Cin, H, W), jnp.float32)
    params = init_params(kp, Cin, F, C)

    fwd = jax.jit(functools.partial(pmgi_v8_forward, N=N, H=H, W=W, F=F, C=C))
    xc1, xc2, xc3, x_concat = fwd(params, x1, x2, x3)
    jax.block_until_ready((xc1, xc2, xc3, x_concat))

    assert xc1.shape == (2 * N, C)
    assert xc2.shape == (2 * N, C)
    assert xc3.shape == (2 * N, C)
    assert x_concat.shape == (N, C)
    print("KERNEL_OK")
</pallas_src>

<mosaic_0001>
module attributes {stable_mosaic.version = 11 : i64} {
  func.func @_pmgi_kernel(%arg0: memref<96x2048xbf16, #tpu.memory_space<vmem>>, %arg1: memref<96x9xf32, #tpu.memory_space<vmem>>, %arg2: memref<2048x128xbf16, #tpu.memory_space<vmem>>, %arg3: memref<1x128xf32, #tpu.memory_space<vmem>>, %arg4: memref<1x128xf32, #tpu.memory_space<vmem>>, %arg5: memref<1152x128xbf16, #tpu.memory_space<vmem>>, %arg6: memref<1x128xf32, #tpu.memory_space<vmem>>, %arg7: memref<1x128xf32, #tpu.memory_space<vmem>>, %arg8: memref<384x128xbf16, #tpu.memory_space<vmem>>, %arg9: memref<1x128xf32, #tpu.memory_space<vmem>>, %arg10: memref<128x128xbf16, #tpu.memory_space<vmem>>, %arg11: memref<1x128xf32, #tpu.memory_space<vmem>>, %arg12: memref<1x128xf32, #tpu.memory_space<vmem>>, %arg13: memref<1x128xf32, #tpu.memory_space<vmem>>, %arg14: memref<128x128xbf16, #tpu.memory_space<vmem>>, %arg15: memref<1x128xf32, #tpu.memory_space<vmem>>, %arg16: memref<1x128xf32, #tpu.memory_space<vmem>>, %arg17: memref<1x128xf32, #tpu.memory_space<vmem>>, %arg18: memref<128x8xbf16, #tpu.memory_space<vmem>>, %arg19: memref<1x8xf32, #tpu.memory_space<vmem>>, %arg20: memref<1x128xf32, #tpu.memory_space<vmem>>, %arg21: memref<1x128xf32, #tpu.memory_space<vmem>>, %arg22: memref<128x128xbf16, #tpu.memory_space<vmem>>, %arg23: memref<1x128xf32, #tpu.memory_space<vmem>>, %arg24: memref<1x128xf32, #tpu.memory_space<vmem>>, %arg25: memref<1x128xf32, #tpu.memory_space<vmem>>, %arg26: memref<128x8xbf16, #tpu.memory_space<vmem>>, %arg27: memref<1x8xf32, #tpu.memory_space<vmem>>, %arg28: memref<1x128xf32, #tpu.memory_space<vmem>>, %arg29: memref<1x128xf32, #tpu.memory_space<vmem>>, %arg30: memref<128x128xbf16, #tpu.memory_space<vmem>>, %arg31: memref<1x128xf32, #tpu.memory_space<vmem>>, %arg32: memref<1x128xf32, #tpu.memory_space<vmem>>, %arg33: memref<1x128xf32, #tpu.memory_space<vmem>>, %arg34: memref<128x8xbf16, #tpu.memory_space<vmem>>, %arg35: memref<1x8xf32, #tpu.memory_space<vmem>>, %arg36: memref<1x768xf32, #tpu.memory_space<vmem>>, %arg37: memref<1x768xf32, #tpu.memory_space<vmem>>, %arg38: memref<768x128xbf16, #tpu.memory_space<vmem>>, %arg39: memref<1x128xf32, #tpu.memory_space<vmem>>, %arg40: memref<1x128xf32, #tpu.memory_space<vmem>>, %arg41: memref<1x128xf32, #tpu.memory_space<vmem>>, %arg42: memref<128x8xbf16, #tpu.memory_space<vmem>>, %arg43: memref<1x8xf32, #tpu.memory_space<vmem>>, %arg44: memref<14x8xf32, #tpu.memory_space<vmem>>, %arg45: memref<112x128xf32, #tpu.memory_space<vmem>>, %arg46: memref<96x1152xbf16, #tpu.memory_space<vmem>>) attributes {dimension_semantics = [], scalar_prefetch = 0 : i64, scratch_operands = 2 : i64, tpu.core_type = #tpu.core_type<tc>} {
    %c0 = arith.constant 0 : index
    %c0_0 = arith.constant 0 : index
    %0 = vector.load %arg0[%c0, %c0_0] : memref<96x2048xbf16, #tpu.memory_space<vmem>>, vector<96x2048xbf16>
    %c0_1 = arith.constant 0 : index
    %c0_2 = arith.constant 0 : index
    %1 = vector.load %arg2[%c0_1, %c0_2] : memref<2048x128xbf16, #tpu.memory_space<vmem>>, vector<2048x128xbf16>
    %cst = arith.constant dense<0.000000e+00> : vector<96x128xf32>
    %2 = tpu.matmul %0, %1, %cst {dimension_numbers = #tpu.dot_dimension_numbers<[1], [0], [0], [1], [0, 0, 1, 1], [], []>} : vector<96x2048xbf16>, vector<2048x128xbf16>, vector<96x128xf32> -> vector<96x128xf32>
    %c0_3 = arith.constant 0 : index
    %c0_4 = arith.constant 0 : index
    %3 = vector.load %arg3[%c0_3, %c0_4] : memref<1x128xf32, #tpu.memory_space<vmem>>, vector<1x128xf32>
    %4 = vector.broadcast %3 : vector<1x128xf32> to vector<96x128xf32>
    %5 = arith.mulf %2, %4 : vector<96x128xf32>
    %c0_5 = arith.constant 0 : index
    %c0_6 = arith.constant 0 : index
    %6 = vector.load %arg4[%c0_5, %c0_6] : memref<1x128xf32, #tpu.memory_space<vmem>>, vector<1x128xf32>
    %7 = vector.broadcast %6 : vector<1x128xf32> to vector<96x128xf32>
    %8 = arith.addf %5, %7 : vector<96x128xf32>
    %cst_7 = arith.constant 0.000000e+00 : f32
    %9 = vector.broadcast %cst_7 : f32 to vector<96x128xf32>
    %10 = arith.maximumf %8, %9 : vector<96x128xf32>
    %cst_8 = arith.constant 0.000000e+00 : f32
    %11 = vector.broadcast %cst_8 : f32 to vector<8x128xf32>
    %c0_9 = arith.constant 0 : index
    %c0_10 = arith.constant 0 : index
    %12 = vector.load %arg45[%c0_9, %c0_10] : memref<112x128xf32, #tpu.memory_space<vmem>>, vector<8x128xf32>
    tpu.vector_store %arg45[%c0_9, %c0_10], %11 {strides = array<i32>} : memref<112x128xf32, #tpu.memory_space<vmem>>, vector<8x128xf32>,
    %c8 = arith.constant 8 : index
    %c0_11 = arith.constant 0 : index
    %13 = vector.load %arg45[%c8, %c0_11] : memref<112x128xf32, #tpu.memory_space<vmem>>, vector<96x128xf32>
    tpu.vector_store %arg45[%c8, %c0_11], %10 {strides = array<i32>} : memref<112x128xf32, #tpu.memory_space<vmem>>, vector<96x128xf32>,
    %cst_12 = arith.constant 0.000000e+00 : f32
    %14 = vector.broadcast %cst_12 : f32 to vector<8x128xf32>
    %c104 = arith.constant 104 : index
    %c0_13 = arith.constant 0 : index
    %15 = vector.load %arg45[%c104, %c0_13] : memref<112x128xf32, #tpu.memory_space<vmem>>, vector<8x128xf32>
    tpu.vector_store %arg45[%c104, %c0_13], %14 {strides = array<i32>} : memref<112x128xf32, #tpu.memory_space<vmem>>, vector<8x128xf32>,
    %c3 = arith.constant 3 : index
    %c0_14 = arith.constant 0 : index
    %16 = vector.load %arg45[%c3, %c0_14] : memref<112x128xf32, #tpu.memory_space<vmem>>, vector<96x128xf32>
    %c0_15 = arith.constant 0 : index
    %c0_16 = arith.constant 0 : index
    %17 = vector.load %arg1[%c0_15, %c0_16] : memref<96x9xf32, #tpu.memory_space<vmem>>, vector<96x1xf32>
    %18 = vector.broadcast %17 : vector<96x1xf32> to vector<96x128xf32>
    %19 = arith.mulf %16, %18 : vector<96x128xf32>
    %20 = arith.truncf %19 : vector<96x128xf32> to vector<96x128xbf16>
    %c0_17 = arith.constant 0 : index
    %c0_18 = arith.constant 0 : index
    %21 = vector.load %arg46[%c0_17, %c0_18] : memref<96x1152xbf16, #tpu.memory_space<vmem>>, vector<96x128xbf16>
    tpu.vector_store %arg46[%c0_17, %c0_18], %20 {strides = array<i32>} : memref<96x1152xbf16, #tpu.memory_space<vmem>>, vector<96x128xbf16>,
    %c4 = arith.constant 4 : index
    %c0_19 = arith.constant 0 : index
    %22 = vector.load %arg45[%c4, %c0_19] : memref<112x128xf32, #tpu.memory_space<vmem>>, vector<96x128xf32>
    %c0_20 = arith.constant 0 : index
    %c1 = arith.constant 1 : index
    %23 = vector.load %arg1[%c0_20, %c1] : memref<96x9xf32, #tpu.memory_space<vmem>>, vector<96x1xf32>
    %24 = vector.broadcast %23 : vector<96x1xf32> to vector<96x128xf32>
    %25 = arith.mulf %22, %24 : vector<96x128xf32>
    %26 = arith.truncf %25 : vector<96x128xf32> to vector<96x128xbf16>
    %c0_21 = arith.constant 0 : index
    %c128 = arith.constant 128 : index
    %27 = vector.load %arg46[%c0_21, %c128] : memref<96x1152xbf16, #tpu.memory_space<vmem>>, vector<96x128xbf16>
    tpu.vector_store %arg46[%c0_21, %c128], %26 {strides = array<i32>} : memref<96x1152xbf16, #tpu.memory_space<vmem>>, vector<96x128xbf16>,
    %c5 = arith.constant 5 : index
    %c0_22 = arith.constant 0 : index
    %28 = vector.load %arg45[%c5, %c0_22] : memref<112x128xf32, #tpu.memory_space<vmem>>, vector<96x128xf32>
    %c0_23 = arith.constant 0 : index
    %c2 = arith.constant 2 : index
    %29 = vector.load %arg1[%c0_23, %c2] : memref<96x9xf32, #tpu.memory_space<vmem>>, vector<96x1xf32>
    %30 = vector.broadcast %29 : vector<96x1xf32> to vector<96x128xf32>
    %31 = arith.mulf %28, %30 : vector<96x128xf32>
    %32 = arith.truncf %31 : vector<96x128xf32> to vector<96x128xbf16>
    %c0_24 = arith.constant 0 : index
    %c256 = arith.constant 256 : index
    %33 = vector.load %arg46[%c0_24, %c256] : memref<96x1152xbf16, #tpu.memory_space<vmem>>, vector<96x128xbf16>
    tpu.vector_store %arg46[%c0_24, %c256], %32 {strides = array<i32>} : memref<96x1152xbf16, #tpu.memory_space<vmem>>, vector<96x128xbf16>,
    %c7 = arith.constant 7 : index
    %c0_25 = arith.constant 0 : index
    %34 = vector.load %arg45[%c7, %c0_25] : memref<112x128xf32, #tpu.memory_space<vmem>>, vector<96x128xf32>
    %c0_26 = arith.constant 0 : index
    %c3_27 = arith.constant 3 : index
    %35 = vector.load %arg1[%c0_26, %c3_27] : memref<96x9xf32, #tpu.memory_space<vmem>>, vector<96x1xf32>
    %36 = vector.broadcast %35 : vector<96x1xf32> to vector<96x128xf32>
    %37 = arith.mulf %34, %36 : vector<96x128xf32>
    %38 = arith.truncf %37 : vector<96x128xf32> to vector<96x128xbf16>
    %c0_28 = arith.constant 0 : index
    %c384 = arith.constant 384 : index
    %39 = vector.load %arg46[%c0_28, %c384] : memref<96x1152xbf16, #tpu.memory_space<vmem>>, vector<96x128xbf16>
    tpu.vector_store %arg46[%c0_28, %c384], %38 {strides = array<i32>} : memref<96x1152xbf16, #tpu.memory_space<vmem>>, vector<96x128xbf16>,
    %c8_29 = arith.constant 8 : index
    %c0_30 = arith.constant 0 : index
    %40 = vector.load %arg45[%c8_29, %c0_30] : memref<112x128xf32, #tpu.memory_space<vmem>>, vector<96x128xf32>
    %c0_31 = arith.constant 0 : index
    %c4_32 = arith.constant 4 : index
    %41 = vector.load %arg1[%c0_31, %c4_32] : memref<96x9xf32, #tpu.memory_space<vmem>>, vector<96x1xf32>
    %42 = vector.broadcast %41 : vector<96x1xf32> to vector<96x128xf32>
    %43 = arith.mulf %40, %42 : vector<96x128xf32>
    %44 = arith.truncf %43 : vector<96x128xf32> to vector<96x128xbf16>
    %c0_33 = arith.constant 0 : index
    %c512 = arith.constant 512 : index
    %45 = vector.load %arg46[%c0_33, %c512] : memref<96x1152xbf16, #tpu.memory_space<vmem>>, vector<96x128xbf16>
    tpu.vector_store %arg46[%c0_33, %c512], %44 {strides = array<i32>} : memref<96x1152xbf16, #tpu.memory_space<vmem>>, vector<96x128xbf16>,
    %c9 = arith.constant 9 : index
    %c0_34 = arith.constant 0 : index
    %46 = vector.load %arg45[%c9, %c0_34] : memref<112x128xf32, #tpu.memory_space<vmem>>, vector<96x128xf32>
    %c0_35 = arith.constant 0 : index
    %c5_36 = arith.constant 5 : index
    %47 = vector.load %arg1[%c0_35, %c5_36] : memref<96x9xf32, #tpu.memory_space<vmem>>, vector<96x1xf32>
    %48 = vector.broadcast %47 : vector<96x1xf32> to vector<96x128xf32>
    %49 = arith.mulf %46, %48 : vector<96x128xf32>
    %50 = arith.truncf %49 : vector<96x128xf32> to vector<96x128xbf16>
    %c0_37 = arith.constant 0 : index
    %c640 = arith.constant 640 : index
    %51 = vector.load %arg46[%c0_37, %c640] : memref<96x1152xbf16, #tpu.memory_space<vmem>>, vector<96x128xbf16>
    tpu.vector_store %arg46[%c0_37, %c640], %50 {strides = array<i32>} : memref<96x1152xbf16, #tpu.memory_space<vmem>>, vector<96x128xbf16>,
    %c11 = arith.constant 11 : index
    %c0_38 = arith.constant 0 : index
    %52 = vector.load %arg45[%c11, %c0_38] : memref<112x128xf32, #tpu.memory_space<vmem>>, vector<96x128xf32>
    %c0_39 = arith.constant 0 : index
    %c6 = arith.constant 6 : index
    %53 = vector.load %arg1[%c0_39, %c6] : memref<96x9xf32, #tpu.memory_space<vmem>>, vector<96x1xf32>
    %54 = vector.broadcast %53 : vector<96x1xf32> to vector<96x128xf32>
    %55 = arith.mulf %52, %54 : vector<96x128xf32>
    %56 = arith.truncf %55 : vector<96x128xf32> to vector<96x128xbf16>
    %c0_40 = arith.constant 0 : index
    %c768 = arith.constant 768 : index
    %57 = vector.load %arg46[%c0_40, %c768] : memref<96x1152xbf16, #tpu.memory_space<vmem>>, vector<96x128xbf16>
    tpu.vector_store %arg46[%c0_40, %c768], %56 {strides = array<i32>} : memref<96x1152xbf16, #tpu.memory_space<vmem>>, vector<96x128xbf16>,
    %c12 = arith.constant 12 : index
    %c0_41 = arith.constant 0 : index
    %58 = vector.load %arg45[%c12, %c0_41] : memref<112x128xf32, #tpu.memory_space<vmem>>, vector<96x128xf32>
    %c0_42 = arith.constant 0 : index
    %c7_43 = arith.constant 7 : index
    %59 = vector.load %arg1[%c0_42, %c7_43] : memref<96x9xf32, #tpu.memory_space<vmem>>, vector<96x1xf32>
    %60 = vector.broadcast %59 : vector<96x1xf32> to vector<96x128xf32>
    %61 = arith.mulf %58, %60 : vector<96x128xf32>
    %62 = arith.truncf %61 : vector<96x128xf32> to vector<96x128xbf16>
    %c0_44 = arith.constant 0 : index
    %c896 = arith.constant 896 : index
    %63 = vector.load %arg46[%c0_44, %c896] : memref<96x1152xbf16, #tpu.memory_space<vmem>>, vector<96x128xbf16>
    tpu.vector_store %arg46[%c0_44, %c896], %62 {strides = array<i32>} : memref<96x1152xbf16, #tpu.memory_space<vmem>>, vector<96x128xbf16>,
    %c13 = arith.constant 13 : index
    %c0_45 = arith.constant 0 : index
    %64 = vector.load %arg45[%c13, %c0_45] : memref<112x128xf32, #tpu.memory_space<vmem>>, vector<96x128xf32>
    %c0_46 = arith.constant 0 : index
    %c8_47 = arith.constant 8 : index
    %65 = vector.load %arg1[%c0_46, %c8_47] : memref<96x9xf32, #tpu.memory_space<vmem>>, vector<96x1xf32>
    %66 = vector.broadcast %65 : vector<96x1xf32> to vector<96x128xf32>
    %67 = arith.mulf %64, %66 : vector<96x128xf32>
    %68 = arith.truncf %67 : vector<96x128xf32> to vector<96x128xbf16>
    %c0_48 = arith.constant 0 : index
    %c1024 = arith.constant 1024 : index
    %69 = vector.load %arg46[%c0_48, %c1024] : memref<96x1152xbf16, #tpu.memory_space<vmem>>, vector<96x128xbf16>
    tpu.vector_store %arg46[%c0_48, %c1024], %68 {strides = array<i32>} : memref<96x1152xbf16, #tpu.memory_space<vmem>>, vector<96x128xbf16>,
    %c0_49 = arith.constant 0 : index
    %c0_50 = arith.constant 0 : index
    %70 = vector.load %arg46[%c0_49, %c0_50] : memref<96x1152xbf16, #tpu.memory_space<vmem>>, vector<96x1152xbf16>
    %c0_51 = arith.constant 0 : index
    %c0_52 = arith.constant 0 : index
    %71 = vector.load %arg5[%c0_51, %c0_52] : memref<1152x128xbf16, #tpu.memory_space<vmem>>, vector<1152x128xbf16>
    %cst_53 = arith.constant dense<0.000000e+00> : vector<96x128xf32>
    %72 = tpu.matmul %70, %71, %cst_53 {dimension_numbers = #tpu.dot_dimension_numbers<[1], [0], [0], [1], [0, 0, 1, 1], [], []>} : vector<96x1152xbf16>, vector<1152x128xbf16>, vector<96x128xf32> -> vector<96x128xf32>
    %c0_54 = arith.constant 0 : index
    %c0_55 = arith.constant 0 : index
    %73 = vector.load %arg6[%c0_54, %c0_55] : memref<1x128xf32, #tpu.memory_space<vmem>>, vector<1x128xf32>
    %74 = vector.broadcast %73 : vector<1x128xf32> to vector<96x128xf32>
    %75 = arith.mulf %72, %74 : vector<96x128xf32>
    %c0_56 = arith.constant 0 : index
    %c0_57 = arith.constant 0 : index
    %76 = vector.load %arg7[%c0_56, %c0_57] : memref<1x128xf32, #tpu.memory_space<vmem>>, vector<1x128xf32>
    %77 = vector.broadcast %76 : vector<1x128xf32> to vector<96x128xf32>
    %78 = arith.addf %75, %77 : vector<96x128xf32>
    %cst_58 = arith.constant 0.000000e+00 : f32
    %79 = vector.broadcast %cst_58 : f32 to vector<96x128xf32>
    %80 = arith.maximumf %78, %79 : vector<96x128xf32>
    %81 = vector.shape_cast %80 : vector<96x128xf32> to vector<6x16x128xf32>
    %cst_59 = arith.constant dense<0xFF800000> : vector<6x128xf32>
    %82 = vector.multi_reduction <maximumf>, %81, %cst_59 [1] : vector<6x16x128xf32> to vector<6x128xf32>
    %83 = vector.extract_strided_slice %82 {offsets = [0, 0], sizes = [2, 128], strides = [1, 1]} : vector<6x128xf32> to vector<2x128xf32>
    %84 = vector.extract_strided_slice %82 {offsets = [2, 0], sizes = [2, 128], strides = [1, 1]} : vector<6x128xf32> to vector<2x128xf32>
    %85 = vector.extract_strided_slice %82 {offsets = [4, 0], sizes = [2, 128], strides = [1, 1]} : vector<6x128xf32> to vector<2x128xf32>
    %86 = tpu.concatenate %83, %84, %85 in 1 : vector<2x128xf32>, vector<2x128xf32>, vector<2x128xf32> -> vector<2x384xf32>
    %87 = arith.truncf %86 : vector<2x384xf32> to vector<2x384xbf16>
    %c0_60 = arith.constant 0 : index
    %c0_61 = arith.constant 0 : index
    %88 = vector.load %arg8[%c0_60, %c0_61] : memref<384x128xbf16, #tpu.memory_space<vmem>>, vector<384x128xbf16>
    %cst_62 = arith.constant dense<0.000000e+00> : vector<2x128xf32>
    %89 = tpu.matmul %87, %88, %cst_62 {dimension_numbers = #tpu.dot_dimension_numbers<[1], [0], [0], [1], [0, 0, 1, 1], [], []>} : vector<2x384xbf16>, vector<384x128xbf16>, vector<2x128xf32> -> vector<2x128xf32>
    %c0_63 = arith.constant 0 : index
    %c0_64 = arith.constant 0 : index
    %90 = vector.load %arg9[%c0_63, %c0_64] : memref<1x128xf32, #tpu.memory_space<vmem>>, vector<1x128xf32>
    %91 = vector.broadcast %90 : vector<1x128xf32> to vector<2x128xf32>
    %92 = arith.addf %89, %91 : vector<2x128xf32>
    %93 = arith.truncf %92 : vector<2x128xf32> to vector<2x128xbf16>
    %c0_65 = arith.constant 0 : index
    %c0_66 = arith.constant 0 : index
    %94 = vector.load %arg10[%c0_65, %c0_66] : memref<128x128xbf16, #tpu.memory_space<vmem>>, vector<128x128xbf16>
    %cst_67 = arith.constant dense<0.000000e+00> : vector<2x128xf32>
    %95 = tpu.matmul %93, %94, %cst_67 {dimension_numbers = #tpu.dot_dimension_numbers<[1], [0], [0], [1], [0, 0, 1, 1], [], []>} : vector<2x128xbf16>, vector<128x128xbf16>, vector<2x128xf32> -> vector<2x128xf32>
    %c0_68 = arith.constant 0 : index
    %c0_69 = arith.constant 0 : index
    %96 = vector.load %arg11[%c0_68, %c0_69] : memref<1x128xf32, #tpu.memory_space<vmem>>, vector<1x128xf32>
    %97 = vector.broadcast %96 : vector<1x128xf32> to vector<2x128xf32>
    %98 = arith.addf %95, %97 : vector<2x128xf32>
    %99 = arith.mulf %98, %83 : vector<2x128xf32>
    %100 = arith.negf %99 : vector<2x128xf32>
    %101 = math.exp %100 : vector<2x128xf32>
    %cst_70 = arith.constant 1.000000e+00 : f32
    %102 = vector.broadcast %cst_70 : f32 to vector<2x128xf32>
    %103 = arith.addf %102, %101 : vector<2x128xf32>
    %104 = arith.divf %102, %103 : vector<2x128xf32>
    %105 = arith.mulf %104, %83 : vector<2x128xf32>
    %106 = arith.mulf %98, %84 : vector<2x128xf32>
    %107 = arith.negf %106 : vector<2x128xf32>
    %108 = math.exp %107 : vector<2x128xf32>
    %cst_71 = arith.constant 1.000000e+00 : f32
    %109 = vector.broadcast %cst_71 : f32 to vector<2x128xf32>
    %110 = arith.addf %109, %108 : vector<2x128xf32>
    %111 = arith.divf %109, %110 : vector<2x128xf32>
    %112 = arith.mulf %111, %84 : vector<2x128xf32>
    %113 = arith.mulf %98, %85 : vector<2x128xf32>
    %114 = arith.negf %113 : vector<2x128xf32>
    %115 = math.exp %114 : vector<2x128xf32>
    %cst_72 = arith.constant 1.000000e+00 : f32
    %116 = vector.broadcast %cst_72 : f32 to vector<2x128xf32>
    %117 = arith.addf %116, %115 : vector<2x128xf32>
    %118 = arith.divf %116, %117 : vector<2x128xf32>
    %119 = arith.mulf %118, %85 : vector<2x128xf32>
    %120 = arith.addf %105, %83 : vector<2x128xf32>
    %121 = arith.addf %83, %112 : vector<2x128xf32>
    %122 = arith.addf %121, %119 : vector<2x128xf32>
    %123 = arith.addf %112, %84 : vector<2x128xf32>
    %124 = arith.addf %84, %105 : vector<2x128xf32>
    %125 = arith.addf %124, %119 : vector<2x128xf32>
    %126 = arith.addf %119, %85 : vector<2x128xf32>
    %127 = arith.addf %85, %105 : vector<2x128xf32>
    %128 = arith.addf %127, %112 : vector<2x128xf32>
    %129 = tpu.concatenate %120, %122 in 0 : vector<2x128xf32>, vector<2x128xf32> -> vector<4x128xf32>
    %c0_73 = arith.constant 0 : index
    %c0_74 = arith.constant 0 : index
    %130 = vector.load %arg12[%c0_73, %c0_74] : memref<1x128xf32, #tpu.memory_space<vmem>>, vector<1x128xf32>
    %131 = vector.broadcast %130 : vector<1x128xf32> to vector<4x128xf32>
    %132 = arith.mulf %129, %131 : vector<4x128xf32>
    %c0_75 = arith.constant 0 : index
    %c0_76 = arith.constant 0 : index
    %133 = vector.load %arg13[%c0_75, %c0_76] : memref<1x128xf32, #tpu.memory_space<vmem>>, vector<1x128xf32>
    %134 = vector.broadcast %133 : vector<1x128xf32> to vector<4x128xf32>
    %135 = arith.addf %132, %134 : vector<4x128xf32>
    %cst_77 = arith.constant 0.000000e+00 : f32
    %136 = vector.broadcast %cst_77 : f32 to vector<4x128xf32>
    %137 = arith.cmpf ogt, %135, %136 : vector<4x128xf32>
    %cst_78 = arith.constant 0.000000e+00 : f32
    %138 = vector.broadcast %cst_78 : f32 to vector<4x128xf32>
    %139 = arith.minimumf %135, %138 : vector<4x128xf32>
    %140 = math.exp %139 : vector<4x128xf32>
    %cst_79 = arith.constant 1.000000e+00 : f32
    %141 = vector.broadcast %cst_79 : f32 to vector<4x128xf32>
    %142 = arith.subf %140, %141 : vector<4x128xf32>
    %143 = arith.select %137, %135, %142 : vector<4x128xi1>, vector<4x128xf32>
    %144 = arith.truncf %143 : vector<4x128xf32> to vector<4x128xbf16>
    %c0_80 = arith.constant 0 : index
    %c0_81 = arith.constant 0 : index
    %145 = vector.load %arg14[%c0_80, %c0_81] : memref<128x128xbf16, #tpu.memory_space<vmem>>, vector<128x128xbf16>
    %cst_82 = arith.constant dense<0.000000e+00> : vector<4x128xf32>
    %146 = tpu.matmul %144, %145, %cst_82 {dimension_numbers = #tpu.dot_dimension_numbers<[1], [0], [0], [1], [0, 0, 1, 1], [], []>} : vector<4x128xbf16>, vector<128x128xbf16>, vector<4x128xf32> -> vector<4x128xf32>
    %c0_83 = arith.constant 0 : index
    %c0_84 = arith.constant 0 : index
    %147 = vector.load %arg15[%c0_83, %c0_84] : memref<1x128xf32, #tpu.memory_space<vmem>>, vector<1x128xf32>
    %148 = vector.broadcast %147 : vector<1x128xf32> to vector<4x128xf32>
    %149 = arith.addf %146, %148 : vector<4x128xf32>
    %c0_85 = arith.constant 0 : index
    %c0_86 = arith.constant 0 : index
    %150 = vector.load %arg16[%c0_85, %c0_86] : memref<1x128xf32, #tpu.memory_space<vmem>>, vector<1x128xf32>
    %151 = vector.broadcast %150 : vector<1x128xf32> to vector<4x128xf32>
    %152 = arith.mulf %149, %151 : vector<4x128xf32>
    %c0_87 = arith.constant 0 : index
    %c0_88 = arith.constant 0 : index
    %153 = vector.load %arg17[%c0_87, %c0_88] : memref<1x128xf32, #tpu.memory_space<vmem>>, vector<1x128xf32>
    %154 = vector.broadcast %153 : vector<1x128xf32> to vector<4x128xf32>
    %155 = arith.addf %152, %154 : vector<4x128xf32>
    %cst_89 = arith.constant 0.000000e+00 : f32
    %156 = vector.broadcast %cst_89 : f32 to vector<4x128xf32>
    %157 = arith.cmpf ogt, %155, %156 : vector<4x128xf32>
    %cst_90 = arith.constant 0.000000e+00 : f32
    %158 = vector.broadcast %cst_90 : f32 to vector<4x128xf32>
    %159 = arith.minimumf %155, %158 : vector<4x128xf32>
    %160 = math.exp %159 : vector<4x128xf32>
    %cst_91 = arith.constant 1.000000e+00 : f32
    %161 = vector.broadcast %cst_91 : f32 to vector<4x128xf32>
    %162 = arith.subf %160, %161 : vector<4x128xf32>
    %163 = arith.select %157, %155, %162 : vector<4x128xi1>, vector<4x128xf32>
    %164 = arith.truncf %163 : vector<4x128xf32> to vector<4x128xbf16>
    %c0_92 = arith.constant 0 : index
    %c0_93 = arith.constant 0 : index
    %165 = vector.load %arg18[%c0_92, %c0_93] : memref<128x8xbf16, #tpu.memory_space<vmem>>, vector<128x8xbf16>
    %cst_94 = arith.constant dense<0.000000e+00> : vector<4x8xf32>
    %166 = tpu.matmul %164, %165, %cst_94 {dimension_numbers = #tpu.dot_dimension_numbers<[1], [0], [0], [1], [0, 0, 1, 1], [], []>} : vector<4x128xbf16>, vector<128x8xbf16>, vector<4x8xf32> -> vector<4x8xf32>
    %c0_95 = arith.constant 0 : index
    %c0_96 = arith.constant 0 : index
    %167 = vector.load %arg19[%c0_95, %c0_96] : memref<1x8xf32, #tpu.memory_space<vmem>>, vector<1x8xf32>
    %168 = vector.broadcast %167 : vector<1x8xf32> to vector<4x8xf32>
    %169 = arith.addf %166, %168 : vector<4x8xf32>
    %170 = tpu.concatenate %123, %125 in 0 : vector<2x128xf32>, vector<2x128xf32> -> vector<4x128xf32>
    %c0_97 = arith.constant 0 : index
    %c0_98 = arith.constant 0 : index
    %171 = vector.load %arg20[%c0_97, %c0_98] : memref<1x128xf32, #tpu.memory_space<vmem>>, vector<1x128xf32>
    %172 = vector.broadcast %171 : vector<1x128xf32> to vector<4x128xf32>
    %173 = arith.mulf %170, %172 : vector<4x128xf32>
    %c0_99 = arith.constant 0 : index
    %c0_100 = arith.constant 0 : index
    %174 = vector.load %arg21[%c0_99, %c0_100] : memref<1x128xf32, #tpu.memory_space<vmem>>, vector<1x128xf32>
    %175 = vector.broadcast %174 : vector<1x128xf32> to vector<4x128xf32>
    %176 = arith.addf %173, %175 : vector<4x128xf32>
    %cst_101 = arith.constant 0.000000e+00 : f32
    %177 = vector.broadcast %cst_101 : f32 to vector<4x128xf32>
    %178 = arith.cmpf ogt, %176, %177 : vector<4x128xf32>
    %cst_102 = arith.constant 0.000000e+00 : f32
    %179 = vector.broadcast %cst_102 : f32 to vector<4x128xf32>
    %180 = arith.minimumf %176, %179 : vector<4x128xf32>
    %181 = math.exp %180 : vector<4x128xf32>
    %cst_103 = arith.constant 1.000000e+00 : f32
    %182 = vector.broadcast %cst_103 : f32 to vector<4x128xf32>
    %183 = arith.subf %181, %182 : vector<4x128xf32>
    %184 = arith.select %178, %176, %183 : vector<4x128xi1>, vector<4x128xf32>
    %185 = arith.truncf %184 : vector<4x128xf32> to vector<4x128xbf16>
    %c0_104 = arith.constant 0 : index
    %c0_105 = arith.constant 0 : index
    %186 = vector.load %arg22[%c0_104, %c0_105] : memref<128x128xbf16, #tpu.memory_space<vmem>>, vector<128x128xbf16>
    %cst_106 = arith.constant dense<0.000000e+00> : vector<4x128xf32>
    %187 = tpu.matmul %185, %186, %cst_106 {dimension_numbers = #tpu.dot_dimension_numbers<[1], [0], [0], [1], [0, 0, 1, 1], [], []>} : vector<4x128xbf16>, vector<128x128xbf16>, vector<4x128xf32> -> vector<4x128xf32>
    %c0_107 = arith.constant 0 : index
    %c0_108 = arith.constant 0 : index
    %188 = vector.load %arg23[%c0_107, %c0_108] : memref<1x128xf32, #tpu.memory_space<vmem>>, vector<1x128xf32>
    %189 = vector.broadcast %188 : vector<1x128xf32> to vector<4x128xf32>
    %190 = arith.addf %187, %189 : vector<4x128xf32>
    %c0_109 = arith.constant 0 : index
    %c0_110 = arith.constant 0 : index
    %191 = vector.load %arg24[%c0_109, %c0_110] : memref<1x128xf32, #tpu.memory_space<vmem>>, vector<1x128xf32>
    %192 = vector.broadcast %191 : vector<1x128xf32> to vector<4x128xf32>
    %193 = arith.mulf %190, %192 : vector<4x128xf32>
    %c0_111 = arith.constant 0 : index
    %c0_112 = arith.constant 0 : index
    %194 = vector.load %arg25[%c0_111, %c0_112] : memref<1x128xf32, #tpu.memory_space<vmem>>, vector<1x128xf32>
    %195 = vector.broadcast %194 : vector<1x128xf32> to vector<4x128xf32>
    %196 = arith.addf %193, %195 : vector<4x128xf32>
    %cst_113 = arith.constant 0.000000e+00 : f32
    %197 = vector.broadcast %cst_113 : f32 to vector<4x128xf32>
    %198 = arith.cmpf ogt, %196, %197 : vector<4x128xf32>
    %cst_114 = arith.constant 0.000000e+00 : f32
    %199 = vector.broadcast %cst_114 : f32 to vector<4x128xf32>
    %200 = arith.minimumf %196, %199 : vector<4x128xf32>
    %201 = math.exp %200 : vector<4x128xf32>
    %cst_115 = arith.constant 1.000000e+00 : f32
    %202 = vector.broadcast %cst_115 : f32 to vector<4x128xf32>
    %203 = arith.subf %201, %202 : vector<4x128xf32>
    %204 = arith.select %198, %196, %203 : vector<4x128xi1>, vector<4x128xf32>
    %205 = arith.truncf %204 : vector<4x128xf32> to vector<4x128xbf16>
    %c0_116 = arith.constant 0 : index
    %c0_117 = arith.constant 0 : index
    %206 = vector.load %arg26[%c0_116, %c0_117] : memref<128x8xbf16, #tpu.memory_space<vmem>>, vector<128x8xbf16>
    %cst_118 = arith.constant dense<0.000000e+00> : vector<4x8xf32>
    %207 = tpu.matmul %205, %206, %cst_118 {dimension_numbers = #tpu.dot_dimension_numbers<[1], [0], [0], [1], [0, 0, 1, 1], [], []>} : vector<4x128xbf16>, vector<128x8xbf16>, vector<4x8xf32> -> vector<4x8xf32>
    %c0_119 = arith.constant 0 : index
    %c0_120 = arith.constant 0 : index
    %208 = vector.load %arg27[%c0_119, %c0_120] : memref<1x8xf32, #tpu.memory_space<vmem>>, vector<1x8xf32>
    %209 = vector.broadcast %208 : vector<1x8xf32> to vector<4x8xf32>
    %210 = arith.addf %207, %209 : vector<4x8xf32>
    %211 = tpu.concatenate %126, %128 in 0 : vector<2x128xf32>, vector<2x128xf32> -> vector<4x128xf32>
    %c0_121 = arith.constant 0 : index
    %c0_122 = arith.constant 0 : index
    %212 = vector.load %arg28[%c0_121, %c0_122] : memref<1x128xf32, #tpu.memory_space<vmem>>, vector<1x128xf32>
    %213 = vector.broadcast %212 : vector<1x128xf32> to vector<4x128xf32>
    %214 = arith.mulf %211, %213 : vector<4x128xf32>
    %c0_123 = arith.constant 0 : index
    %c0_124 = arith.constant 0 : index
    %215 = vector.load %arg29[%c0_123, %c0_124] : memref<1x128xf32, #tpu.memory_space<vmem>>, vector<1x128xf32>
    %216 = vector.broadcast %215 : vector<1x128xf32> to vector<4x128xf32>
    %217 = arith.addf %214, %216 : vector<4x128xf32>
    %cst_125 = arith.constant 0.000000e+00 : f32
    %218 = vector.broadcast %cst_125 : f32 to vector<4x128xf32>
    %219 = arith.cmpf ogt, %217, %218 : vector<4x128xf32>
    %cst_126 = arith.constant 0.000000e+00 : f32
    %220 = vector.broadcast %cst_126 : f32 to vector<4x128xf32>
    %221 = arith.minimumf %217, %220 : vector<4x128xf32>
    %222 = math.exp %221 : vector<4x128xf32>
    %cst_127 = arith.constant 1.000000e+00 : f32
    %223 = vector.broadcast %cst_127 : f32 to vector<4x128xf32>
    %224 = arith.subf %222, %223 : vector<4x128xf32>
    %225 = arith.select %219, %217, %224 : vector<4x128xi1>, vector<4x128xf32>
    %226 = arith.truncf %225 : vector<4x128xf32> to vector<4x128xbf16>
    %c0_128 = arith.constant 0 : index
    %c0_129 = arith.constant 0 : index
    %227 = vector.load %arg30[%c0_128, %c0_129] : memref<128x128xbf16, #tpu.memory_space<vmem>>, vector<128x128xbf16>
    %cst_130 = arith.constant dense<0.000000e+00> : vector<4x128xf32>
    %228 = tpu.matmul %226, %227, %cst_130 {dimension_numbers = #tpu.dot_dimension_numbers<[1], [0], [0], [1], [0, 0, 1, 1], [], []>} : vector<4x128xbf16>, vector<128x128xbf16>, vector<4x128xf32> -> vector<4x128xf32>
    %c0_131 = arith.constant 0 : index
    %c0_132 = arith.constant 0 : index
    %229 = vector.load %arg31[%c0_131, %c0_132] : memref<1x128xf32, #tpu.memory_space<vmem>>, vector<1x128xf32>
    %230 = vector.broadcast %229 : vector<1x128xf32> to vector<4x128xf32>
    %231 = arith.addf %228, %230 : vector<4x128xf32>
    %c0_133 = arith.constant 0 : index
    %c0_134 = arith.constant 0 : index
    %232 = vector.load %arg32[%c0_133, %c0_134] : memref<1x128xf32, #tpu.memory_space<vmem>>, vector<1x128xf32>
    %233 = vector.broadcast %232 : vector<1x128xf32> to vector<4x128xf32>
    %234 = arith.mulf %231, %233 : vector<4x128xf32>
    %c0_135 = arith.constant 0 : index
    %c0_136 = arith.constant 0 : index
    %235 = vector.load %arg33[%c0_135, %c0_136] : memref<1x128xf32, #tpu.memory_space<vmem>>, vector<1x128xf32>
    %236 = vector.broadcast %235 : vector<1x128xf32> to vector<4x128xf32>
    %237 = arith.addf %234, %236 : vector<4x128xf32>
    %cst_137 = arith.constant 0.000000e+00 : f32
    %238 = vector.broadcast %cst_137 : f32 to vector<4x128xf32>
    %239 = arith.cmpf ogt, %237, %238 : vector<4x128xf32>
    %cst_138 = arith.constant 0.000000e+00 : f32
    %240 = vector.broadcast %cst_138 : f32 to vector<4x128xf32>
    %241 = arith.minimumf %237, %240 : vector<4x128xf32>
    %242 = math.exp %241 : vector<4x128xf32>
    %cst_139 = arith.constant 1.000000e+00 : f32
    %243 = vector.broadcast %cst_139 : f32 to vector<4x128xf32>
    %244 = arith.subf %242, %243 : vector<4x128xf32>
    %245 = arith.select %239, %237, %244 : vector<4x128xi1>, vector<4x128xf32>
    %246 = arith.truncf %245 : vector<4x128xf32> to vector<4x128xbf16>
    %c0_140 = arith.constant 0 : index
    %c0_141 = arith.constant 0 : index
    %247 = vector.load %arg34[%c0_140, %c0_141] : memref<128x8xbf16, #tpu.memory_space<vmem>>, vector<128x8xbf16>
    %cst_142 = arith.constant dense<0.000000e+00> : vector<4x8xf32>
    %248 = tpu.matmul %246, %247, %cst_142 {dimension_numbers = #tpu.dot_dimension_numbers<[1], [0], [0], [1], [0, 0, 1, 1], [], []>} : vector<4x128xbf16>, vector<128x8xbf16>, vector<4x8xf32> -> vector<4x8xf32>
    %c0_143 = arith.constant 0 : index
    %c0_144 = arith.constant 0 : index
    %249 = vector.load %arg35[%c0_143, %c0_144] : memref<1x8xf32, #tpu.memory_space<vmem>>, vector<1x8xf32>
    %250 = vector.broadcast %249 : vector<1x8xf32> to vector<4x8xf32>
    %251 = arith.addf %248, %250 : vector<4x8xf32>
    %252 = tpu.concatenate %120, %122, %123, %125, %126, %128 in 1 : vector<2x128xf32>, vector<2x128xf32>, vector<2x128xf32>, vector<2x128xf32>, vector<2x128xf32>, vector<2x128xf32> -> vector<2x768xf32>
    %c0_145 = arith.constant 0 : index
    %c0_146 = arith.constant 0 : index
    %253 = vector.load %arg36[%c0_145, %c0_146] : memref<1x768xf32, #tpu.memory_space<vmem>>, vector<1x768xf32>
    %254 = vector.broadcast %253 : vector<1x768xf32> to vector<2x768xf32>
    %255 = arith.mulf %252, %254 : vector<2x768xf32>
    %c0_147 = arith.constant 0 : index
    %c0_148 = arith.constant 0 : index
    %256 = vector.load %arg37[%c0_147, %c0_148] : memref<1x768xf32, #tpu.memory_space<vmem>>, vector<1x768xf32>
    %257 = vector.broadcast %256 : vector<1x768xf32> to vector<2x768xf32>
    %258 = arith.addf %255, %257 : vector<2x768xf32>
    %cst_149 = arith.constant 0.000000e+00 : f32
    %259 = vector.broadcast %cst_149 : f32 to vector<2x768xf32>
    %260 = arith.cmpf ogt, %258, %259 : vector<2x768xf32>
    %cst_150 = arith.constant 0.000000e+00 : f32
    %261 = vector.broadcast %cst_150 : f32 to vector<2x768xf32>
    %262 = arith.minimumf %258, %261 : vector<2x768xf32>
    %263 = math.exp %262 : vector<2x768xf32>
    %cst_151 = arith.constant 1.000000e+00 : f32
    %264 = vector.broadcast %cst_151 : f32 to vector<2x768xf32>
    %265 = arith.subf %263, %264 : vector<2x768xf32>
    %266 = arith.select %260, %258, %265 : vector<2x768xi1>, vector<2x768xf32>
    %267 = arith.truncf %266 : vector<2x768xf32> to vector<2x768xbf16>
    %c0_152 = arith.constant 0 : index
    %c0_153 = arith.constant 0 : index
    %268 = vector.load %arg38[%c0_152, %c0_153] : memref<768x128xbf16, #tpu.memory_space<vmem>>, vector<768x128xbf16>
    %cst_154 = arith.constant dense<0.000000e+00> : vector<2x128xf32>
    %269 = tpu.matmul %267, %268, %cst_154 {dimension_numbers = #tpu.dot_dimension_numbers<[1], [0], [0], [1], [0, 0, 1, 1], [], []>} : vector<2x768xbf16>, vector<768x128xbf16>, vector<2x128xf32> -> vector<2x128xf32>
    %c0_155 = arith.constant 0 : index
    %c0_156 = arith.constant 0 : index
    %270 = vector.load %arg39[%c0_155, %c0_156] : memref<1x128xf32, #tpu.memory_space<vmem>>, vector<1x128xf32>
    %271 = vector.broadcast %270 : vector<1x128xf32> to vector<2x128xf32>
    %272 = arith.addf %269, %271 : vector<2x128xf32>
    %c0_157 = arith.constant 0 : index
    %c0_158 = arith.constant 0 : index
    %273 = vector.load %arg40[%c0_157, %c0_158] : memref<1x128xf32, #tpu.memory_space<vmem>>, vector<1x128xf32>
    %274 = vector.broadcast %273 : vector<1x128xf32> to vector<2x128xf32>
    %275 = arith.mulf %272, %274 : vector<2x128xf32>
    %c0_159 = arith.constant 0 : index
    %c0_160 = arith.constant 0 : index
    %276 = vector.load %arg41[%c0_159, %c0_160] : memref<1x128xf32, #tpu.memory_space<vmem>>, vector<1x128xf32>
    %277 = vector.broadcast %276 : vector<1x128xf32> to vector<2x128xf32>
    %278 = arith.addf %275, %277 : vector<2x128xf32>
    %cst_161 = arith.constant 0.000000e+00 : f32
    %279 = vector.broadcast %cst_161 : f32 to vector<2x128xf32>
    %280 = arith.cmpf ogt, %278, %279 : vector<2x128xf32>
    %cst_162 = arith.constant 0.000000e+00 : f32
    %281 = vector.broadcast %cst_162 : f32 to vector<2x128xf32>
    %282 = arith.minimumf %278, %281 : vector<2x128xf32>
    %283 = math.exp %282 : vector<2x128xf32>
    %cst_163 = arith.constant 1.000000e+00 : f32
    %284 = vector.broadcast %cst_163 : f32 to vector<2x128xf32>
    %285 = arith.subf %283, %284 : vector<2x128xf32>
    %286 = arith.select %280, %278, %285 : vector<2x128xi1>, vector<2x128xf32>
    %287 = arith.truncf %286 : vector<2x128xf32> to vector<2x128xbf16>
    %c0_164 = arith.constant 0 : index
    %c0_165 = arith.constant 0 : index
    %288 = vector.load %arg42[%c0_164, %c0_165] : memref<128x8xbf16, #tpu.memory_space<vmem>>, vector<128x8xbf16>
    %cst_166 = arith.constant dense<0.000000e+00> : vector<2x8xf32>
    %289 = tpu.matmul %287, %288, %cst_166 {dimension_numbers = #tpu.dot_dimension_numbers<[1], [0], [0], [1], [0, 0, 1, 1], [], []>} : vector<2x128xbf16>, vector<128x8xbf16>, vector<2x8xf32> -> vector<2x8xf32>
    %c0_167 = arith.constant 0 : index
    %c0_168 = arith.constant 0 : index
    %290 = vector.load %arg43[%c0_167, %c0_168] : memref<1x8xf32, #tpu.memory_space<vmem>>, vector<1x8xf32>
    %291 = vector.broadcast %290 : vector<1x8xf32> to vector<2x8xf32>
    %292 = arith.addf %289, %291 : vector<2x8xf32>
    %293 = tpu.concatenate %169, %210, %251, %292 in 0 : vector<4x8xf32>, vector<4x8xf32>, vector<4x8xf32>, vector<2x8xf32> -> vector<14x8xf32>
    %c0_169 = arith.constant 0 : index
    %c0_170 = arith.constant 0 : index
    %294 = vector.load %arg44[%c0_169, %c0_170] : memref<14x8xf32, #tpu.memory_space<vmem>>, vector<14x8xf32>
    tpu.vector_store %arg44[%c0_169, %c0_170], %293 {strides = array<i32>} : memref<14x8xf32, #tpu.memory_space<vmem>>, vector<14x8xf32>,
    return
  }
}

</mosaic_0001>

<bundles_post_ra>
// kernel: pmgi_v8_forward.1
= control target key start
LH: loop header
LB: loop body
LE: loop exit
PB: predicated region body
PF: predicated region fallthrough
CT: control target
= control target key end

     0   :  { %s8854_s6 = smov 1   ;;  %s8855_s10 = smov 2   ;;  %s10818_s0 = inlined_call_operand.smem [shape: u32[45], index: -1, kind: input, shape index: {}] }
   0x1   :  { %s8921_s5 = sld [smem:[%s10818_s0]]   ;;  %s8856_s14 = smov 3  }
   0x2   :  { %s8926_s9 = sld [smem:[%s10818_s0 + %s8854_s6]]   ;;  %s8857_s18 = smov 4  }
   0x3   :  { %s8931_s13 = sld [smem:[%s10818_s0 + %s8855_s10]]   ;;  %s8858_s22 = smov 5  }
   0x4   :  { %s8936_s17 = sld [smem:[%s10818_s0 + %s8856_s14]]   ;;  %s8859_s26 = smov 6  }
   0x5   :  { %s8941_s21 = sld [smem:[%s10818_s0 + %s8857_s18]]   ;;  %s8860_s30 = smov 7  }
   0x6   :  { %s8946_s25 = sld [smem:[%s10818_s0 + %s8858_s22]]   ;;  %s8861_s4 = smov 8  }
   0x7   :  { %s8951_s29 = sld [smem:[%s10818_s0 + %s8859_s26]]   ;;  %s8862_s10 = smov 9  }
   0x8   :  { %s8956_s3 = sld [smem:[%s10818_s0 + %s8860_s30]]   ;;  %s8863_s15 = smov 10  }
   0x9   :  { %s8961_s8 = sld [smem:[%s10818_s0 + %s8861_s4]]   ;;  %s8864_s20 = smov 11  }
   0xa   :  { %s8966_s14 = sld [smem:[%s10818_s0 + %s8862_s10]]   ;;  %s8865_s26 = smov 12  }
   0xb   :  { %s8971_s19 = sld [smem:[%s10818_s0 + %s8863_s15]]   ;;  %s8866_s1 = smov 13  }
   0xc   :  { %s8976_s24 = sld [smem:[%s10818_s0 + %s8864_s20]]   ;;  %s8867_s7 = smov 14  }
   0xd   :  { %s8981_s30 = sld [smem:[%s10818_s0 + %s8865_s26]]   ;;  %s8868_s15 = smov 15  }
   0xe   :  { %s8986_s6 = sld [smem:[%s10818_s0 + %s8866_s1]]   ;;  %s8869_s22 = smov 16  }
   0xf   :  { %s8991_s12 = sld [smem:[%s10818_s0 + %s8867_s7]]   ;;  %s8870_s28 = smov 17  }
  0x10   :  { %s8996_s20 = sld [smem:[%s10818_s0 + %s8868_s15]]   ;;  %s8871_s7 = smov 18  }
  0x11   :  { %s9001_s27 = sld [smem:[%s10818_s0 + %s8869_s22]]   ;;  %s8872_s15 = smov 19  }
  0x12   :  { %10847 = sst [smem:[#allocation14_spill]] %s8976_s24  ;;  %s8873_s22 = smov 20  }
  0x13   :  { %10848 = sst [smem:[#allocation15_spill]] %s8981_s30 }
  0x14   :  { %10849 = sst [smem:[#allocation16_spill]] %s8986_s6 }
  0x15   :  { %s9006_s4 = sld [smem:[%s10818_s0 + %s8870_s28]]   ;;  %s8874_s28 = smov 21  }
  0x16   :  { %10850 = sst [smem:[#allocation17_spill]] %s8996_s20 }
  0x17   :  { %10851 = sst [smem:[#allocation18_spill]] %s9001_s27 }
  0x18   :  { %s9011_s6 = sld [smem:[%s10818_s0 + %s8871_s7]]   ;;  %s8875_s7 = smov 22  }
  0x19   :  { %s9016_s20 = sld [smem:[%s10818_s0 + %s8872_s15]]   ;;  %s8876_s15 = smov 23  }
  0x1a   :  { %s9021_s27 = sld [smem:[%s10818_s0 + %s8873_s22]]   ;;  %s8877_s22 = smov 24  }
  0x1b   :  { %10852 = sst [smem:[#allocation19_spill]] %s9006_s4 }
  0x1c   :  { %s9026_s4 = sld [smem:[%s10818_s0 + %s8874_s28]]   ;;  %s8878_s28 = smov 25  }
  0x1e   :  { %10853 = sst [smem:[#allocation20_spill]] %s9011_s6 }
  0x1f   :  { %10854 = sst [smem:[#allocation21_spill]] %s9016_s20 }
  0x20   :  { %10855 = sst [smem:[#allocation22_spill]] %s9021_s27 }
  0x21   :  { %s9031_s6 = sld [smem:[%s10818_s0 + %s8875_s7]]   ;;  %s8879_s7 = smov 26  }
  0x22   :  { %10856 = sst [smem:[#allocation23_spill]] %s9026_s4 }
  0x23   :  { %s9036_s20 = sld [smem:[%s10818_s0 + %s8876_s15]]   ;;  %s8880_s15 = smov 27  }
  0x24   :  { %s9041_s27 = sld [smem:[%s10818_s0 + %s8877_s22]]   ;;  %s8881_s22 = smov 28  }
  0x25   :  { %s9046_s4 = sld [smem:[%s10818_s0 + %s8878_s28]]   ;;  %s8882_s28 = smov 29  }
  0x27   :  { %10857 = sst [smem:[#allocation24_spill]] %s9031_s6 }
  0x28   :  { %s9051_s6 = sld [smem:[%s10818_s0 + %s8879_s7]]   ;;  %s8883_s7 = smov 30  }
  0x29   :  { %10858 = sst [smem:[#allocation25_spill]] %s9036_s20 }
  0x2a   :  { %10859 = sst [smem:[#allocation26_spill]] %s9041_s27 }
  0x2b   :  { %10860 = sst [smem:[#allocation27_spill]] %s9046_s4 }
  0x2c   :  { %s9056_s20 = sld [smem:[%s10818_s0 + %s8880_s15]]   ;;  %s8884_s15 = smov 31  }
  0x2d   :  { %s9061_s27 = sld [smem:[%s10818_s0 + %s8881_s22]]   ;;  %s8885_s22 = smov 32  }
  0x2e   :  { %10861 = sst [smem:[#allocation28_spill]] %s9051_s6 }
  0x2f   :  { %s9066_s4 = sld [smem:[%s10818_s0 + %s8882_s28]]   ;;  %s8886_s28 = smov 33  }
  0x30   :  { %s9071_s6 = sld [smem:[%s10818_s0 + %s8883_s7]]   ;;  %s8887_s7 = smov 34  }
  0x32   :  { %10862 = sst [smem:[#allocation29_spill]] %s9056_s20 }
  0x33   :  { %10863 = sst [smem:[#allocation30_spill]] %s9061_s27 }
  0x34   :  { %s9076_s20 = sld [smem:[%s10818_s0 + %s8884_s15]]   ;;  %s8888_s15 = smov 35  }
  0x35   :  { %10864 = sst [smem:[#allocation31_spill]] %s9066_s4 }
  0x36   :  { %10865 = sst [smem:[#allocation32_spill]] %s9071_s6 }
  0x37   :  { %s9081_s27 = sld [smem:[%s10818_s0 + %s8885_s22]]   ;;  %s8889_s22 = smov 36  }
  0x38   :  { %s9086_s4 = sld [smem:[%s10818_s0 + %s8886_s28]]   ;;  %s8890_s28 = smov 37  }
  0x39   :  { %s9091_s6 = sld [smem:[%s10818_s0 + %s8887_s7]]   ;;  %s8891_s7 = smov 38  }
  0x3a   :  { %10866 = sst [smem:[#allocation33_spill]] %s9076_s20 }
  0x3b   :  { %s9096_s20 = sld [smem:[%s10818_s0 + %s8888_s15]]   ;;  %s8892_s15 = smov 39  }
  0x3d   :  { %10867 = sst [smem:[#allocation34_spill]] %s9081_s27 }
  0x3e   :  { %10868 = sst [smem:[#allocation35_spill]] %s9086_s4 }
  0x3f   :  { %10869 = sst [smem:[#allocation36_spill]] %s9091_s6 }
  0x40   :  { %s9101_s27 = sld [smem:[%s10818_s0 + %s8889_s22]]   ;;  %s8893_s22 = smov 40  }
  0x41   :  { %10870 = sst [smem:[#allocation37_spill]] %s9096_s20 }
  0x42   :  { %s9106_s4 = sld [smem:[%s10818_s0 + %s8890_s28]]   ;;  %s8894_s28 = smov 41  }
  0x43   :  { %s9111_s6 = sld [smem:[%s10818_s0 + %s8891_s7]]   ;;  %s8895_s7 = smov 42  }
  0x44   :  { %s9116_s20 = sld [smem:[%s10818_s0 + %s8892_s15]]   ;;  %s8896_s15 = smov 43  }
  0x45   :  { %s9121_s30 = sld [smem:[%s10818_s0 + %s8893_s22]]   ;;  %s8897_s22 = smov 44  }
  0x46   :  { %10871 = sst [smem:[#allocation38_spill]] %s9101_s27 }
  0x47   :  { %s9126_s24 = sld [smem:[%s10818_s0 + %s8894_s28]]  }
  0x48   :  { %10872 = sst [smem:[#allocation39_spill]] %s9106_s4 }
  0x49   :  { %10873 = sst [smem:[#allocation40_spill]] %s9111_s6 }
  0x4a   :  { %s9131_s6 = sld [smem:[%s10818_s0 + %s8895_s7]]  }
  0x4b   :  { %s9136_s4 = sld [smem:[%s10818_s0 + %s8896_s15]]  }
  0x4c   :  { %s9141_s27 = sld [smem:[%s10818_s0 + %s8897_s22]]  }
  0x4d   :  { %94 = vsyncpa [#allocation5], 0 }
  0x4e   :  { %95 = vsyncpa [#allocation7], 0 }
  0x4f   :  { %96 = vsyncpa [#allocation10], 0  ;;  %s8898_s28 = smov [#allocation6]   ;;  %s8899_s2 = smov [#allocation4]  }
  0x50   :  { %s191_s1 = sshll.u32 %s8898_s28, 4  ;;  %s181_s7 = sshll.u32 %s8899_s2, 4  ;;  %s192_s1 = int_to_ptr.vmem [resolvable:$true] %s191_s1  ;;  %s182_s7 = int_to_ptr.vmem [resolvable:$true] %s181_s7 }
  0x51   :  { %s8760_s10 = scalar_lea.hbm %s9121_s30, 16 }
  0x52   :  { %p8761_p0 = scmp.ne.s32.totalorder %s9121_s30, %s8760_s10  ;;  %p8764_p1 = scmp.lt.u32.totalorder %s8760_s10, %s9121_s30 }
  0x54   :  { %p8766_p2 = pnand %p8764_p1, %p8761_p0 }
  0x56   :  { %8769 = shalt.err (!%p8766_p2)
}
  0x57   :  { %s8770_s11 = scalar_lea.vmem %s192_s1, 16  ;;  %s8774_s0 = scalar_lea.vmem %s192_s1, 32 }
  0x58   :  { %p8771_p3 = scmp.ne.s32.totalorder %s192_s1, %s8770_s11  ;;  %p8775_p4 = scmp.lt.s32.totalorder %s192_s1, %s192_s1 }
  0x59   :  { %p8776_p5 = scmp.lt.s32.totalorder %s8774_s0, %s8770_s11 }
  0x5b   :  { %p8777_p6 = por %p8776_p5, %p8775_p4 }
  0x5d   :  { %p8778_p7 = pnand %p8777_p6, %p8771_p3 }
  0x5f   :  { %8781 = shalt.err (!%p8778_p7)
}
  0x60   :  { %194 = dma.hbm_to_vmem [thread:$0]  %s9121_s30, 16, %s192_s1, [#allocation7]  }
  0x61   :  { %s8782_s15 = scalar_lea.hbm %s9116_s20, 16 }
  0x62   :  { %p8783_p8 = scmp.ne.s32.totalorder %s9116_s20, %s8782_s15  ;;  %p8786_p9 = scmp.lt.u32.totalorder %s8782_s15, %s9116_s20 }
  0x64   :  { %p8788_p10 = pnand %p8786_p9, %p8783_p8 }
  0x66   :  { %8791 = shalt.err (!%p8788_p10)
}
  0x67   :  { %s8792_s16 = scalar_lea.vmem %s182_s7, 16  ;;  %s8796_s18 = scalar_lea.vmem %s182_s7, 32 }
  0x68   :  { %p8793_p11 = scmp.ne.s32.totalorder %s182_s7, %s8792_s16  ;;  %p8797_p12 = scmp.lt.s32.totalorder %s182_s7, %s182_s7 }
  0x69   :  { %p8798_p13 = scmp.lt.s32.totalorder %s8796_s18, %s8792_s16 }
  0x6b   :  { %p8799_p0 = por %p8798_p13, %p8797_p12 }
  0x6d   :  { %p8800_p1 = pnand %p8799_p0, %p8793_p11 }
  0x6f   :  { %8803 = shalt.err (!%p8800_p1)
}
  0x70   :  { %184 = dma.hbm_to_vmem [thread:$0]  %s9116_s20, 16, %s182_s7, [#allocation5]  }
  0x71   :  { %s8900_s22 = smov [#allocation8]   ;;  %s8901_s23 = smov [#allocation9]  }
  0x72   :  { %s201_s30 = sshll.u32 %s8900_s22, 4  ;;  %s213_s26 = sshll.u32 %s8901_s23, 4  ;;  %s202_s30 = int_to_ptr.vmem [resolvable:$true] %s201_s30  ;;  %s214_s26 = int_to_ptr.vmem [resolvable:$true] %s213_s26 }
  0x73   :  { %s8804_s28 = scalar_lea.hbm %s9126_s24, 16 }
  0x74   :  { %p8805_p2 = scmp.ne.s32.totalorder %s9126_s24, %s8804_s28  ;;  %p8808_p3 = scmp.lt.u32.totalorder %s8804_s28, %s9126_s24 }
  0x76   :  { %p8810_p4 = pnand %p8808_p3, %p8805_p2 }
  0x78   :  { %8813 = shalt.err (!%p8810_p4)
}
  0x79   :  { %s8814_s1 = scalar_lea.vmem %s202_s30, 16  ;;  %s8818_s2 = scalar_lea.vmem %s202_s30, 32 }
  0x7a   :  { %p8815_p5 = scmp.ne.s32.totalorder %s202_s30, %s8814_s1  ;;  %p8819_p6 = scmp.lt.s32.totalorder %s202_s30, %s202_s30 }
  0x7b   :  { %p8820_p7 = scmp.lt.s32.totalorder %s8818_s2, %s8814_s1 }
  0x7d   :  { %p8821_p8 = por %p8820_p7, %p8819_p6 }
  0x7f   :  { %p8822_p9 = pnand %p8821_p8, %p8815_p5 }
  0x81   :  { %8825 = shalt.err (!%p8822_p9)
}
  0x82   :  { %204 = dma.hbm_to_vmem [thread:$0]  %s9126_s24, 16, %s202_s30, [#allocation7]  }
  0x83   :  { %s8826_s20 = scalar_lea.hbm %s9136_s4, 16 }
  0x84   :  { %p8827_p10 = scmp.ne.s32.totalorder %s9136_s4, %s8826_s20  ;;  %p8830_p11 = scmp.lt.u32.totalorder %s8826_s20, %s9136_s4 }
  0x86   :  { %p8832_p12 = pnand %p8830_p11, %p8827_p10 }
  0x88   :  { %8835 = shalt.err (!%p8832_p12)
}
  0x89   :  { %s8836_s7 = scalar_lea.vmem %s214_s26, 16  ;;  %s8840_s10 = scalar_lea.vmem %s214_s26, 32 }
  0x8a   :  { %p8837_p13 = scmp.ne.s32.totalorder %s214_s26, %s8836_s7  ;;  %p8841_p0 = scmp.lt.s32.totalorder %s214_s26, %s214_s26 }
  0x8b   :  { %p8842_p1 = scmp.lt.s32.totalorder %s8840_s10, %s8836_s7 }
  0x8d   :  { %p8843_p2 = por %p8842_p1, %p8841_p0 }
  0x8f   :  { %p8844_p3 = pnand %p8843_p2, %p8837_p13 }
  0x91   :  { %8847 = shalt.err (!%p8844_p3)
}
  0x92   :  { %216 = dma.hbm_to_vmem [thread:$0]  %s9136_s4, 16, %s214_s26, [#allocation10]  }
  0x93   :  { %8848 = dma.done.wait [#allocation5], 16  }
  0x94   :  { %8849 = vsyncadd [#allocation5], 4294967280 }
  0x95   :  { %8850 = dma.done.wait [#allocation7], 32  }
  0x96   :  { %8851 = vsyncadd [#allocation7], 4294967264 }
  0x97   :  { %8852 = dma.done.wait [#allocation10], 16  }
  0x98   :  { %8853 = vsyncadd [#allocation10], 4294967280  ;;  %v8902_v0 = vmov 0   ;;  %v9162_v1 = vld [vmem:[%s8926_s9] sm:$0xff]  ;;  %v9170_v6 = vld [vmem:[%s8926_s9 + $0x8] sm:$0xff]  ;;  %v8903_v12 = vmov 1  }
  0x99   :  { %8312 = vset.pattern.permute.xlu1 %v8902_v0  ;;  %8314 = vset.pattern.permute.xlu0 %v8902_v0  ;;  %v8372_v2 = vld [vmem:[%s8931_s13 + $0x40] sm:$0xff]   ;;  %v8376_v7 = vld [vmem:[%s8931_s13 + $0x48] sm:$0xff]   ;;  %v9178_v11 = vld [vmem:[%s8926_s9 + $0x18] sm:$0xff]  ;;  %v8904_v40 = vmov 3   ;;  %v8905_v53 = vmov 2   ;;  %vm8912_vm0 = vmmov 0  }
  0x9a   :  { %2568 = vperm.xlu1 %8312, %v9162_v1   ;;  %v8373_v3 = vld [vmem:[%s8931_s13 + $0xc0] sm:$0xff]   ;;  %7238 = vmatprep.subr.bf16.mxu0 %v8372_v2  ;;  %v8377_v8 = vld [vmem:[%s8931_s13 + $0xc8] sm:$0xff]   ;;  %v8380_v13 = vld [vmem:[%s8931_s13 + $0x50] sm:$0xff]   ;;  %vm4643_vm1 = vcmask 1041409   ;;  %vm5103_vm2 = vcmask 1043459   ;;  %vm5106_vm3 = vcmask 1041408  }
  0x9b   :  { %v8374_v4 = vld [vmem:[%s8931_s13] sm:$0xff]   ;;  %7290 = vmatprep.subr.bf16.mxu1 %v8373_v3  ;;  %v8378_v9 = vld [vmem:[%s8931_s13 + $0x8] sm:$0xff]   ;;  %v8381_v14 = vld [vmem:[%s8931_s13 + $0xd0] sm:$0xff]   ;;  %s11036_s24 = sld [smem:[#allocation32_spill]]  ;;  %s11038_s4 = sld [smem:[#allocation17_spill]] }
  0x9c   :  { %v8375_v5 = vld [vmem:[%s8931_s13 + $0x80] sm:$0xff]   ;;  %7239 = vmatpush3.bf16.msra.mxu0 %v8374_v4  ;;  %v8379_v10 = vld [vmem:[%s8931_s13 + $0x88] sm:$0xff]   ;;  %v8382_v15 = vld [vmem:[%s8931_s13 + $0x10] sm:$0xff]   ;;  %s11039_s11 = sld [smem:[#allocation18_spill]]  ;;  %s11040_s0 = sld [smem:[#allocation19_spill]] }
  0x9d   :  { %7291 = vmatpush3.bf16.msra.mxu1 %v8375_v5  ;;  %7240 = vmatprep.subr.bf16.mxu0 %v8376_v7  ;;  %v8383_v16 = vld [vmem:[%s8931_s13 + $0x90] sm:$0xff]   ;;  %v8384_v17 = vld [vmem:[%s8931_s13 + $0x58] sm:$0xff]   ;;  %v8388_v21 = vld [vmem:[%s8931_s13 + $0x60] sm:$0xff]   ;;  %s11041_s15 = sld [smem:[#allocation28_spill]]  ;;  %s11042_s16 = sld [smem:[#allocation25_spill]] }
  0x9e   :  { %2573 = vperm.xlu1 %8312, %v9170_v6   ;;  %7292 = vmatprep.subr.bf16.mxu1 %v8377_v8  ;;  %v8385_v18 = vld [vmem:[%s8931_s13 + $0xd8] sm:$0xff]   ;;  %v8389_v22 = vld [vmem:[%s8931_s13 + $0xe0] sm:$0xff]   ;;  %v8392_v26 = vld [vmem:[%s8931_s13 + $0x68] sm:$0xff]   ;;  %s11043_s18 = sld [smem:[#allocation26_spill]]  ;;  %s11044_s22 = sld [smem:[#allocation27_spill]] }
  0x9f   :  { %v8386_v19 = vld [vmem:[%s8931_s13 + $0x18] sm:$0xff]   ;;  %v9196_v23 = vld [vmem:[%s8926_s9 + $0x20] sm:$0xff]  ;;  %v8393_v27 = vld [vmem:[%s8931_s13 + $0xe8] sm:$0xff]   ;;  %s11045_s30 = sld [smem:[#allocation36_spill]]  ;;  %s11046_s23 = sld [smem:[#allocation33_spill]] }
  0xa0   :  { %7241 = vmatpush3.bf16.msra.mxu0 %v8378_v9  ;;  %v8387_v20 = vld [vmem:[%s8931_s13 + $0x98] sm:$0xff]   ;;  %v8390_v24 = vld [vmem:[%s8931_s13 + $0x20] sm:$0xff]   ;;  %v8394_v28 = vld [vmem:[%s8931_s13 + $0x28] sm:$0xff]   ;;  %s11047_s26 = sld [smem:[#allocation34_spill]]  ;;  %s11048_s28 = sld [smem:[#allocation35_spill]] }
  0xa1   :  { %7293 = vmatpush3.bf16.msra.mxu1 %v8379_v10  ;;  %7242 = vmatprep.subr.bf16.mxu0 %v8380_v13  ;;  %v8391_v25 = vld [vmem:[%s8931_s13 + $0xa0] sm:$0xff]   ;;  %v8395_v29 = vld [vmem:[%s8931_s13 + $0xa8] sm:$0xff]   ;;  %v8396_v30 = vld [vmem:[%s8931_s13 + $0x70] sm:$0xff]   ;;  %s11049_s1 = sld [smem:[#allocation29_spill]] }
  0xa2   :  { %8313 = vset.pattern.permute.xlu1 %v8903_v12  ;;  %7294 = vmatprep.subr.bf16.mxu1 %v8381_v14  ;;  %v8397_v31 = vld [vmem:[%s8931_s13 + $0xf0] sm:$0xff]   ;;  %v9212_v34 = vld [vmem:[%s8926_s9 + $0x28] sm:$0xff]  ;;  %v8400_v35 = vld [vmem:[%s8931_s13 + $0x78] sm:$0xff]   ;;  %s11050_s2 = sld [smem:[#allocation21_spill]] }
  0xa3   :  { %2691 = vperm.xlu1 %8313, %v9178_v11   ;;  %v8398_v32 = vld [vmem:[%s8931_s13 + $0x30] sm:$0xff]   ;;  %v8401_v36 = vld [vmem:[%s8931_s13 + $0xf8] sm:$0xff]   ;;  %v230_v39 = vld [vmem:[%s8921_s5] sm:$0xff] }
  0xa4   :  { %7243 = vmatpush3.bf16.msra.mxu0 %v8382_v15  ;;  %v8399_v33 = vld [vmem:[%s8931_s13 + $0xb0] sm:$0xff]   ;;  %v8402_v37 = vld [vmem:[%s8931_s13 + $0x38] sm:$0xff]   ;;  %v238_v41 = vld [vmem:[%s8921_s5 + $0x40] sm:$0xff] }
  0xa5   :  { %7295 = vmatpush3.bf16.msra.mxu1 %v8383_v16  ;;  %7244 = vmatprep.subr.bf16.mxu0 %v8384_v17  ;;  %v8403_v38 = vld [vmem:[%s8931_s13 + $0xb8] sm:$0xff]   ;;  %v231_v42 = vld [vmem:[%s8921_s5 + $0x8] sm:$0xff]  ;;  %v6762_v44 = vcombine.low %v230_v39, %v238_v41  ;;  %v6763_v45 = vcombine.high %v230_v39, %v238_v41  ;;  %v8404_v47 = vld [vmem:[%s8931_s13 + $0x140] sm:$0xff]  }
  0xa6   :  { %7296 = vmatprep.subr.bf16.mxu1 %v8385_v18  ;;  %v239_v43 = vld [vmem:[%s8921_s5 + $0x48] sm:$0xff]  ;;  %v8405_v49 = vld [vmem:[%s8931_s13 + $0x100] sm:$0xff]   ;;  %v9239_v2 = vld [vmem:[%s8926_s9 + $0x30] sm:$0xff] }
  0xa7   :  { %8315 = vset.pattern.permute.xlu1 %v8902_v0  ;;  %v6764_v46 = vcombine.low %v231_v42, %v239_v43  ;;  %v6765_v48 = vcombine.high %v231_v42, %v239_v43  ;;  %1862 = vmatprep.mubr.bf16.mxu0 %v6763_v45  ;;  %v8406_v50 = vld [vmem:[%s8931_s13 + $0x1c0] sm:$0xff]   ;;  %v8408_v52 = vld [vmem:[%s8931_s13 + $0x148] sm:$0xff]   ;;  %v8412_v3 = vld [vmem:[%s8931_s13 + $0x150] sm:$0xff]  }
  0xa8   :  { %2583 = vperm.xlu1 %8315, %v9178_v11   ;;  %7245 = vmatpush3.bf16.msra.mxu0 %v8386_v19  ;;  %v8407_v51 = vld [vmem:[%s8931_s13 + $0x180] sm:$0xff]   ;;  %v247_v56 = vld [vmem:[%s8921_s5 + $0x88] sm:$0xff]  ;;  %v9245_v4 = vld [vmem:[%s8926_s9 + $0x38] sm:$0xff] }
  0xa9   :  { %7297 = vmatpush3.bf16.msra.mxu1 %v8387_v20  ;;  %7246 = vmatprep.subr.bf16.mxu0 %v8388_v21  ;;  %v246_v54 = vld [vmem:[%s8921_s5 + $0x80] sm:$0xff]  ;;  %v255_v58 = vld [vmem:[%s8921_s5 + $0xc8] sm:$0xff]  ;;  %v8413_v5 = vld [vmem:[%s8931_s13 + $0x110] sm:$0xff]  }
  0xaa   :  { %7298 = vmatprep.subr.bf16.mxu1 %v8389_v22  ;;  %1943 = vmatprep.mubr.bf16.mxu1 %v6765_v48  ;;  %v254_v55 = vld [vmem:[%s8921_s5 + $0xc0] sm:$0xff]  ;;  %v6781_v59 = vcombine.high %v247_v56, %v255_v58  ;;  %v8409_v60 = vld [vmem:[%s8931_s13 + $0x108] sm:$0xff]   ;;  %v6780_v62 = vcombine.low %v247_v56, %v255_v58  ;;  %v8415_v15 = vld [vmem:[%s8931_s13 + $0x190] sm:$0xff]  }
  0xab   :  { %v6779_v57 = vcombine.high %v246_v54, %v254_v55  ;;  %v6778_v61 = vcombine.low %v246_v54, %v254_v55  ;;  %v8410_v63 = vld [vmem:[%s8931_s13 + $0x1c8] sm:$0xff]   ;;  %v262_v7 = vld [vmem:[%s8921_s5 + $0x100] sm:$0xff]  ;;  %v8416_v18 = vld [vmem:[%s8931_s13 + $0x158] sm:$0xff]  }
  0xac   :  { %8316 = vset.pattern.permute.xlu1 %v8903_v12  ;;  %7247 = vmatpush3.bf16.msra.mxu0 %v8390_v24  ;;  %v270_v8 = vld [vmem:[%s8921_s5 + $0x140] sm:$0xff]  ;;  %v263_v9 = vld [vmem:[%s8921_s5 + $0x108] sm:$0xff]  ;;  %v8417_v19 = vld [vmem:[%s8931_s13 + $0x118] sm:$0xff]  }
  0xad   :  { %2696 = vperm.xlu1 %8316, %v9196_v23   ;;  %7299 = vmatpush3.bf16.msra.mxu1 %v8391_v25  ;;  %v6795_v10 = vcombine.high %v262_v7, %v270_v8  ;;  %v271_v13 = vld [vmem:[%s8921_s5 + $0x148] sm:$0xff]  ;;  %v6794_v16 = vcombine.low %v262_v7, %v270_v8  ;;  %v8418_v20 = vld [vmem:[%s8931_s13 + $0x1d8] sm:$0xff]   ;;  %v2880_v22 = vld [vmem:[%s8926_s9 + $0x10] sm:$0xff] }
  0xae   :  { %7248 = vmatprep.subr.bf16.mxu0 %v8392_v26  ;;  %7300 = vmatprep.subr.bf16.mxu1 %v8393_v27  ;;  %v6797_v14 = vcombine.high %v263_v9, %v271_v13  ;;  %v6796_v17 = vcombine.low %v263_v9, %v271_v13  ;;  %v8419_v21 = vld [vmem:[%s8931_s13 + $0x198] sm:$0xff]   ;;  %v278_v24 = vld [vmem:[%s8921_s5 + $0x180] sm:$0xff]  ;;  %v279_v26 = vld [vmem:[%s8921_s5 + $0x188] sm:$0xff] }
  0xaf   :  { %v286_v25 = vld [vmem:[%s8921_s5 + $0x1c0] sm:$0xff]  ;;  %v287_v27 = vld [vmem:[%s8921_s5 + $0x1c8] sm:$0xff]  ;;  %2578 = vperm.xlu0 %8314, %v2880_v22   ;;  %v232_v7 = vld [vmem:[%s8921_s5 + $0x10] sm:$0xff] }
  0xb0   :  { %7249 = vmatpush3.bf16.msra.mxu0 %v8394_v28  ;;  %v6811_v28 = vcombine.high %v278_v24, %v286_v25  ;;  %v302_v39 = vld [vmem:[%s8921_s5 + $0x240] sm:$0xff]  ;;  %v295_v41 = vld [vmem:[%s8921_s5 + $0x208] sm:$0xff]  ;;  %v240_v8 = vld [vmem:[%s8921_s5 + $0x50] sm:$0xff] }
  0xb1   :  { %8317 = vset.pattern.permute.xlu1 %v8902_v0  ;;  %7301 = vmatpush3.bf16.msra.mxu1 %v8395_v29  ;;  %v6813_v29 = vcombine.high %v279_v26, %v287_v27  ;;  %v303_v43 = vld [vmem:[%s8921_s5 + $0x248] sm:$0xff]  ;;  %v310_v54 = vld [vmem:[%s8921_s5 + $0x280] sm:$0xff]  ;;  %v6767_v9 = vcombine.high %v232_v7, %v240_v8  ;;  %v241_v13 = vld [vmem:[%s8921_s5 + $0x58] sm:$0xff] }
  0xb2   :  { %2588 = vperm.xlu1 %8317, %v9196_v23   ;;  %7250 = vmatprep.subr.bf16.mxu0 %v8396_v30  ;;  %v8420_v30 = vld [vmem:[%s8931_s13 + $0x160] sm:$0xff]   ;;  %v8425_v45 = vld [vmem:[%s8931_s13 + $0x128] sm:$0xff]  }
  0xb3   :  { %7302 = vmatprep.subr.bf16.mxu1 %v8397_v31  ;;  %v8421_v31 = vld [vmem:[%s8931_s13 + $0x120] sm:$0xff]   ;;  %v311_v56 = vld [vmem:[%s8921_s5 + $0x288] sm:$0xff] }
  0xb4   :  { %7251 = vmatpush3.bf16.msra.mxu0 %v8398_v32  ;;  %v6810_v32 = vcombine.low %v278_v24, %v286_v25  ;;  %v318_v55 = vld [vmem:[%s8921_s5 + $0x2c0] sm:$0xff]  ;;  %v257_v25 = vld [vmem:[%s8921_s5 + $0xd8] sm:$0xff] }
  0xb5   :  { %7303 = vmatpush3.bf16.msra.mxu1 %v8399_v33  ;;  %7252 = vmatprep.subr.bf16.mxu0 %v8400_v35  ;;  %v8422_v33 = vld [vmem:[%s8931_s13 + $0x1e0] sm:$0xff]   ;;  %v6812_v35 = vcombine.low %v279_v26, %v287_v27  ;;  %v6843_v58 = vcombine.high %v310_v54, %v318_v55  ;;  %v8440_v26 = vld [vmem:[%s8931_s13 + $0x248] sm:$0xff]  }
  0xb6   :  { %2593 = vperm.xlu1 %8317, %v9212_v34   ;;  %7304 = vmatprep.subr.bf16.mxu1 %v8401_v36  ;;  %v8423_v36 = vld [vmem:[%s8931_s13 + $0x1a0] sm:$0xff]  }
  0xb8   :  { %7253 = vmatpush3.bf16.msra.mxu0 %v8402_v37  ;;  %v8424_v37 = vld [vmem:[%s8931_s13 + $0x168] sm:$0xff]  }
  0xb9   :  { %7305 = vmatpush3.bf16.msra.mxu1 %v8403_v38  ;;  %7342 = vmatprep.subr.bf16.mxu0 %v8404_v47  ;;  %v294_v38 = vld [vmem:[%s8921_s5 + $0x200] sm:$0xff]  ;;  %v8427_v47 = vld [vmem:[%s8931_s13 + $0x1a8] sm:$0xff]  }
  0xba   :  { %8318 = vset.pattern.permute.xlu1 %v8904_v40  ;;  %7394 = vmatprep.subr.bf16.mxu1 %v8406_v50  ;;  %v6827_v42 = vcombine.high %v294_v38, %v302_v39  ;;  %v6826_v48 = vcombine.low %v294_v38, %v302_v39  ;;  %v6828_v50 = vcombine.low %v295_v41, %v303_v43  ;;  %v273_v38 = vld [vmem:[%s8921_s5 + $0x158] sm:$0xff] }
  0xbb   :  { %2897 = vperm.xlu1 %8318, %v9170_v6   ;;  %1863 = vmatmul.mubr.bf16.vlgmr.msra.gmra.mrb[0].mxu0 %v6762_v44  ;;  %v8414_v6 = vld [vmem:[%s8931_s13 + $0x1d0] sm:$0xff]   ;;  %v6829_v44 = vcombine.high %v295_v41, %v303_v43 }
  0xbc   :  { %1944 = vmatmul.mubr.bf16.vlgmr.msra.gmra.mrb[0].mxu1 %v6764_v46  ;;  %7343 = vmatpush3.bf16.msra.mxu0 %v8405_v49  ;;  %v8426_v46 = vld [vmem:[%s8931_s13 + $0x1e8] sm:$0xff]   ;;  %v8428_v49 = vld [vmem:[%s8931_s13 + $0x170] sm:$0xff]  }
  0xbd   :  { %7395 = vmatpush3.bf16.msra.mxu1 %v8407_v51  ;;  %7344 = vmatprep.subr.bf16.mxu0 %v8408_v52  ;;  %v8429_v51 = vld [vmem:[%s8931_s13 + $0x130] sm:$0xff]  }
  0xbe   :  { %1870 = vmatprep.mubr.bf16.mxu0 %v6779_v57  ;;  %1951 = vmatprep.mubr.bf16.mxu1 %v6781_v59  ;;  %v8430_v52 = vld [vmem:[%s8931_s13 + $0x1f0] sm:$0xff]   ;;  %v319_v57 = vld [vmem:[%s8921_s5 + $0x2c8] sm:$0xff] }
  0xbf   :  { %8319 = vset.pattern.permute.xlu1 %v8905_v53  ;;  %7396 = vmatprep.subr.bf16.mxu1 %v8410_v63  ;;  %v6845_v59 = vcombine.high %v311_v56, %v319_v57  ;;  %v6842_v63 = vcombine.low %v310_v54, %v318_v55  ;;  %v8445_v41 = vld [vmem:[%s8931_s13 + $0x210] sm:$0xff]   ;;  %v8452_v55 = vld [vmem:[%s8931_s13 + $0x260] sm:$0xff]  }
  0xc0   :  { %2784 = vperm.xlu1 %8319, %v9162_v1   ;;  %7345 = vmatpush3.bf16.msra.mxu0 %v8409_v60  ;;  %v8411_v1 = vld [vmem:[%s8931_s13 + $0x188] sm:$0xff]   ;;  %v8431_v60 = vld [vmem:[%s8931_s13 + $0x1b0] sm:$0xff]  }
  0xc1   :  { %7346 = vmatprep.subr.bf16.mxu0 %v8412_v3  ;;  %7397 = vmatpush3.bf16.msra.mxu1 %v8411_v1  ;;  %v9298_v1 = vld [vmem:[%s8926_s9 + $0x40] sm:$0xff]  ;;  %v8434_v3 = vld [vmem:[%s8931_s13 + $0x1f8] sm:$0xff]  }
  0xc2   :  { %7398 = vmatprep.subr.bf16.mxu1 %v8414_v6  ;;  %v8435_v6 = vld [vmem:[%s8931_s13 + $0x1b8] sm:$0xff]  }
  0xc3   :  { %1871 = vmatmul.mubr.bf16.gmra.mrb[4].mxu0 %v6778_v61  ;;  %v9291_v61 = vld [vmem:[%s8926_s9 + $0x48] sm:$0xff] }
  0xc4   :  { %8320 = vset.pattern.permute.xlu1 %v8903_v12  ;;  %1952 = vmatmul.mubr.bf16.gmra.mrb[4].mxu1 %v6780_v62  ;;  %v8433_v62 = vld [vmem:[%s8931_s13 + $0x138] sm:$0xff]  }
  0xc5   :  { %2706 = vperm.xlu1 %8320, %v9239_v2   ;;  %7347 = vmatpush3.bf16.msra.mxu0 %v8413_v5  ;;  %v6844_v5 = vcombine.low %v311_v56, %v319_v57 }
  0xc6   :  { %1878 = vmatprep.mubr.bf16.mxu0 %v6795_v10  ;;  %1959 = vmatprep.mubr.bf16.mxu1 %v6797_v14  ;;  %v233_v10 = vld [vmem:[%s8921_s5 + $0x18] sm:$0xff] }
  0xc7   :  { %7399 = vmatpush3.bf16.msra.mxu1 %v8415_v15  ;;  %7348 = vmatprep.subr.bf16.mxu0 %v8416_v18  ;;  %v6769_v14 = vcombine.high %v233_v10, %v241_v13  ;;  %v8436_v15 = vld [vmem:[%s8931_s13 + $0x240] sm:$0xff]   ;;  %v6766_v18 = vcombine.low %v232_v7, %v240_v8  ;;  %v6768_v24 = vcombine.low %v233_v10, %v241_v13  ;;  %v305_v7 = vld [vmem:[%s8921_s5 + $0x258] sm:$0xff]  ;;  %v8457_v8 = vld [vmem:[%s8931_s13 + $0x228] sm:$0xff]  }
  0xc8   :  { %7400 = vmatprep.subr.bf16.mxu1 %v8418_v20  ;;  %v248_v20 = vld [vmem:[%s8921_s5 + $0x90] sm:$0xff]  ;;  %v8459_v10 = vld [vmem:[%s8931_s13 + $0x2a8] sm:$0xff]  }
  0xc9   :  { %2711 = vperm.xlu1 %8320, %v9245_v4   ;;  %7349 = vmatpush3.bf16.msra.mxu0 %v8417_v19  ;;  %v8439_v19 = vld [vmem:[%s8931_s13 + $0x280] sm:$0xff]  }
  0xca   :  { %7350 = vmatprep.subr.bf16.mxu0 %v8420_v30  ;;  %v8442_v30 = vld [vmem:[%s8931_s13 + $0x2c8] sm:$0xff]  }
  0xcb   :  { %1879 = vmatmul.mubr.bf16.gmra.mrb[8].mxu0 %v6794_v16  ;;  %7401 = vmatpush3.bf16.msra.mxu1 %v8419_v21  ;;  %v8438_v16 = vld [vmem:[%s8931_s13 + $0x2c0] sm:$0xff]   ;;  %v256_v21 = vld [vmem:[%s8921_s5 + $0xd0] sm:$0xff] }
  0xcc   :  { %1960 = vmatmul.mubr.bf16.gmra.mrb[8].mxu1 %v6796_v17  ;;  %1886 = vmatprep.mubr.bf16.mxu0 %v6811_v28  ;;  %v8437_v17 = vld [vmem:[%s8931_s13 + $0x200] sm:$0xff]   ;;  %v6783_v27 = vcombine.high %v248_v20, %v256_v21  ;;  %v8441_v28 = vld [vmem:[%s8931_s13 + $0x208] sm:$0xff]  }
  0xcd   :  { %8321 = vset.pattern.permute.xlu1 %v8902_v0  ;;  %1967 = vmatprep.mubr.bf16.mxu1 %v6813_v29 }
  0xce   :  { %2603 = vperm.xlu1 %8321, %v9245_v4   ;;  %7351 = vmatpush3.bf16.msra.mxu0 %v8421_v31  ;;  %v8443_v31 = vld [vmem:[%s8931_s13 + $0x288] sm:$0xff]  }
  0xcf   :  { %7402 = vmatprep.subr.bf16.mxu1 %v8422_v33  ;;  %7352 = vmatprep.subr.bf16.mxu0 %v8424_v37  ;;  %v264_v33 = vld [vmem:[%s8921_s5 + $0x110] sm:$0xff]  ;;  %v265_v37 = vld [vmem:[%s8921_s5 + $0x118] sm:$0xff] }
  0xd0   :  { %7403 = vmatpush3.bf16.msra.mxu1 %v8423_v36  ;;  %v6782_v36 = vcombine.low %v248_v20, %v256_v21  ;;  %v6801_v43 = vcombine.high %v265_v37, %v273_v38  ;;  %v6800_v56 = vcombine.low %v265_v37, %v273_v38  ;;  %v320_v20 = vld [vmem:[%s8921_s5 + $0x2d0] sm:$0xff]  ;;  %v313_v21 = vld [vmem:[%s8921_s5 + $0x298] sm:$0xff]  ;;  %v8470_v37 = vld [vmem:[%s8931_s13 + $0x3c0] sm:$0xff]   ;;  %v8906_v38 = vmov 5  }
  0xd1   :  { %7404 = vmatprep.subr.bf16.mxu1 %v8426_v46  ;;  %v8448_v46 = vld [vmem:[%s8931_s13 + $0x258] sm:$0xff]  }
  0xd2   :  { %8322 = vset.pattern.permute.xlu1 %v8904_v40  ;;  %7353 = vmatpush3.bf16.msra.mxu0 %v8425_v45  ;;  %v9334_v45 = vld [vmem:[%s8926_s9 + $0x50] sm:$0xff] }
  0xd3   :  { %2902 = vperm.xlu1 %8322, %v2880_v22   ;;  %1887 = vmatmul.mubr.bf16.gmra.mrb[12].mxu0 %v6810_v32  ;;  %v8444_v32 = vld [vmem:[%s8931_s13 + $0x250] sm:$0xff]  }
  0xd4   :  { %1968 = vmatmul.mubr.bf16.gmra.mrb[12].mxu1 %v6812_v35  ;;  %1894 = vmatprep.mubr.bf16.mxu0 %v6827_v42  ;;  %v272_v35 = vld [vmem:[%s8921_s5 + $0x150] sm:$0xff] }
  0xd5   :  { %1975 = vmatprep.mubr.bf16.mxu1 %v6829_v44  ;;  %7405 = vmatpush3.bf16.msra.mxu1 %v8427_v47  ;;  %v6799_v42 = vcombine.high %v264_v33, %v272_v35  ;;  %v8447_v44 = vld [vmem:[%s8931_s13 + $0x290] sm:$0xff]   ;;  %v8449_v47 = vld [vmem:[%s8931_s13 + $0x218] sm:$0xff]   ;;  %v6798_v54 = vcombine.low %v264_v33, %v272_v35  ;;  %v242_v33 = vld [vmem:[%s8921_s5 + $0x60] sm:$0xff] }
  0xd6   :  { %7354 = vmatprep.subr.bf16.mxu0 %v8428_v49  ;;  %7406 = vmatprep.subr.bf16.mxu1 %v8430_v52  ;;  %v8451_v49 = vld [vmem:[%s8931_s13 + $0x298] sm:$0xff]   ;;  %v8468_v35 = vld [vmem:[%s8931_s13 + $0x340] sm:$0xff]  }
  0xd7   :  { %8323 = vset.pattern.permute.xlu1 %v8905_v53  ;;  %7355 = vmatpush3.bf16.msra.mxu0 %v8429_v51  ;;  %v288_v51 = vld [vmem:[%s8921_s5 + $0x1d0] sm:$0xff]  ;;  %v281_v52 = vld [vmem:[%s8921_s5 + $0x198] sm:$0xff] }
  0xd8   :  { %2794 = vperm.xlu1 %8323, %v2880_v22   ;;  %v249_v22 = vld [vmem:[%s8921_s5 + $0x98] sm:$0xff] }
  0xd9   :  { %7407 = vmatpush3.bf16.msra.mxu1 %v8431_v60  ;;  %v6785_v29 = vcombine.high %v249_v22, %v257_v25  ;;  %v6784_v39 = vcombine.low %v249_v22, %v257_v25  ;;  %v8454_v60 = vld [vmem:[%s8931_s13 + $0x2e0] sm:$0xff]   ;;  %v321_v22 = vld [vmem:[%s8921_s5 + $0x2d8] sm:$0xff] }
  0xda   :  { %7408 = vmatprep.subr.bf16.mxu1 %v8434_v3  ;;  %v296_v3 = vld [vmem:[%s8921_s5 + $0x210] sm:$0xff]  ;;  %v8464_v25 = vld [vmem:[%s8931_s13 + $0x278] sm:$0xff]  }
  0xdb   :  { %1895 = vmatmul.mubr.bf16.gmra.mrb[16].mxu0 %v6826_v48  ;;  %v8450_v48 = vld [vmem:[%s8931_s13 + $0x2d8] sm:$0xff]  }
  0xdc   :  { %2799 = vperm.xlu1 %8323, %v9178_v11   ;;  %1976 = vmatmul.mubr.bf16.gmra.mrb[16].mxu1 %v6828_v50  ;;  %v8432_v11 = vld [vmem:[%s8931_s13 + $0x178] sm:$0xff]   ;;  %v280_v50 = vld [vmem:[%s8921_s5 + $0x190] sm:$0xff] }
  0xdd   :  { %1902 = vmatprep.mubr.bf16.mxu0 %v6843_v58  ;;  %1983 = vmatprep.mubr.bf16.mxu1 %v6845_v59  ;;  %v6815_v57 = vcombine.high %v280_v50, %v288_v51  ;;  %v8453_v59 = vld [vmem:[%s8931_s13 + $0x220] sm:$0xff]  }
  0xde   :  { %7356 = vmatprep.subr.bf16.mxu0 %v8432_v11  ;;  %7409 = vmatpush3.bf16.msra.mxu1 %v8435_v6  ;;  %v9351_v11 = vld [vmem:[%s8926_s9 + $0x58] sm:$0xff] }
  0xdf   :  { %7357 = vmatpush3.bf16.msra.mxu0 %v8433_v62  ;;  %7498 = vmatprep.subr.bf16.mxu1 %v8438_v16  ;;  %v8455_v62 = vld [vmem:[%s8931_s13 + $0x2a0] sm:$0xff]   ;;  %v297_v6 = vld [vmem:[%s8921_s5 + $0x218] sm:$0xff] }
  0xe0   :  { %8324 = vset.pattern.permute.xlu1 %v8903_v12  ;;  %7446 = vmatprep.subr.bf16.mxu0 %v8436_v15  ;;  %v8460_v15 = vld [vmem:[%s8931_s13 + $0x270] sm:$0xff]   ;;  %v6833_v16 = vcombine.high %v297_v6, %v305_v7 }
  0xe1   :  { %2721 = vperm.xlu1 %8324, %v9291_v61  }
  0xe3   :  { %1903 = vmatmul.mubr.bf16.gmra.mrb[20].mxu0 %v6842_v63  ;;  %v8456_v63 = vld [vmem:[%s8931_s13 + $0x268] sm:$0xff]  }
  0xe4   :  { %1984 = vmatmul.mubr.bf16.gmra.mrb[20].mxu1 %v6844_v5  ;;  %2024 = vmatprep.mubr.bf16.mxu0 %v6767_v9  ;;  %v304_v5 = vld [vmem:[%s8921_s5 + $0x250] sm:$0xff]  ;;  %v6814_v9 = vcombine.low %v280_v50, %v288_v51  ;;  %v250_v50 = vld [vmem:[%s8921_s5 + $0xa0] sm:$0xff] }
  0xe5   :  { %8325 = vset.pattern.permute.xlu1 %v8902_v0  ;;  %2105 = vmatprep.mubr.bf16.mxu1 %v6769_v14  ;;  %v6831_v14 = vcombine.high %v296_v3, %v304_v5  ;;  %v258_v51 = vld [vmem:[%s8921_s5 + $0xe0] sm:$0xff] }
  0xe6   :  { %2608 = vperm.xlu1 %8325, %v9298_v1  }
  0xea   :  { %8327 = vset.pattern.permute.xlu1 %v8904_v40 }
  0xeb   :  { %2912 = vperm.xlu1 %8327, %v9196_v23   ;;  %2025 = vmatmul.mubr.bf16.vlgmr.msra.gmra.mrb[24].mxu0 %v6766_v18  ;;  %v8446_v23 = vld [vmem:[%s8931_s13 + $0x2d0] sm:$0xff]  }
  0xec   :  { %2106 = vmatmul.mubr.bf16.vlgmr.msra.gmra.mrb[24].mxu1 %v6768_v24  ;;  %7447 = vmatpush3.bf16.msra.mxu0 %v8437_v17  ;;  %v8461_v17 = vld [vmem:[%s8931_s13 + $0x230] sm:$0xff]  }
  0xed   :  { %7499 = vmatpush3.bf16.msra.mxu1 %v8439_v19  ;;  %7448 = vmatprep.subr.bf16.mxu0 %v8440_v26  ;;  %v8462_v18 = vld [vmem:[%s8931_s13 + $0x2f0] sm:$0xff]   ;;  %v6830_v26 = vcombine.low %v296_v3, %v304_v5 }
  0xee   :  { %2032 = vmatprep.mubr.bf16.mxu0 %v6783_v27  ;;  %2113 = vmatprep.mubr.bf16.mxu1 %v6785_v29  ;;  %v312_v19 = vld [vmem:[%s8921_s5 + $0x290] sm:$0xff]  ;;  %v6832_v27 = vcombine.low %v297_v6, %v305_v7  ;;  %v6849_v29 = vcombine.high %v313_v21, %v321_v22  ;;  %v266_v6 = vld [vmem:[%s8921_s5 + $0x120] sm:$0xff] }
  0xef   :  { %2917 = vperm.xlu1 %8327, %v9212_v34   ;;  %7500 = vmatprep.subr.bf16.mxu1 %v8442_v30  ;;  %v8463_v24 = vld [vmem:[%s8931_s13 + $0x2b0] sm:$0xff]   ;;  %v8465_v30 = vld [vmem:[%s8931_s13 + $0x238] sm:$0xff]   ;;  %v274_v7 = vld [vmem:[%s8921_s5 + $0x160] sm:$0xff] }
  0xf0   :  { %7449 = vmatpush3.bf16.msra.mxu0 %v8441_v28  ;;  %v6847_v28 = vcombine.high %v312_v19, %v320_v20  ;;  %v8476_v3 = vld [vmem:[%s8931_s13 + $0x350] sm:$0xff]  }
  0xf1   :  { %7501 = vmatpush3.bf16.msra.mxu1 %v8443_v31  ;;  %7450 = vmatprep.subr.bf16.mxu0 %v8444_v32  ;;  %v9380_v31 = vld [vmem:[%s8926_s9] sm:$0xff]  ;;  %v8467_v32 = vld [vmem:[%s8931_s13 + $0x2b8] sm:$0xff]   ;;  %v8478_v5 = vld [vmem:[%s8931_s13 + $0x3d0] sm:$0xff]  }
  0xf2   :  { %7502 = vmatprep.subr.bf16.mxu1 %v8446_v23  ;;  %v234_v23 = vld [vmem:[%s8921_s5 + $0x20] sm:$0xff] }
  0xf3   :  { %8328 = vset.pattern.permute.xlu1 %v8905_v53  ;;  %2033 = vmatmul.mubr.bf16.gmra.mrb[28].mxu0 %v6782_v36  ;;  %v235_v36 = vld [vmem:[%s8921_s5 + $0x28] sm:$0xff] }
  0xf4   :  { %2809 = vperm.xlu1 %8328, %v9212_v34   ;;  %2114 = vmatmul.mubr.bf16.gmra.mrb[28].mxu1 %v6784_v39  ;;  %v289_v34 = vld [vmem:[%s8921_s5 + $0x1d8] sm:$0xff]  ;;  %v6846_v39 = vcombine.low %v312_v19, %v320_v20 }
  0xf5   :  { %7451 = vmatpush3.bf16.msra.mxu0 %v8445_v41  ;;  %2040 = vmatprep.mubr.bf16.mxu0 %v6799_v42  ;;  %v6817_v58 = vcombine.high %v281_v52, %v289_v34  ;;  %v6816_v13 = vcombine.low %v281_v52, %v289_v34  ;;  %v6848_v41 = vcombine.low %v313_v21, %v321_v22  ;;  %v9392_v42 = vld [vmem:[%s8926_s9 + $0x8] sm:$0xff]  ;;  %v8481_v19 = vld [vmem:[%s8931_s13 + $0x318] sm:$0xff]  }
  0xf6   :  { %2121 = vmatprep.mubr.bf16.mxu1 %v6801_v43  ;;  %7503 = vmatpush3.bf16.msra.mxu1 %v8447_v44  ;;  %v6771_v43 = vcombine.high %v234_v23, %v242_v33  ;;  %v251_v34 = vld [vmem:[%s8921_s5 + $0xa8] sm:$0xff]  ;;  %v8482_v20 = vld [vmem:[%s8931_s13 + $0x3d8] sm:$0xff]  }
  0xf7   :  { %7452 = vmatprep.subr.bf16.mxu0 %v8448_v46  ;;  %7504 = vmatprep.subr.bf16.mxu1 %v8450_v48  ;;  %v6770_v48 = vcombine.low %v234_v23, %v242_v33  ;;  %v8483_v22 = vld [vmem:[%s8931_s13 + $0x398] sm:$0xff]  }
  0xf8   :  { %8329 = vset.pattern.permute.xlu1 %v8903_v12 }
  0xf9   :  { %2726 = vperm.xlu1 %8329, %v9334_v45   ;;  %7453 = vmatpush3.bf16.msra.mxu0 %v8449_v47  ;;  %v8907_v47 = vmov 4  }
  0xfa   :  { %7454 = vmatprep.subr.bf16.mxu0 %v8452_v55  ;;  %7505 = vmatpush3.bf16.msra.mxu1 %v8451_v49  ;;  %v8469_v49 = vld [vmem:[%s8931_s13 + $0x300] sm:$0xff]  }
  0xfb   :  { %2041 = vmatmul.mubr.bf16.gmra.mrb[32].mxu0 %v6798_v54  ;;  %7506 = vmatprep.subr.bf16.mxu1 %v8454_v60  ;;  %v259_v54 = vld [vmem:[%s8921_s5 + $0xe8] sm:$0xff]  ;;  %v8471_v55 = vld [vmem:[%s8931_s13 + $0x380] sm:$0xff]   ;;  %v6787_v60 = vcombine.high %v250_v50, %v258_v51 }
  0xfc   :  { %2122 = vmatmul.mubr.bf16.gmra.mrb[32].mxu1 %v6800_v56  ;;  %2048 = vmatprep.mubr.bf16.mxu0 %v6815_v57  ;;  %v8472_v56 = vld [vmem:[%s8931_s13 + $0x348] sm:$0xff]  }
  0xfd   :  { %8331 = vset.pattern.permute.xlu1 %v8902_v0  ;;  %2129 = vmatprep.mubr.bf16.mxu1 %v6817_v58  ;;  %v8458_v0 = vld [vmem:[%s8931_s13 + $0x2e8] sm:$0xff]  }
  0xfe   :  { %2618 = vperm.xlu1 %8331, %v9334_v45   ;;  %7455 = vmatpush3.bf16.msra.mxu0 %v8453_v59  ;;  %v8473_v58 = vld [vmem:[%s8931_s13 + $0x308] sm:$0xff]  }
  0xff   :  { %7507 = vmatpush3.bf16.msra.mxu1 %v8455_v62  ;;  %7456 = vmatprep.subr.bf16.mxu0 %v8456_v63  ;;  %v8474_v59 = vld [vmem:[%s8931_s13 + $0x3c8] sm:$0xff]   ;;  %v6789_v62 = vcombine.high %v251_v34, %v259_v54 }
 0x100   :  { %7508 = vmatprep.subr.bf16.mxu1 %v8458_v0  ;;  %v8475_v63 = vld [vmem:[%s8931_s13 + $0x388] sm:$0xff]  }
 0x101   :  { %v275_v0 = vld [vmem:[%s8921_s5 + $0x168] sm:$0xff] }
 0x102   :  { %2623 = vperm.xlu1 %8331, %v9351_v11   ;;  %7457 = vmatpush3.bf16.msra.mxu0 %v8457_v8  ;;  %v267_v8 = vld [vmem:[%s8921_s5 + $0x128] sm:$0xff] }
 0x103   :  { %2049 = vmatmul.mubr.bf16.gmra.mrb[36].mxu0 %v6814_v9  ;;  %7509 = vmatpush3.bf16.msra.mxu1 %v8459_v10  ;;  %v6786_v10 = vcombine.low %v250_v50, %v258_v51  ;;  %v8489_v50 = vld [vmem:[%s8931_s13 + $0x328] sm:$0xff]  }
 0x104   :  { %2130 = vmatmul.mubr.bf16.gmra.mrb[36].mxu1 %v6816_v13  ;;  %2056 = vmatprep.mubr.bf16.mxu0 %v6831_v14  ;;  %v6788_v13 = vcombine.low %v251_v34, %v259_v54  ;;  %v8477_v14 = vld [vmem:[%s8931_s13 + $0x310] sm:$0xff]  }
 0x105   :  { %2137 = vmatprep.mubr.bf16.mxu1 %v6833_v16  ;;  %7458 = vmatprep.subr.bf16.mxu0 %v8460_v15  ;;  %v6803_v15 = vcombine.high %v266_v6, %v274_v7  ;;  %v6805_v16 = vcombine.high %v267_v8, %v275_v0 }
 0x106   :  { %8332 = vset.pattern.permute.xlu1 %v8904_v40  ;;  %7459 = vmatpush3.bf16.msra.mxu0 %v8461_v17  ;;  %v8479_v17 = vld [vmem:[%s8931_s13 + $0x390] sm:$0xff]  }
 0x107   :  { %2927 = vperm.xlu1 %8332, %v9245_v4   ;;  %7510 = vmatprep.subr.bf16.mxu1 %v8462_v18  ;;  %v8466_v4 = vld [vmem:[%s8931_s13 + $0x2f8] sm:$0xff]  }
 0x108   :  { %7511 = vmatpush3.bf16.msra.mxu1 %v8463_v24  ;;  %7460 = vmatprep.subr.bf16.mxu0 %v8464_v25  ;;  %v8480_v18 = vld [vmem:[%s8931_s13 + $0x358] sm:$0xff]   ;;  %v282_v24 = vld [vmem:[%s8921_s5 + $0x1a0] sm:$0xff] }
 0x109   :  { %7512 = vmatprep.subr.bf16.mxu1 %v8466_v4  ;;  %v290_v25 = vld [vmem:[%s8921_s5 + $0x1e0] sm:$0xff]  ;;  %v6802_v4 = vcombine.low %v266_v6, %v274_v7  ;;  %v315_v6 = vld [vmem:[%s8921_s5 + $0x2a8] sm:$0xff] }
 0x10a   :  { %7461 = vmatpush3.bf16.msra.mxu0 %v8465_v30  ;;  %v6804_v30 = vcombine.low %v267_v8, %v275_v0  ;;  %v6819_v33 = vcombine.high %v282_v24, %v290_v25  ;;  %v6818_v51 = vcombine.low %v282_v24, %v290_v25  ;;  %v323_v7 = vld [vmem:[%s8921_s5 + $0x2e8] sm:$0xff]  ;;  %v8498_v8 = vld [vmem:[%s8931_s13 + $0x3f8] sm:$0xff]   ;;  %v9498_v25 = vld [vmem:[%s8926_s9 + $0x20] sm:$0xff] }
 0x10b   :  { %8333 = vset.pattern.permute.xlu1 %v8905_v53  ;;  %2057 = vmatmul.mubr.bf16.gmra.mrb[40].mxu0 %v6830_v26  ;;  %v283_v26 = vld [vmem:[%s8921_s5 + $0x1a8] sm:$0xff] }
 0x10c   :  { %2814 = vperm.xlu1 %8333, %v9239_v2   ;;  %2138 = vmatmul.mubr.bf16.gmra.mrb[40].mxu1 %v6832_v27  ;;  %v243_v2 = vld [vmem:[%s8921_s5 + $0x68] sm:$0xff]  ;;  %v8484_v27 = vld [vmem:[%s8931_s13 + $0x360] sm:$0xff]  }
 0x10d   :  { %2064 = vmatprep.mubr.bf16.mxu0 %v6847_v28  ;;  %2145 = vmatprep.mubr.bf16.mxu1 %v6849_v29  ;;  %v6773_v44 = vcombine.high %v235_v36, %v243_v2  ;;  %v6772_v52 = vcombine.low %v235_v36, %v243_v2  ;;  %v9436_v28 = vld [vmem:[%s8926_s9 + $0x30] sm:$0xff]  ;;  %v9441_v29 = vld [vmem:[%s8926_s9 + $0x18] sm:$0xff]  ;;  %v8486_v36 = vld [vmem:[%s8931_s13 + $0x3e0] sm:$0xff]  }
 0x10e   :  { %7513 = vmatpush3.bf16.msra.mxu1 %v8467_v32  ;;  %7550 = vmatprep.subr.bf16.mxu0 %v8468_v35  ;;  %v8485_v32 = vld [vmem:[%s8931_s13 + $0x320] sm:$0xff]   ;;  %v8488_v2 = vld [vmem:[%s8931_s13 + $0x368] sm:$0xff]  }
 0x10f   :  { %7602 = vmatprep.subr.bf16.mxu1 %v8470_v37  ;;  %2598 = vperm.xlu0 %8314, %v9436_v28   ;;  %v8487_v37 = vld [vmem:[%s8931_s13 + $0x3a0] sm:$0xff]  }
 0x110   :  { %8334 = vset.pattern.permute.xlu1 %v8906_v38 }
 0x111   :  { %3108 = vperm.xlu1 %8334, %v9380_v31  }
 0x113   :  { %2065 = vmatmul.mubr.bf16.gmra.mrb[44].mxu0 %v6846_v39  ;;  %v298_v39 = vld [vmem:[%s8921_s5 + $0x220] sm:$0xff]  ;;  %2613 = vperm.xlu0 %8314, %v9291_v61  }
 0x114   :  { %2146 = vmatmul.mubr.bf16.gmra.mrb[44].mxu1 %v6848_v41  ;;  %2186 = vmatprep.mubr.bf16.mxu0 %v6771_v43  ;;  %v306_v41 = vld [vmem:[%s8921_s5 + $0x260] sm:$0xff]  ;;  %v299_v43 = vld [vmem:[%s8921_s5 + $0x228] sm:$0xff] }
 0x115   :  { %3113 = vperm.xlu1 %8334, %v9392_v42   ;;  %2267 = vmatprep.mubr.bf16.mxu1 %v6773_v44  ;;  %v8490_v44 = vld [vmem:[%s8931_s13 + $0x3e8] sm:$0xff]   ;;  %v6835_v54 = vcombine.high %v298_v39, %v306_v41  ;;  %v6834_v0 = vcombine.low %v298_v39, %v306_v41 }
 0x117   :  { %8326 = vset.pattern.permute.xlu0 %v8903_v12  ;;  %v8497_v12 = vld [vmem:[%s8931_s13 + $0x338] sm:$0xff]  }
 0x118   :  { %2676 = vperm.xlu0 %8326, %v9380_v31  }
 0x119   :  { %v9395_v46 = vpop.permute.xlu1 %2568  ;;  %8335 = vset.pattern.permute.xlu1 %v8907_v47 }
 0x11a   :  { %3005 = vperm.xlu1 %8335, %v9392_v42  }
 0x11b   :  { %2187 = vmatmul.mubr.bf16.vlgmr.msra.gmra.mrb[48].mxu0 %v6770_v48 }
 0x11c   :  { %2268 = vmatmul.mubr.bf16.vlgmr.msra.gmra.mrb[48].mxu1 %v6772_v52  ;;  %7551 = vmatpush3.bf16.msra.mxu0 %v8469_v49  ;;  %v307_v49 = vld [vmem:[%s8921_s5 + $0x268] sm:$0xff] }
 0x11d   :  { %v9406_v57 = vpop.permute.xlu1 %2573  ;;  %7603 = vmatpush3.bf16.msra.mxu1 %v8471_v55  ;;  %7552 = vmatprep.subr.bf16.mxu0 %v8472_v56  ;;  %v8491_v52 = vld [vmem:[%s8931_s13 + $0x3a8] sm:$0xff]   ;;  %v8746_v55 = vld [vmem:[%s8926_s9 + $0x10] sm:$0xff]  ;;  %v6837_v56 = vcombine.high %v299_v43, %v307_v49 }
 0x11e   :  { %8336 = vset.pattern.permute.xlu1 %v8904_v40  ;;  %2194 = vmatprep.mubr.bf16.mxu0 %v6787_v60  ;;  %v8494_v60 = vld [vmem:[%s8931_s13 + $0x3f0] sm:$0xff]  }
 0x11f   :  { %2932 = vperm.xlu1 %8336, %v9298_v1   ;;  %2275 = vmatprep.mubr.bf16.mxu1 %v6789_v62  ;;  %v314_v62 = vld [vmem:[%s8921_s5 + $0x2a0] sm:$0xff] }
 0x120   :  { %7553 = vmatpush3.bf16.msra.mxu0 %v8473_v58  ;;  %7604 = vmatprep.subr.bf16.mxu1 %v8474_v59  ;;  %v8493_v59 = vld [vmem:[%s8931_s13 + $0x330] sm:$0xff]  }
 0x121   :  { %7605 = vmatpush3.bf16.msra.mxu1 %v8475_v63  ;;  %7554 = vmatprep.subr.bf16.mxu0 %v8476_v3  ;;  %v322_v63 = vld [vmem:[%s8921_s5 + $0x2e0] sm:$0xff]  ;;  %v8495_v3 = vld [vmem:[%s8931_s13 + $0x3b0] sm:$0xff]  }
 0x122   :  { %v9419_v9 = vpop.permute.xlu1 %2691  ;;  %7606 = vmatprep.subr.bf16.mxu1 %v8478_v5  ;;  %v8496_v5 = vld [vmem:[%s8931_s13 + $0x378] sm:$0xff]   ;;  %2681 = vperm.xlu0 %8326, %v9392_v42   ;;  %v6850_v24 = vcombine.low %v314_v62, %v322_v63 }
 0x123   :  { %8338 = vset.pattern.permute.xlu1 %v8905_v53  ;;  %2195 = vmatmul.mubr.bf16.gmra.mrb[52].mxu0 %v6786_v10 }
 0x124   :  { %2824 = vperm.xlu1 %8338, %v9298_v1   ;;  %2276 = vmatmul.mubr.bf16.gmra.mrb[52].mxu1 %v6788_v13  ;;  %v291_v1 = vld [vmem:[%s8921_s5 + $0x1e8] sm:$0xff]  ;;  %v6836_v13 = vcombine.low %v299_v43, %v307_v49  ;;  %v8747_v43 = vld [vmem:[%s8926_s9 + $0x40] sm:$0xff]  ;;  %v268_v49 = vld [vmem:[%s8921_s5 + $0x130] sm:$0xff] }
 0x125   :  { %7555 = vmatpush3.bf16.msra.mxu0 %v8477_v14  ;;  %2202 = vmatprep.mubr.bf16.mxu0 %v6803_v15  ;;  %v6821_v35 = vcombine.high %v283_v26, %v291_v1  ;;  %v6820_v34 = vcombine.low %v283_v26, %v291_v1  ;;  %v6853_v14 = vcombine.high %v315_v6, %v323_v7  ;;  %v8499_v15 = vld [vmem:[%s8931_s13 + $0x3b8] sm:$0xff]  }
 0x126   :  { %2283 = vmatprep.mubr.bf16.mxu1 %v6805_v16  ;;  %7607 = vmatpush3.bf16.msra.mxu1 %v8479_v17  ;;  %v9487_v16 = vld [vmem:[%s8926_s9 + $0x10] sm:$0xff]  ;;  %v6852_v26 = vcombine.low %v315_v6, %v323_v7  ;;  %v10827_v6 = vmov 6  }
 0x127   :  { %v9428_v21 = vpop.permute.xlu1 %2583  ;;  %7556 = vmatprep.subr.bf16.mxu0 %v8480_v18  ;;  %7608 = vmatprep.subr.bf16.mxu1 %v8482_v20  ;;  %v236_v17 = vld [vmem:[%s8921_s5 + $0x30] sm:$0xff]  ;;  %v245_v20 = vld [vmem:[%s8921_s5 + $0x78] sm:$0xff] }
 0x128   :  { %2829 = vperm.xlu1 %8338, %v9291_v61   ;;  %v8492_v61 = vld [vmem:[%s8931_s13 + $0x370] sm:$0xff]   ;;  %2686 = vperm.xlu0 %8326, %v9487_v16   ;;  %s11027_s13 = sld [smem:[#allocation14_spill]] }
 0x129   :  { %7557 = vmatpush3.bf16.msra.mxu0 %v8481_v19  ;;  %v244_v18 = vld [vmem:[%s8921_s5 + $0x70] sm:$0xff]  ;;  %v237_v19 = vld [vmem:[%s8921_s5 + $0x38] sm:$0xff] }
 0x12a   :  { %7558 = vmatprep.subr.bf16.mxu0 %v8484_v27  ;;  %7609 = vmatpush3.bf16.msra.mxu1 %v8483_v22  ;;  %v9502_v27 = vld [vmem:[%s8926_s9 + $0x28] sm:$0xff]  ;;  %v6775_v1 = vcombine.high %v236_v17, %v244_v18  ;;  %v6776_v39 = vcombine.low %v237_v19, %v245_v20 }
 0x12b   :  { %2203 = vmatmul.mubr.bf16.gmra.mrb[56].mxu0 %v6802_v4  ;;  %7610 = vmatprep.subr.bf16.mxu1 %v8486_v36  ;;  %v6777_v4 = vcombine.high %v237_v19, %v245_v20  ;;  %v261_v36 = vld [vmem:[%s8921_s5 + $0xf8] sm:$0xff] }
 0x12c   :  { %v9445_v23 = vpop.permute.xlu1 %2696  ;;  %8339 = vset.pattern.permute.xlu1 %v8906_v38  ;;  %2284 = vmatmul.mubr.bf16.gmra.mrb[56].mxu1 %v6804_v30 }
 0x12d   :  { %3123 = vperm.xlu1 %8339, %v9441_v29   ;;  %2210 = vmatprep.mubr.bf16.mxu0 %v6819_v33  ;;  %v260_v33 = vld [vmem:[%s8921_s5 + $0xf0] sm:$0xff] }
 0x12e   :  { %2291 = vmatprep.mubr.bf16.mxu1 %v6821_v35  ;;  %7559 = vmatpush3.bf16.msra.mxu0 %v8485_v32  ;;  %v252_v32 = vld [vmem:[%s8921_s5 + $0xb0] sm:$0xff]  ;;  %v253_v35 = vld [vmem:[%s8921_s5 + $0xb8] sm:$0xff] }
 0x12f   :  { %7611 = vmatpush3.bf16.msra.mxu1 %v8487_v37  ;;  %7560 = vmatprep.subr.bf16.mxu0 %v8488_v2  ;;  %v6774_v2 = vcombine.low %v236_v17, %v244_v18  ;;  %v6791_v41 = vcombine.high %v252_v32, %v260_v33  ;;  %v309_v17 = vld [vmem:[%s8921_s5 + $0x278] sm:$0xff] }
 0x130   :  { %7612 = vmatprep.subr.bf16.mxu1 %v8490_v44  ;;  %2701 = vperm.xlu0 %8326, %v9502_v27   ;;  %v6793_v44 = vcombine.high %v253_v35, %v261_v36 }
 0x131   :  { %v9456_v48 = vpop.permute.xlu1 %2588  ;;  %8340 = vset.pattern.permute.xlu1 %v8907_v47 }
 0x132   :  { %3010 = vperm.xlu1 %8340, %v8746_v55   ;;  %7561 = vmatpush3.bf16.msra.mxu0 %v8489_v50  ;;  %v276_v50 = vld [vmem:[%s8921_s5 + $0x170] sm:$0xff]  ;;  %v6792_v55 = vcombine.low %v253_v35, %v261_v36  ;;  %v325_v35 = vld [vmem:[%s8921_s5 + $0x2f8] sm:$0xff] }
 0x133   :  { %2211 = vmatmul.mubr.bf16.gmra.mrb[60].mxu0 %v6818_v51  ;;  %7613 = vmatpush3.bf16.msra.mxu1 %v8491_v52  ;;  %v269_v52 = vld [vmem:[%s8921_s5 + $0x138] sm:$0xff] }
 0x134   :  { %2292 = vmatmul.mubr.bf16.gmra.mrb[60].mxu1 %v6820_v34  ;;  %2218 = vmatprep.mubr.bf16.mxu0 %v6835_v54  ;;  %v277_v34 = vld [vmem:[%s8921_s5 + $0x178] sm:$0xff]  ;;  %v6790_v54 = vcombine.low %v252_v32, %v260_v33 }
 0x135   :  { %v9464_v58 = vpop.permute.xlu1 %2593  ;;  %2299 = vmatprep.mubr.bf16.mxu1 %v6837_v56  ;;  %7562 = vmatprep.subr.bf16.mxu0 %v8492_v61  ;;  %v6807_v56 = vcombine.high %v268_v49, %v276_v50  ;;  %v6808_v7 = vcombine.low %v269_v52, %v277_v34  ;;  %v317_v33 = vld [vmem:[%s8921_s5 + $0x2b8] sm:$0xff] }
 0x136   :  { %8341 = vset.pattern.permute.xlu1 %v8904_v40  ;;  %7563 = vmatpush3.bf16.msra.mxu0 %v8493_v59  ;;  %v10829_v59 = vmov 7  }
 0x137   :  { %2942 = vperm.xlu1 %8341, %v9334_v45   ;;  %7614 = vmatprep.subr.bf16.mxu1 %v8494_v60  ;;  %v6851_v45 = vcombine.high %v314_v62, %v322_v63  ;;  %v6809_v60 = vcombine.high %v269_v52, %v277_v34  ;;  %v292_v62 = vld [vmem:[%s8921_s5 + $0x1f0] sm:$0xff]  ;;  %v285_v63 = vld [vmem:[%s8921_s5 + $0x1b8] sm:$0xff]  ;;  %v8748_v52 = vld [vmem:[%s8926_s9] sm:$0xff] }
 0x138   :  { %7615 = vmatpush3.bf16.msra.mxu1 %v8495_v3  ;;  %7564 = vmatprep.subr.bf16.mxu0 %v8496_v5  ;;  %v293_v3 = vld [vmem:[%s8921_s5 + $0x1f8] sm:$0xff] }
 0x139   :  { %7616 = vmatprep.subr.bf16.mxu1 %v8498_v8  ;;  %2716 = vperm.xlu0 %8326, %v8747_v43   ;;  %v6824_v20 = vcombine.low %v285_v63, %v293_v3 }
 0x13a   :  { %v9480_v10 = vpop.permute.xlu1 %2897  ;;  %7565 = vmatpush3.bf16.msra.mxu0 %v8497_v12  ;;  %v308_v12 = vld [vmem:[%s8921_s5 + $0x270] sm:$0xff] }
 0x13b   :  { %2947 = vperm.xlu1 %8341, %v9351_v11   ;;  %2219 = vmatmul.mubr.bf16.gmra.mrb[64].mxu0 %v6834_v0  ;;  %v6825_v0 = vcombine.high %v285_v63, %v293_v3 }
 0x13c   :  { %2300 = vmatmul.mubr.bf16.gmra.mrb[64].mxu1 %v6836_v13  ;;  %2226 = vmatprep.mubr.bf16.mxu0 %v6851_v45  ;;  %v9542_v13 = vld [vmem:[%s8926_s9 + $0x48] sm:$0xff] }
 0x13d   :  { %2307 = vmatprep.mubr.bf16.mxu1 %v6853_v14  ;;  %7617 = vmatpush3.bf16.msra.mxu1 %v8499_v15  ;;  %v9549_v14 = vld [vmem:[%s8926_s9 + $0x38] sm:$0xff] }
 0x13e   :  { %2731 = vperm.xlu0 %8326, %v9351_v11   ;;  %v301_v15 = vld [vmem:[%s8921_s5 + $0x238] sm:$0xff] }
 0x13f   :  { %v9493_v22 = vpop.permute.xlu1 %2784  ;;  %8342 = vset.pattern.permute.xlu1 %v8905_v53 }
 0x140   :  { %2839 = vperm.xlu1 %8342, %v9351_v11   ;;  %v284_v11 = vld [vmem:[%s8921_s5 + $0x1b0] sm:$0xff] }
 0x141   :  { %v6823_v8 = vcombine.high %v284_v11, %v292_v62  ;;  %v6822_v19 = vcombine.low %v284_v11, %v292_v62 }
 0x142   :  { %8330 = vset.pattern.permute.xlu0 %v8904_v40  ;;  %v6806_v40 = vcombine.low %v268_v49, %v276_v50  ;;  %v6856_v49 = vcombine.low %v317_v33, %v325_v35 }
 0x143   :  { %2227 = vmatmul.mubr.bf16.gmra.mrb[68].mxu0 %v6850_v24  ;;  %2892 = vperm.xlu0 %8330, %v9380_v31  }
 0x144   :  { %v9504_v30 = vpop.permute.xlu1 %2706  ;;  %8343 = vset.pattern.permute.xlu1 %v8906_v38  ;;  %2308 = vmatmul.mubr.bf16.gmra.mrb[68].mxu1 %v6852_v26  ;;  %v6841_v26 = vcombine.high %v301_v15, %v309_v17 }
 0x145   :  { %3128 = vperm.xlu1 %8343, %v9498_v25   ;;  %2348 = vmatprep.mubr.bf16.mxu0 %v6775_v1  ;;  %v316_v1 = vld [vmem:[%s8921_s5 + $0x2b0] sm:$0xff] }
 0x146   :  { %2429 = vmatprep.mubr.bf16.mxu1 %v6777_v4  ;;  %v324_v4 = vld [vmem:[%s8921_s5 + $0x2f0] sm:$0xff] }
 0x147   :  { %2907 = vperm.xlu0 %8330, %v9441_v29  }
 0x148   :  { %v9513_v37 = vpop.permute.xlu1 %2711 }
 0x149   :  { %8344 = vset.pattern.permute.xlu1 %v8907_v47 }
 0x14a   :  { %3020 = vperm.xlu1 %8344, %v9498_v25  }
 0x14b   :  { %2349 = vmatmul.mubr.bf16.vlgmr.msra.gmra.mrb[72].mxu0 %v6774_v2  ;;  %2922 = vperm.xlu0 %8330, %v9436_v28   ;;  %v6855_v2 = vcombine.high %v316_v1, %v324_v4 }
 0x14c   :  { %2430 = vmatmul.mubr.bf16.vlgmr.msra.gmra.mrb[72].mxu1 %v6776_v39  ;;  %2356 = vmatprep.mubr.bf16.mxu0 %v6791_v41  ;;  %v6857_v39 = vcombine.high %v317_v33, %v325_v35  ;;  %v9576_v41 = vld [vmem:[%s8926_s9 + $0x50] sm:$0xff]  ;;  %v8502_v35 = vld [vmem:[%s8946_s25 + $0x48] sm:$0xff]  }
 0x14d   :  { %v9520_v51 = vpop.permute.xlu1 %2603  ;;  %2437 = vmatprep.mubr.bf16.mxu1 %v6793_v44  ;;  %v6854_v44 = vcombine.low %v316_v1, %v324_v4  ;;  %v9634_v1 = vld [vmem:[%s8926_s9 + $0x58] sm:$0xff] }
 0x14e   :  { %10874 = vst [vmem:[#allocation41_spill] sm:$0xff] %v9520_v51  ;;  %3025 = vperm.xlu1 %8344, %v9502_v27  }
 0x14f   :  { %2937 = vperm.xlu0 %8330, %v9542_v13  }
 0x152   :  { %v9526_v61 = vpop.permute.xlu1 %2902  ;;  %8346 = vset.pattern.permute.xlu1 %v10829_v59 }
 0x153   :  { %3329 = vperm.xlu1 %8346, %v9392_v42   ;;  %2357 = vmatmul.mubr.bf16.gmra.mrb[76].mxu0 %v6790_v54  ;;  %v9594_v54 = vld [vmem:[%s8926_s9 + $0x40] sm:$0xff] }
 0x154   :  { %2438 = vmatmul.mubr.bf16.gmra.mrb[76].mxu1 %v6792_v55  ;;  %2364 = vmatprep.mubr.bf16.mxu0 %v6807_v56 }
 0x155   :  { %2445 = vmatprep.mubr.bf16.mxu1 %v6809_v60  ;;  %8337 = vset.pattern.permute.xlu0 %v8905_v53  ;;  %v6840_v53 = vcombine.low %v301_v15, %v309_v17 }
 0x156   :  { %2789 = vperm.xlu0 %8337, %v9392_v42  }
 0x157   :  { %v9536_v5 = vpop.permute.xlu1 %2794  ;;  %8347 = vset.pattern.permute.xlu1 %v10827_v6 }
 0x158   :  { %3216 = vperm.xlu1 %8347, %v9380_v31   ;;  %v300_v31 = vld [vmem:[%s8921_s5 + $0x230] sm:$0xff]  ;;  %s11025_s5 = sld [smem:[#allocation38_spill]] }
 0x159   :  { %v6839_v24 = vcombine.high %v300_v31, %v308_v12  ;;  %v6838_v36 = vcombine.low %v300_v31, %v308_v12 }
 0x15a   :  { %2804 = vperm.xlu0 %8337, %v9498_v25  }
 0x15b   :  { %v9544_v45 = vpop.permute.xlu1 %2799  ;;  %2365 = vmatmul.mubr.bf16.gmra.mrb[80].mxu0 %v6806_v40  ;;  %v8501_v40 = vld [vmem:[%s8946_s25] sm:$0xff]  }
 0x15c   :  { %8348 = vset.pattern.permute.xlu1 %v8906_v38  ;;  %2446 = vmatmul.mubr.bf16.gmra.mrb[80].mxu1 %v6808_v7 }
 0x15d   :  { %3138 = vperm.xlu1 %8348, %v9436_v28   ;;  %2372 = vmatprep.mubr.bf16.mxu0 %v6823_v8 }
 0x15e   :  { %2453 = vmatprep.mubr.bf16.mxu1 %v6825_v0  ;;  %2819 = vperm.xlu0 %8337, %v9549_v14  }
 0x160   :  { %v9557_v18 = vpop.permute.xlu1 %2721 }
 0x161   :  { %10875 = vst [vmem:[#allocation42_spill] sm:$0xff] %v9557_v18  ;;  %3143 = vperm.xlu1 %8348, %v9549_v14  }
 0x162   :  { %2834 = vperm.xlu0 %8337, %v9576_v41  }
 0x163   :  { %2373 = vmatmul.mubr.bf16.gmra.mrb[84].mxu0 %v6822_v19 }
 0x164   :  { %2454 = vmatmul.mubr.bf16.gmra.mrb[84].mxu1 %v6824_v20  ;;  %2380 = vmatprep.mubr.bf16.mxu0 %v6839_v24 }
 0x165   :  { %v9564_v32 = vpop.permute.xlu1 %2608  ;;  %8349 = vset.pattern.permute.xlu1 %v8907_v47  ;;  %2461 = vmatprep.mubr.bf16.mxu1 %v6841_v26 }
 0x166   :  { %10876 = vst [vmem:[#allocation43_spill] sm:$0xff] %v9564_v32  ;;  %3035 = vperm.xlu1 %8349, %v9549_v14   ;;  %8345 = vset.pattern.permute.xlu0 %v10829_v59 }
 0x167   :  { %3324 = vperm.xlu0 %8345, %v8748_v52  }
 0x16a   :  { %v9571_v42 = vpop.permute.xlu1 %2912  ;;  %8350 = vset.pattern.permute.xlu1 %v10829_v59 }
 0x16b   :  { %3334 = vperm.xlu1 %8350, %v9487_v16   ;;  %2381 = vmatmul.mubr.bf16.gmra.mrb[88].mxu0 %v6838_v36  ;;  %v8503_v36 = vld [vmem:[%s8946_s25 + $0x8] sm:$0xff]  }
 0x16c   :  { %2462 = vmatmul.mubr.bf16.gmra.mrb[88].mxu1 %v6840_v53  ;;  %2388 = vmatprep.mubr.bf16.mxu0 %v6855_v2 }
 0x16d   :  { %2469 = vmatprep.mubr.bf16.mxu1 %v6857_v39  ;;  %3339 = vperm.xlu0 %8345, %v9441_v29  }
 0x16e   :  { %v9579_v43 = vpop.permute.xlu1 %2917 }
 0x16f   :  { %8352 = vset.pattern.permute.xlu1 %v10827_v6 }
 0x170   :  { %3226 = vperm.xlu1 %8352, %v9487_v16  }
 0x171   :  { %8351 = vset.pattern.permute.xlu0 %v8907_v47 }
 0x172   :  { %3000 = vperm.xlu0 %8351, %v8748_v52  }
 0x173   :  { %v9584_v50 = vpop.permute.xlu1 %2809  ;;  %2389 = vmatmul.mubr.bf16.gmra.mrb[92].mxu0 %v6854_v44 }
 0x174   :  { %3231 = vperm.xlu1 %8352, %v9441_v29   ;;  %2470 = vmatmul.mubr.bf16.gmra.mrb[92].mxu1 %v6856_v49 }
 0x176   :  { %3015 = vperm.xlu0 %8351, %v9441_v29  }
 0x178   :  { %v9589_v34 = vpop.permute.xlu1 %2726  ;;  %8353 = vset.pattern.permute.xlu1 %v8906_v38 }
 0x179   :  { %10877 = vst [vmem:[#allocation44_spill] sm:$0xff] %v9589_v34  ;;  %3153 = vperm.xlu1 %8353, %v9542_v13  }
 0x17a   :  { %3030 = vperm.xlu0 %8351, %v9436_v28   ;;  %v8500_v28 = vld [vmem:[%s8946_s25 + $0x40] sm:$0xff]  }
 0x17b   :  { %7654 = vmatprep.subr.bf16.mxu0 %v8500_v28  ;;  %v8504_v28 = vld [vmem:[%s8946_s25 + $0x50] sm:$0xff]  }
 0x17c   :  { %7655 = vmatpush3.bf16.msra.mxu0 %v8501_v40  ;;  %v8505_v40 = vld [vmem:[%s8946_s25 + $0x10] sm:$0xff]  }
 0x17d   :  { %v9597_v55 = vpop.permute.xlu1 %2618  ;;  %8354 = vset.pattern.permute.xlu1 %v8907_v47  ;;  %7656 = vmatprep.subr.bf16.mxu0 %v8502_v35  ;;  %v8749_v35 = vld [vmem:[%s8926_s9 + $0x8] sm:$0xff] }
 0x17e   :  { %10878 = vst [vmem:[#allocation45_spill] sm:$0xff] %v9597_v55  ;;  %3040 = vperm.xlu1 %8354, %v9594_v54   ;;  %3045 = vperm.xlu0 %8351, %v9542_v13  }
 0x180   :  { %7657 = vmatpush3.bf16.msra.mxu0 %v8503_v36  ;;  %v8511_v36 = vld [vmem:[%s8946_s25 + $0x88] sm:$0xff]  }
 0x181   :  { %v9602_v56 = vpop.permute.xlu1 %2623  ;;  %7658 = vmatprep.subr.bf16.mxu0 %v8504_v28  ;;  %v3418_v28 = vld [vmem:[%s8926_s9] sm:$0xff] }
 0x182   :  { %10879 = vst [vmem:[#allocation46_spill] sm:$0xff] %v9602_v56  ;;  %8356 = vset.pattern.permute.xlu1 %v10829_v59  ;;  %8355 = vset.pattern.permute.xlu0 %v8906_v38 }
 0x183   :  { %3344 = vperm.xlu1 %8356, %v9498_v25   ;;  %3118 = vperm.xlu0 %8355, %v9487_v16  }
 0x184   :  { %7659 = vmatpush3.bf16.msra.mxu0 %v8505_v40  ;;  %v9673_v40 = vpop.permute.xlu0 %2578 }
 0x186   :  { %v9607_v60 = vpop.permute.xlu1 %2927 }
 0x187   :  { %3349 = vperm.xlu1 %8356, %v9502_v27   ;;  %3133 = vperm.xlu0 %8355, %v9502_v27  }
 0x18b   :  { %v9611_v11 = vpop.permute.xlu1 %2814  ;;  %8357 = vset.pattern.permute.xlu1 %v10827_v6  ;;  %3148 = vperm.xlu0 %8355, %v9594_v54  }
 0x18c   :  { %3241 = vperm.xlu1 %8357, %v9502_v27  }
 0x18e   :  { %v7254_v62 = vpop.f32.mrb[0].mxu0 }
 0x18f   :  { %v7306_v29 = vpop.f32.mrb[0].mxu1  ;;  %v7255_v3 = vpop.f32.mrb[1].mxu0  ;;  %3163 = vperm.xlu0 %8355, %v9634_v1  }
 0x190   :  { %v9617_v63 = vpop.permute.xlu1 %3108  ;;  %8358 = vset.pattern.permute.xlu1 %v8906_v38  ;;  %v7256_v7 = vadd.f32 %v7255_v3, %v7254_v62  ;;  %v7307_v8 = vpop.f32.mrb[1].mxu1  ;;  %v8506_v3 = vld [vmem:[%s8946_s25 + $0xc0] sm:$0xff]  }
 0x191   :  { %10880 = vst [vmem:[#allocation47_spill] sm:$0xff] %v9617_v63  ;;  %3158 = vperm.xlu1 %8358, %v9576_v41   ;;  %v7257_v0 = vpop.f32.mrb[2].mxu0  ;;  %v7308_v31 = vadd.f32 %v7307_v8, %v7306_v29  ;;  %v7309_v12 = vpop.f32.mrb[2].mxu1  ;;  %7706 = vmatprep.subr.bf16.mxu1 %v8506_v3  ;;  %v8513_v3 = vld [vmem:[%s8946_s25 + $0xd0] sm:$0xff]   ;;  %v10891_v63 = vmov 6  }
 0x192   :  { %v7258_v15 = vpop.f32.mrb[3].mxu0  ;;  %v7310_v19 = vpop.f32.mrb[3].mxu1 }
 0x193   :  { %v7259_v17 = vadd.f32 %v7258_v15, %v7257_v0  ;;  %v9624_v38 = vadd.f32 %v7308_v31, %v7256_v7  ;;  %v7311_v16 = vadd.f32 %v7310_v19, %v7309_v12  ;;  %v8507_v7 = vld [vmem:[%s8946_s25 + $0x80] sm:$0xff]   ;;  %8359 = vset.pattern.permute.xlu0 %v10827_v6  ;;  %v8509_v19 = vld [vmem:[%s8946_s25 + $0x18] sm:$0xff]  }
 0x194   :  { %v9628_v20 = vpop.permute.xlu1 %3113  ;;  %3221 = vperm.xlu0 %8359, %v8749_v35   ;;  %7707 = vmatpush3.bf16.msra.mxu1 %v8507_v7  ;;  %v8515_v7 = vld [vmem:[%s8946_s25 + $0x90] sm:$0xff]   ;;  %v3419_v35 = vld [vmem:[%s8926_s9 + $0x8] sm:$0xff] }
 0x195   :  { %8360 = vset.pattern.permute.xlu1 %v8907_v47  ;;  %10881 = vst [vmem:[#allocation48_spill] sm:$0xff] %v9628_v20  ;;  %v9630_v24 = vadd.f32 %v7311_v16, %v7259_v17  ;;  %v8508_v17 = vld [vmem:[%s8946_s25 + $0x58] sm:$0xff]   ;;  %v8510_v16 = vld [vmem:[%s8946_s25 + $0xc8] sm:$0xff]  }
 0x196   :  { %3050 = vperm.xlu1 %8360, %v9576_v41   ;;  %v7260_v26 = vpop.f32.mrb[4].mxu0  ;;  %7660 = vmatprep.subr.bf16.mxu0 %v8508_v17 }
 0x197   :  { %v7312_v4 = vpop.f32.mrb[4].mxu1  ;;  %v7261_v33 = vpop.f32.mrb[5].mxu0  ;;  %7708 = vmatprep.subr.bf16.mxu1 %v8510_v16  ;;  %7661 = vmatpush3.bf16.msra.mxu0 %v8509_v19  ;;  %v10825_v16 = vmov 8  }
 0x198   :  { %v7262_v53 = vadd.f32 %v7261_v33, %v7260_v26  ;;  %v7313_v27 = vpop.f32.mrb[5].mxu1  ;;  %v7263_v47 = vpop.f32.mrb[6].mxu0  ;;  %3236 = vperm.xlu0 %8359, %v9498_v25   ;;  %7709 = vmatpush3.bf16.msra.mxu1 %v8511_v36 }
 0x199   :  { %v7314_v2 = vadd.f32 %v7313_v27, %v7312_v4  ;;  %v7315_v39 = vpop.f32.mrb[6].mxu1  ;;  %v7264_v41 = vpop.f32.mrb[7].mxu0  ;;  %7710 = vmatprep.subr.bf16.mxu1 %v8513_v3 }
 0x19a   :  { %3055 = vperm.xlu1 %8360, %v9634_v1   ;;  %v7265_v44 = vadd.f32 %v7264_v41, %v7263_v47  ;;  %v7316_v49 = vpop.f32.mrb[7].mxu1  ;;  %v9640_v52 = vpop.permute.xlu1 %3005 }
 0x19b   :  { %10882 = vst [vmem:[#allocation49_spill] sm:$0xff] %v9640_v52  ;;  %v9642_v62 = vadd.f32 %v7314_v2, %v7262_v53  ;;  %v7317_v29 = vadd.f32 %v7316_v49, %v7315_v39  ;;  %v10889_v52 = vmov 7  }
 0x19c   :  { %3251 = vperm.xlu0 %8359, %v9549_v14   ;;  %7711 = vmatpush3.bf16.msra.mxu1 %v8515_v7 }
 0x19d   :  { %v9649_v8 = vadd.f32 %v7317_v29, %v7265_v44  ;;  %v9667_v29 = vld [vmem:[%s8926_s9 + $0x30] sm:$0xff] }
 0x19e   :  { %8361 = vset.pattern.permute.xlu1 %v10829_v59  ;;  %v7266_v0 = vpop.f32.mrb[8].mxu0  ;;  %v9653_v31 = vpop.permute.xlu1 %2932 }
 0x19f   :  { %3359 = vperm.xlu1 %8361, %v9549_v14   ;;  %10883 = vst [vmem:[#allocation50_spill] sm:$0xff] %v9653_v31  ;;  %v7318_v12 = vpop.f32.mrb[8].mxu1  ;;  %v7267_v15 = vpop.f32.mrb[9].mxu0  ;;  %v8514_v14 = vld [vmem:[%s8946_s25 + $0x20] sm:$0xff]  }
 0x1a0   :  { %v7268_v26 = vadd.f32 %v7267_v15, %v7266_v0  ;;  %v7319_v4 = vpop.f32.mrb[9].mxu1  ;;  %v7269_v33 = vpop.f32.mrb[10].mxu0  ;;  %8363 = vset.pattern.permute.xlu0 %v10829_v59 }
 0x1a1   :  { %v7320_v53 = vadd.f32 %v7319_v4, %v7318_v12  ;;  %v7321_v27 = vpop.f32.mrb[10].mxu1  ;;  %v7270_v47 = vpop.f32.mrb[11].mxu0  ;;  %3354 = vperm.xlu0 %8363, %v9667_v29  }
 0x1a2   :  { %v7271_v2 = vadd.f32 %v7270_v47, %v7269_v33  ;;  %v7322_v39 = vpop.f32.mrb[11].mxu1 }
 0x1a3   :  { %8362 = vset.pattern.permute.xlu1 %v10827_v6  ;;  %v9662_v41 = vpop.permute.xlu1 %2824  ;;  %v9664_v44 = vadd.f32 %v7320_v53, %v7268_v26  ;;  %v7323_v49 = vadd.f32 %v7322_v39, %v7321_v27  ;;  %v8516_v26 = vld [vmem:[%s8946_s25 + $0xd8] sm:$0xff]   ;;  %v9684_v39 = vpop.permute.xlu0 %2598 }
 0x1a4   :  { %10884 = vst [vmem:[#allocation51_spill] sm:$0xff] %v9662_v41  ;;  %3246 = vperm.xlu1 %8362, %v9667_v29   ;;  %10886 = vst [vmem:[#allocation53_spill] sm:$0xff] %v9684_v39  ;;  %7712 = vmatprep.subr.bf16.mxu1 %v8516_v26 }
 0x1a5   :  { %v9676_v0 = vadd.f32 %v7323_v49, %v7271_v2  ;;  %v8517_v49 = vld [vmem:[%s8946_s25 + $0x98] sm:$0xff]   ;;  %3369 = vperm.xlu0 %8363, %v9542_v13  }
 0x1a6   :  { %v7272_v12 = vpop.f32.mrb[12].mxu0  ;;  %7713 = vmatpush3.bf16.msra.mxu1 %v8517_v49 }
 0x1a7   :  { %v9678_v15 = vpop.permute.xlu1 %2829  ;;  %v7324_v17 = vpop.f32.mrb[12].mxu1 }
 0x1a8   :  { %10885 = vst [vmem:[#allocation52_spill] sm:$0xff] %v9678_v15  ;;  %8364 = vset.pattern.permute.xlu1 %v10825_v16  ;;  %v7273_v19 = vpop.f32.mrb[13].mxu0  ;;  %v7325_v4 = vpop.f32.mrb[13].mxu1  ;;  %v8755_v15 = vld [vmem:[%s8926_s9 + $0x38] sm:$0xff] }
 0x1a9   :  { %v7274_v25 = vadd.f32 %v7273_v19, %v7272_v12  ;;  %3432 = vperm.xlu1 %8364, %v3418_v28   ;;  %v7275_v33 = vpop.f32.mrb[14].mxu0  ;;  %v7326_v36 = vadd.f32 %v7325_v4, %v7324_v17  ;;  %v7327_v53 = vpop.f32.mrb[14].mxu1  ;;  %v8512_v12 = vld [vmem:[%s8946_s25 + $0x60] sm:$0xff]   ;;  %3379 = vperm.xlu0 %8363, %v9634_v1  }
 0x1aa   :  { %v7276_v27 = vpop.f32.mrb[15].mxu0  ;;  %v7328_v2 = vpop.f32.mrb[15].mxu1  ;;  %v8520_v19 = vld [vmem:[%s8946_s25 + $0xe0] sm:$0xff]   ;;  %7662 = vmatprep.subr.bf16.mxu0 %v8512_v12 }
 0x1ab   :  { %v7277_v47 = vadd.f32 %v7276_v27, %v7275_v33  ;;  %v9687_v3 = vadd.f32 %v7326_v36, %v7274_v25  ;;  %v7329_v28 = vadd.f32 %v7328_v2, %v7327_v53  ;;  %v9698_v25 = vpop.permute.xlu0 %2613  ;;  %7663 = vmatpush3.bf16.msra.mxu0 %v8514_v14  ;;  %v8521_v4 = vld [vmem:[%s8946_s25 + $0xa0] sm:$0xff]   ;;  %v8911_v33 = vmov 0.0   ;;  %v8518_v53 = vld [vmem:[%s8946_s25 + $0x68] sm:$0xff]   ;;  %7714 = vmatprep.subr.bf16.mxu1 %v8520_v19 }
 0x1ac   :  { %v9696_v7 = vpop.permute.xlu1 %3123  ;;  %10888 = vst [vmem:[#allocation55_spill] sm:$0xff] %v9698_v25  ;;  %2528 = vst [vmem:[#allocation2] sm:$0xff] %v8911_v33  ;;  %v8523_v27 = vld [vmem:[%s8946_s25 + $0xe8] sm:$0xff]   ;;  %7664 = vmatprep.subr.bf16.mxu0 %v8518_v53  ;;  %7715 = vmatpush3.bf16.msra.mxu1 %v8521_v4  ;;  %v8527_v53 = vld [vmem:[%s8946_s25 + $0xb0] sm:$0xff]  }
 0x1ad   :  { %3437 = vperm.xlu1 %8364, %v3419_v35   ;;  %v9693_v17 = vadd.f32 %v7329_v28, %v7277_v47  ;;  %10887 = vst [vmem:[#allocation54_spill] sm:$0xff] %v9696_v7  ;;  %2541 = vst [vmem:[#allocation2 + $0x68] sm:$0xff] %v8911_v33  ;;  %v8751_v28 = vld [vmem:[%s8926_s9 + $0x18] sm:$0xff]  ;;  %v8519_v14 = vld [vmem:[%s8946_s25 + $0x28] sm:$0xff]   ;;  %7716 = vmatprep.subr.bf16.mxu1 %v8523_v27 }
 0x1ae   :  { %v7278_v26 = vpop.f32.mrb[16].mxu0  ;;  %v8525_v19 = vld [vmem:[%s8946_s25 + $0xa8] sm:$0xff]   ;;  %v8522_v7 = vld [vmem:[%s8946_s25 + $0x70] sm:$0xff]   ;;  %v8528_v27 = vld [vmem:[%s8946_s25 + $0x78] sm:$0xff]  }
 0x1af   :  { %v7330_v35 = vpop.f32.mrb[16].mxu1  ;;  %v7279_v36 = vpop.f32.mrb[17].mxu0  ;;  %7665 = vmatpush3.bf16.msra.mxu0 %v8519_v14  ;;  %v8756_v25 = vld [vmem:[%s8926_s9 + $0x28] sm:$0xff] }
 0x1b0   :  { %v7280_v47 = vadd.f32 %v7279_v36, %v7278_v26  ;;  %v7331_v2 = vpop.f32.mrb[17].mxu1  ;;  %v7281_v12 = vpop.f32.mrb[18].mxu0  ;;  %7666 = vmatprep.subr.bf16.mxu0 %v8522_v7  ;;  %7717 = vmatpush3.bf16.msra.mxu1 %v8525_v19  ;;  %v10892_v7 = vmov 8  }
 0x1b1   :  { %3447 = vperm.xlu1 %8364, %v8751_v28   ;;  %v7332_v16 = vadd.f32 %v7331_v2, %v7330_v35  ;;  %v7333_v49 = vpop.f32.mrb[18].mxu1  ;;  %v7282_v6 = vpop.f32.mrb[19].mxu0  ;;  %v8526_v28 = vld [vmem:[%s8946_s25 + $0xf0] sm:$0xff]   ;;  %8369 = vset.pattern.permute.xlu0 %v10892_v7 }
 0x1b2   :  { %v7283_v33 = vadd.f32 %v7282_v6, %v7281_v12  ;;  %v7334_v59 = vpop.f32.mrb[19].mxu1  ;;  %v8524_v35 = vld [vmem:[%s8946_s25 + $0x30] sm:$0xff]   ;;  %v9717_v6 = vpop.permute.xlu1 %3010  ;;  %7718 = vmatprep.subr.bf16.mxu1 %v8526_v28 }
 0x1b3   :  { %v9707_v26 = vadd.f32 %v7332_v16, %v7280_v47  ;;  %v7335_v36 = vadd.f32 %v7334_v59, %v7333_v49  ;;  %10890 = vst [vmem:[#allocation56_spill] sm:$0xff] %v9717_v6  ;;  %v9719_v59 = vpop.permute.xlu0 %2676  ;;  %7667 = vmatpush3.bf16.msra.mxu0 %v8524_v35  ;;  %v8529_v49 = vld [vmem:[%s8946_s25 + $0x38] sm:$0xff]   ;;  %v8752_v28 = vld [vmem:[%s8926_s9 + $0x10] sm:$0xff] }
 0x1b4   :  { %3442 = vperm.xlu0 %8369, %v8752_v28   ;;  %7719 = vmatpush3.bf16.msra.mxu1 %v8527_v53  ;;  %v8754_v28 = vld [vmem:[%s8926_s9 + $0x20] sm:$0xff] }
 0x1b5   :  { %8365 = vset.pattern.permute.xlu1 %v10889_v52  ;;  %v9713_v2 = vadd.f32 %v7335_v36, %v7283_v33  ;;  %v8530_v33 = vld [vmem:[%s8946_s25 + $0xf8] sm:$0xff]   ;;  %7668 = vmatprep.subr.bf16.mxu0 %v8528_v27 }
 0x1b6   :  { %3364 = vperm.xlu1 %8365, %v9594_v54   ;;  %v7284_v13 = vpop.f32.mrb[20].mxu0  ;;  %7720 = vmatprep.subr.bf16.mxu1 %v8530_v33 }
 0x1b7   :  { %v7336_v16 = vpop.f32.mrb[20].mxu1  ;;  %v7285_v4 = vpop.f32.mrb[21].mxu0  ;;  %7669 = vmatpush3.bf16.msra.mxu0 %v8529_v49 }
 0x1b8   :  { %v7286_v47 = vadd.f32 %v7285_v4, %v7284_v13  ;;  %v7337_v12 = vpop.f32.mrb[21].mxu1  ;;  %v7287_v14 = vpop.f32.mrb[22].mxu0  ;;  %v8531_v4 = vld [vmem:[%s8946_s25 + $0xb8] sm:$0xff]   ;;  %3452 = vperm.xlu0 %8369, %v8754_v28  }
 0x1b9   :  { %v7338_v36 = vadd.f32 %v7337_v12, %v7336_v16  ;;  %v7339_v6 = vpop.f32.mrb[22].mxu1  ;;  %v7288_v56 = vpop.f32.mrb[23].mxu0  ;;  %7721 = vmatpush3.bf16.msra.mxu1 %v8531_v4 }
 0x1ba   :  { %8366 = vset.pattern.permute.xlu1 %v10891_v63  ;;  %v7289_v19 = vadd.f32 %v7288_v56, %v7287_v14  ;;  %v7340_v35 = vpop.f32.mrb[23].mxu1  ;;  %v9729_v13 = vpop.permute.xlu0 %2681  ;;  %v9739_v56 = vld [vmem:[%s8926_s9 + $0x48] sm:$0xff] }
 0x1bb   :  { %3256 = vperm.xlu1 %8366, %v9594_v54   ;;  %v9732_v55 = vadd.f32 %v7338_v36, %v7286_v47  ;;  %v7341_v16 = vadd.f32 %v7340_v35, %v7339_v6  ;;  %v9734_v12 = vpop.permute.xlu1 %2942 }
 0x1bc   :  { %10893 = vst [vmem:[#allocation57_spill] sm:$0xff] %v9734_v12  ;;  %3467 = vperm.xlu0 %8369, %v8755_v15  }
 0x1bd   :  { %v9736_v34 = vadd.f32 %v7341_v16, %v7289_v19 }
 0x1be   :  { %v7358_v14 = vpop.f32.mrb[24].mxu0  ;;  %v9743_v20 = vpop.permute.xlu0 %2686 }
 0x1bf   :  { %3261 = vperm.xlu1 %8366, %v9739_v56   ;;  %v7410_v47 = vpop.f32.mrb[24].mxu1  ;;  %v7359_v6 = vpop.f32.mrb[25].mxu0 }
 0x1c0   :  { %v7360_v53 = vadd.f32 %v7359_v6, %v7358_v14  ;;  %v7411_v27 = vpop.f32.mrb[25].mxu1  ;;  %v7361_v49 = vpop.f32.mrb[26].mxu0  ;;  %3472 = vperm.xlu0 %8369, %v9594_v54  }
 0x1c1   :  { %v7412_v33 = vadd.f32 %v7411_v27, %v7410_v47  ;;  %v7413_v36 = vpop.f32.mrb[26].mxu1  ;;  %v7362_v19 = vpop.f32.mrb[27].mxu0 }
 0x1c2   :  { %v2027_v35 = vadd.f32 %v7360_v53, %v9624_v38  ;;  %v7363_v16 = vadd.f32 %v7362_v19, %v7361_v49  ;;  %v7414_v12 = vpop.f32.mrb[27].mxu1  ;;  %v9747_v28 = vpop.permute.xlu1 %2947 }
 0x1c3   :  { %8367 = vset.pattern.permute.xlu1 %v10892_v7  ;;  %10894 = vst [vmem:[#allocation58_spill] sm:$0xff] %v9747_v28  ;;  %v7415_v41 = vadd.f32 %v7414_v12, %v7413_v36  ;;  %v9754_v47 = vpop.permute.xlu0 %2701  ;;  %v8532_v12 = vld [vmem:[%s8946_s25 + $0x140] sm:$0xff]  }
 0x1c4   :  { %3457 = vperm.xlu1 %8367, %v8756_v25   ;;  %v9751_v4 = vadd.f32 %v7412_v33, %v2027_v35  ;;  %v2030_v14 = vadd.f32 %v7363_v16, %v9630_v24  ;;  %7758 = vmatprep.subr.bf16.mxu0 %v8532_v12 }
 0x1c5   :  { %3487 = vperm.xlu0 %8369, %v9634_v1  }
 0x1c6   :  { %v9756_v6 = vadd.f32 %v7415_v41, %v2030_v14  ;;  %v7364_v38 = vpop.f32.mrb[28].mxu0  ;;  %v9758_v53 = vpop.permute.xlu1 %2839 }
 0x1c7   :  { %10895 = vst [vmem:[#allocation59_spill] sm:$0xff] %v9758_v53  ;;  %v7416_v27 = vpop.f32.mrb[28].mxu1  ;;  %v7365_v15 = vpop.f32.mrb[29].mxu0 }
 0x1c8   :  { %3462 = vperm.xlu1 %8367, %v9667_v29   ;;  %v7366_v49 = vadd.f32 %v7365_v15, %v7364_v38  ;;  %v7417_v25 = vpop.f32.mrb[29].mxu1  ;;  %v7367_v33 = vpop.f32.mrb[30].mxu0  ;;  %v8757_v15 = vld [vmem:[%s8926_s9 + $0x50] sm:$0xff]  ;;  %s11026_s9 = sld [smem:[#allocation39_spill]] }
 0x1c9   :  { %v7418_v24 = vadd.f32 %v7417_v25, %v7416_v27  ;;  %v7419_v36 = vpop.f32.mrb[30].mxu1  ;;  %v7368_v19 = vpop.f32.mrb[31].mxu0  ;;  %v8538_v27 = vld [vmem:[%s8946_s25 + $0x1c0] sm:$0xff]  }
 0x1ca   :  { %v2035_v41 = vadd.f32 %v7366_v49, %v9642_v62  ;;  %v7369_v35 = vadd.f32 %v7368_v19, %v7367_v33  ;;  %v7420_v16 = vpop.f32.mrb[31].mxu1  ;;  %v9764_v14 = vpop.permute.xlu0 %2716  ;;  %7810 = vmatprep.subr.bf16.mxu1 %v8538_v27 }
 0x1cb   :  { %10896 = vst [vmem:[#allocation60_spill] sm:$0xff] %v9764_v14  ;;  %v7421_v54 = vadd.f32 %v7420_v16, %v7419_v36  ;;  %v9773_v25 = vpop.permute.xlu1 %3128 }
 0x1cc   :  { %8368 = vset.pattern.permute.xlu1 %v10889_v52  ;;  %v9768_v29 = vadd.f32 %v7418_v24, %v2035_v41  ;;  %v2038_v38 = vadd.f32 %v7369_v35, %v9649_v8  ;;  %10897 = vst [vmem:[#allocation61_spill] sm:$0xff] %v9773_v25 }
 0x1cd   :  { %3374 = vperm.xlu1 %8368, %v8757_v15  }
 0x1ce   :  { %v9775_v12 = vadd.f32 %v7421_v54, %v2038_v38  ;;  %v7370_v62 = vpop.f32.mrb[32].mxu0  ;;  %v9777_v49 = vpop.permute.xlu0 %2731 }
 0x1cf   :  { %10898 = vst [vmem:[#allocation62_spill] sm:$0xff] %v9777_v49  ;;  %v7422_v33 = vpop.f32.mrb[32].mxu1  ;;  %v7371_v19 = vpop.f32.mrb[33].mxu0 }
 0x1d0   :  { %v7372_v36 = vadd.f32 %v7371_v19, %v7370_v62  ;;  %v7423_v16 = vpop.f32.mrb[33].mxu1  ;;  %v7373_v52 = vpop.f32.mrb[34].mxu0 }
 0x1d1   :  { %8370 = vset.pattern.permute.xlu1 %v10891_v63  ;;  %v7424_v24 = vadd.f32 %v7423_v16, %v7422_v33  ;;  %v7425_v8 = vpop.f32.mrb[34].mxu1  ;;  %v7374_v41 = vpop.f32.mrb[35].mxu0 }
 0x1d2   :  { %3266 = vperm.xlu1 %8370, %v8757_v15   ;;  %v2043_v35 = vadd.f32 %v7372_v36, %v9664_v44  ;;  %v7375_v25 = vadd.f32 %v7374_v41, %v7373_v52  ;;  %v7426_v54 = vpop.f32.mrb[35].mxu1  ;;  %v9781_v38 = vpop.permute.xlu0 %2892 }
 0x1d3   :  { %v7427_v53 = vadd.f32 %v7426_v54, %v7425_v8  ;;  %v9786_v62 = vpop.permute.xlu1 %3020 }
 0x1d4   :  { %v9783_v28 = vadd.f32 %v7424_v24, %v2043_v35  ;;  %v2046_v27 = vadd.f32 %v7375_v25, %v9676_v0  ;;  %10899 = vst [vmem:[#allocation63_spill] sm:$0xff] %v9786_v62 }
 0x1d6   :  { %3271 = vperm.xlu1 %8370, %v9634_v1   ;;  %v9789_v63 = vadd.f32 %v7427_v53, %v2046_v27  ;;  %v7376_v33 = vpop.f32.mrb[36].mxu0  ;;  %v9791_v19 = vpop.permute.xlu0 %2907 }
 0x1d7   :  { %v7428_v16 = vpop.f32.mrb[36].mxu1  ;;  %v7377_v44 = vpop.f32.mrb[37].mxu0 }
 0x1d8   :  { %v7378_v36 = vadd.f32 %v7377_v44, %v7376_v33  ;;  %v7429_v52 = vpop.f32.mrb[37].mxu1  ;;  %v7379_v41 = vpop.f32.mrb[38].mxu0 }
 0x1d9   :  { %v7430_v49 = vadd.f32 %v7429_v52, %v7428_v16  ;;  %v7431_v8 = vpop.f32.mrb[38].mxu1  ;;  %v7380_v24 = vpop.f32.mrb[39].mxu0 }
 0x1da   :  { %8371 = vset.pattern.permute.xlu1 %v10892_v7  ;;  %v2051_v0 = vadd.f32 %v7378_v36, %v9687_v3  ;;  %v7381_v25 = vadd.f32 %v7380_v24, %v7379_v41  ;;  %v7432_v35 = vpop.f32.mrb[39].mxu1  ;;  %v9796_v1 = vpop.permute.xlu1 %3025 }
 0x1db   :  { %3477 = vperm.xlu1 %8371, %v9739_v56   ;;  %10900 = vst [vmem:[#allocation64_spill] sm:$0xff] %v9796_v1  ;;  %v7433_v53 = vadd.f32 %v7432_v35, %v7431_v8  ;;  %v9801_v33 = vpop.permute.xlu0 %2922 }
 0x1dc   :  { %v9798_v54 = vadd.f32 %v7430_v49, %v2051_v0  ;;  %v2054_v27 = vadd.f32 %v7381_v25, %v9693_v17 }
 0x1de   :  { %v9803_v16 = vadd.f32 %v7433_v53, %v2054_v27  ;;  %v7382_v7 = vpop.f32.mrb[40].mxu0  ;;  %v9805_v44 = vpop.permute.xlu1 %3329 }
 0x1df   :  { %3482 = vperm.xlu1 %8371, %v8757_v15   ;;  %10901 = vst [vmem:[#allocation65_spill] sm:$0xff] %v9805_v44  ;;  %v7434_v3 = vpop.f32.mrb[40].mxu1  ;;  %v7383_v36 = vpop.f32.mrb[41].mxu0 }
 0x1e0   :  { %v7384_v52 = vadd.f32 %v7383_v36, %v7382_v7  ;;  %v7435_v41 = vpop.f32.mrb[41].mxu1  ;;  %v7385_v56 = vpop.f32.mrb[42].mxu0 }
 0x1e1   :  { %v7436_v24 = vadd.f32 %v7435_v41, %v7434_v3  ;;  %v7437_v1 = vpop.f32.mrb[42].mxu1  ;;  %v7386_v8 = vpop.f32.mrb[43].mxu0 }
 0x1e2   :  { %v2059_v49 = vadd.f32 %v7384_v52, %v9707_v26  ;;  %v7387_v0 = vadd.f32 %v7386_v8, %v7385_v56  ;;  %v7438_v17 = vpop.f32.mrb[43].mxu1  ;;  %v9808_v25 = vpop.permute.xlu0 %2937 }
 0x1e3   :  { %10902 = vst [vmem:[#allocation66_spill] sm:$0xff] %v9808_v25  ;;  %v7439_v35 = vadd.f32 %v7438_v17, %v7437_v1  ;;  %v9813_v27 = vpop.permute.xlu1 %3216 }
 0x1e4   :  { %v9810_v53 = vadd.f32 %v7436_v24, %v2059_v49  ;;  %v2062_v15 = vadd.f32 %v7387_v0, %v9713_v2  ;;  %10903 = vst [vmem:[#allocation67_spill] sm:$0xff] %v9813_v27 }
 0x1e6   :  { %v9815_v62 = vadd.f32 %v7439_v35, %v2062_v15  ;;  %v7388_v7 = vpop.f32.mrb[44].mxu0  ;;  %v9817_v36 = vpop.permute.xlu0 %2789 }
 0x1e7   :  { %v7440_v3 = vpop.f32.mrb[44].mxu1  ;;  %v7389_v41 = vpop.f32.mrb[45].mxu0 }
 0x1e8   :  { %v7390_v44 = vadd.f32 %v7389_v41, %v7388_v7  ;;  %v7441_v26 = vpop.f32.mrb[45].mxu1  ;;  %v7391_v52 = vpop.f32.mrb[46].mxu0 }
 0x1e9   :  { %v7442_v56 = vadd.f32 %v7441_v26, %v7440_v3  ;;  %v7443_v8 = vpop.f32.mrb[46].mxu1  ;;  %v7392_v32 = vpop.f32.mrb[47].mxu0 }
 0x1ea   :  { %v2067_v1 = vadd.f32 %v7390_v44, %v9732_v55  ;;  %v7393_v24 = vadd.f32 %v7392_v32, %v7391_v52  ;;  %v7444_v49 = vpop.f32.mrb[47].mxu1  ;;  %v9820_v2 = vpop.permute.xlu1 %3138 }
 0x1eb   :  { %10904 = vst [vmem:[#allocation68_spill] sm:$0xff] %v9820_v2  ;;  %v7445_v0 = vadd.f32 %v7444_v49, %v7443_v8  ;;  %v9825_v15 = vpop.permute.xlu0 %2804 }
 0x1ec   :  { %v9822_v17 = vadd.f32 %v7442_v56, %v2067_v1  ;;  %v2070_v35 = vadd.f32 %v7393_v24, %v9736_v34 }
 0x1ee   :  { %v9827_v27 = vadd.f32 %v7445_v0, %v2070_v35  ;;  %v7462_v7 = vpop.f32.mrb[48].mxu0  ;;  %v9829_v41 = vpop.permute.xlu1 %3143 }
 0x1ef   :  { %10905 = vst [vmem:[#allocation69_spill] sm:$0xff] %v9829_v41  ;;  %v7514_v3 = vpop.f32.mrb[48].mxu1  ;;  %v7463_v26 = vpop.f32.mrb[49].mxu0 }
 0x1f0   :  { %v7464_v25 = vadd.f32 %v7463_v26, %v7462_v7  ;;  %v7515_v55 = vpop.f32.mrb[49].mxu1  ;;  %v7465_v32 = vpop.f32.mrb[50].mxu0 }
 0x1f1   :  { %v7516_v44 = vadd.f32 %v7515_v55, %v7514_v3  ;;  %v7517_v52 = vpop.f32.mrb[50].mxu1  ;;  %v7466_v2 = vpop.f32.mrb[51].mxu0 }
 0x1f2   :  { %v2189_v56 = vadd.f32 %v7464_v25, %v9751_v4  ;;  %v7467_v8 = vadd.f32 %v7466_v2, %v7465_v32  ;;  %v7518_v1 = vpop.f32.mrb[51].mxu1  ;;  %v9832_v34 = vpop.permute.xlu0 %2819 }
 0x1f3   :  { %v7519_v24 = vadd.f32 %v7518_v1, %v7517_v52  ;;  %v9834_v49 = vpop.permute.xlu1 %3035 }
 0x1f4   :  { %10906 = vst [vmem:[#allocation70_spill] sm:$0xff] %v9834_v49  ;;  %v9836_v0 = vadd.f32 %v7516_v44, %v2189_v56  ;;  %v2192_v35 = vadd.f32 %v7467_v8, %v9756_v6 }
 0x1f6   :  { %v9839_v41 = vadd.f32 %v7519_v24, %v2192_v35  ;;  %v7468_v7 = vpop.f32.mrb[52].mxu0  ;;  %v9841_v26 = vpop.permute.xlu0 %2834 }
 0x1f7   :  { %10907 = vst [vmem:[#allocation71_spill] sm:$0xff] %v9841_v26  ;;  %v7520_v3 = vpop.f32.mrb[52].mxu1  ;;  %v7469_v55 = vpop.f32.mrb[53].mxu0 }
 0x1f8   :  { %v7470_v18 = vadd.f32 %v7469_v55, %v7468_v7  ;;  %v7521_v4 = vpop.f32.mrb[53].mxu1  ;;  %v7471_v25 = vpop.f32.mrb[54].mxu0 }
 0x1f9   :  { %v7522_v2 = vadd.f32 %v7521_v4, %v7520_v3  ;;  %v7523_v32 = vpop.f32.mrb[54].mxu1  ;;  %v9843_v31 = vpop.permute.xlu1 %3334 }
 0x1fa   :  { %10908 = vst [vmem:[#allocation72_spill] sm:$0xff] %v9843_v31  ;;  %v2197_v52 = vadd.f32 %v7470_v18, %v9768_v29  ;;  %v7472_v44 = vpop.f32.mrb[55].mxu0  ;;  %v7524_v56 = vpop.f32.mrb[55].mxu1 }
 0x1fb   :  { %v7473_v1 = vadd.f32 %v7472_v44, %v7471_v25  ;;  %v7525_v6 = vadd.f32 %v7524_v56, %v7523_v32  ;;  %v9846_v8 = vpop.permute.xlu0 %3324 }
 0x1fc   :  { %10909 = vst [vmem:[#allocation73_spill] sm:$0xff] %v9846_v8  ;;  %v9848_v24 = vadd.f32 %v7522_v2, %v2197_v52 }
 0x1fd   :  { %v2200_v35 = vadd.f32 %v7473_v1, %v9775_v12  ;;  %v9851_v49 = vpop.permute.xlu1 %3226 }
 0x1fe   :  { %10910 = vst [vmem:[#allocation74_spill] sm:$0xff] %v9851_v49  ;;  %v7474_v7 = vpop.f32.mrb[56].mxu0 }
 0x1ff   :  { %v9853_v55 = vadd.f32 %v7525_v6, %v2200_v35  ;;  %v7526_v3 = vpop.f32.mrb[56].mxu1  ;;  %v7475_v4 = vpop.f32.mrb[57].mxu0 }
 0x200   :  { %v7476_v31 = vadd.f32 %v7475_v4, %v7474_v7  ;;  %v7527_v26 = vpop.f32.mrb[57].mxu1  ;;  %v7477_v18 = vpop.f32.mrb[58].mxu0 }
 0x201   :  { %v7528_v29 = vadd.f32 %v7527_v26, %v7526_v3  ;;  %v7529_v14 = vpop.f32.mrb[58].mxu1  ;;  %v9855_v25 = vpop.permute.xlu0 %3339 }
 0x202   :  { %10911 = vst [vmem:[#allocation75_spill] sm:$0xff] %v9855_v25  ;;  %v2205_v32 = vadd.f32 %v7476_v31, %v9783_v28  ;;  %v9858_v2 = vpop.permute.xlu1 %3231  ;;  %v7478_v52 = vpop.f32.mrb[59].mxu0 }
 0x203   :  { %10912 = vst [vmem:[#allocation76_spill] sm:$0xff] %v9858_v2  ;;  %v7479_v12 = vadd.f32 %v7478_v52, %v7477_v18  ;;  %v7530_v44 = vpop.f32.mrb[59].mxu1 }
 0x204   :  { %v9860_v56 = vadd.f32 %v7528_v29, %v2205_v32  ;;  %v7531_v1 = vadd.f32 %v7530_v44, %v7529_v14 }
 0x205   :  { %v2208_v6 = vadd.f32 %v7479_v12, %v9789_v63  ;;  %v9863_v35 = vpop.permute.xlu0 %3000 }
 0x206   :  { %10913 = vst [vmem:[#allocation77_spill] sm:$0xff] %v9863_v35  ;;  %v9865_v7 = vpop.permute.xlu1 %3153  ;;  %v7480_v26 = vpop.f32.mrb[60].mxu0 }
 0x207   :  { %10914 = vst [vmem:[#allocation78_spill] sm:$0xff] %v9865_v7  ;;  %v9867_v3 = vadd.f32 %v7531_v1, %v2208_v6  ;;  %v7532_v4 = vpop.f32.mrb[60].mxu1  ;;  %v7481_v49 = vpop.f32.mrb[61].mxu0 }
 0x208   :  { %v7482_v31 = vadd.f32 %v7481_v49, %v7480_v26  ;;  %v7533_v28 = vpop.f32.mrb[61].mxu1  ;;  %v7483_v2 = vpop.f32.mrb[62].mxu0 }
 0x209   :  { %v7534_v25 = vadd.f32 %v7533_v28, %v7532_v4  ;;  %v7535_v18 = vpop.f32.mrb[62].mxu1  ;;  %v9869_v52 = vpop.permute.xlu0 %3015 }
 0x20a   :  { %10915 = vst [vmem:[#allocation79_spill] sm:$0xff] %v9869_v52  ;;  %v2213_v14 = vadd.f32 %v7482_v31, %v9798_v54  ;;  %v9872_v29 = vpop.permute.xlu1 %3040  ;;  %v7484_v63 = vpop.f32.mrb[63].mxu0 }
 0x20b   :  { %10916 = vst [vmem:[#allocation80_spill] sm:$0xff] %v9872_v29  ;;  %v7485_v32 = vadd.f32 %v7484_v63, %v7483_v2  ;;  %v7536_v12 = vpop.f32.mrb[63].mxu1 }
 0x20c   :  { %v9874_v44 = vadd.f32 %v7534_v25, %v2213_v14  ;;  %v7537_v1 = vadd.f32 %v7536_v12, %v7535_v18 }
 0x20d   :  { %v2216_v6 = vadd.f32 %v7485_v32, %v9803_v16  ;;  %v9877_v7 = vpop.permute.xlu0 %3030 }
 0x20e   :  { %10917 = vst [vmem:[#allocation81_spill] sm:$0xff] %v9877_v7  ;;  %v9879_v49 = vpop.permute.xlu1 %3344  ;;  %v7486_v26 = vpop.f32.mrb[64].mxu0 }
 0x20f   :  { %10918 = vst [vmem:[#allocation82_spill] sm:$0xff] %v9879_v49  ;;  %v9881_v4 = vadd.f32 %v7537_v1, %v2216_v6  ;;  %v7538_v28 = vpop.f32.mrb[64].mxu1  ;;  %v7487_v52 = vpop.f32.mrb[65].mxu0 }
 0x210   :  { %v7488_v54 = vadd.f32 %v7487_v52, %v7486_v26  ;;  %v7539_v31 = vpop.f32.mrb[65].mxu1  ;;  %v7489_v29 = vpop.f32.mrb[66].mxu0 }
 0x211   :  { %v7540_v35 = vadd.f32 %v7539_v31, %v7538_v28  ;;  %v7541_v2 = vpop.f32.mrb[66].mxu1  ;;  %v9883_v63 = vpop.permute.xlu0 %3045 }
 0x212   :  { %10919 = vst [vmem:[#allocation83_spill] sm:$0xff] %v9883_v63  ;;  %v2221_v25 = vadd.f32 %v7488_v54, %v9810_v53  ;;  %v9886_v18 = vpop.permute.xlu1 %3349  ;;  %v7490_v16 = vpop.f32.mrb[67].mxu0 }
 0x213   :  { %10920 = vst [vmem:[#allocation84_spill] sm:$0xff] %v9886_v18  ;;  %v7491_v14 = vadd.f32 %v7490_v16, %v7489_v29  ;;  %v7542_v32 = vpop.f32.mrb[67].mxu1 }
 0x214   :  { %v9888_v12 = vadd.f32 %v7540_v35, %v2221_v25  ;;  %v7543_v1 = vadd.f32 %v7542_v32, %v7541_v2 }
 0x215   :  { %v2224_v6 = vadd.f32 %v7491_v14, %v9815_v62  ;;  %v9891_v49 = vpop.permute.xlu0 %3118 }
 0x216   :  { %10921 = vst [vmem:[#allocation85_spill] sm:$0xff] %v9891_v49  ;;  %v9893_v52 = vpop.permute.xlu1 %3241  ;;  %v7492_v26 = vpop.f32.mrb[68].mxu0 }
 0x217   :  { %10922 = vst [vmem:[#allocation86_spill] sm:$0xff] %v9893_v52  ;;  %v9895_v28 = vadd.f32 %v7543_v1, %v2224_v6  ;;  %v7544_v31 = vpop.f32.mrb[68].mxu1  ;;  %v7493_v63 = vpop.f32.mrb[69].mxu0 }
 0x218   :  { %v7494_v53 = vadd.f32 %v7493_v63, %v7492_v26  ;;  %v7545_v54 = vpop.f32.mrb[69].mxu1  ;;  %v7495_v18 = vpop.f32.mrb[70].mxu0 }
 0x219   :  { %v7546_v7 = vadd.f32 %v7545_v54, %v7544_v31  ;;  %v7547_v29 = vpop.f32.mrb[70].mxu1  ;;  %v9897_v16 = vpop.permute.xlu0 %3133 }
 0x21a   :  { %10923 = vst [vmem:[#allocation87_spill] sm:$0xff] %v9897_v16  ;;  %v2229_v35 = vadd.f32 %v7494_v53, %v9822_v17  ;;  %v9900_v2 = vpop.permute.xlu1 %3158  ;;  %v7496_v62 = vpop.f32.mrb[71].mxu0 }
 0x21b   :  { %10924 = vst [vmem:[#allocation88_spill] sm:$0xff] %v9900_v2  ;;  %v7497_v25 = vadd.f32 %v7496_v62, %v7495_v18  ;;  %v7548_v14 = vpop.f32.mrb[71].mxu1 }
 0x21c   :  { %v9902_v32 = vadd.f32 %v7546_v7, %v2229_v35  ;;  %v7549_v1 = vadd.f32 %v7548_v14, %v7547_v29  ;;  %v9917_v14 = vld [vmem:[%s8936_s17] ss:$0 sm:$0xff]  ;;  %s11028_s17 = sld [smem:[#allocation15_spill]] }
 0x21d   :  { %v2232_v6 = vadd.f32 %v7497_v25, %v9827_v27  ;;  %v9905_v63 = vpop.permute.xlu0 %3148 }
 0x21e   :  { %10925 = vst [vmem:[#allocation89_spill] sm:$0xff] %v9905_v63  ;;  %v9907_v26 = vpop.permute.xlu1 %3050  ;;  %v7566_v31 = vpop.f32.mrb[72].mxu0 }
 0x21f   :  { %10926 = vst [vmem:[#allocation90_spill] sm:$0xff] %v9907_v26  ;;  %v9909_v54 = vadd.f32 %v7549_v1, %v2232_v6  ;;  %v7618_v52 = vpop.f32.mrb[72].mxu1  ;;  %v7567_v17 = vpop.f32.mrb[73].mxu0  ;;  %v9920_v26 = vld [vmem:[%s8941_s21] ss:$0 sm:$0xff]  ;;  %s11029_s21 = sld [smem:[#allocation16_spill]] }
 0x220   :  { %v7568_v53 = vadd.f32 %v7567_v17, %v7566_v31  ;;  %v7619_v2 = vpop.f32.mrb[73].mxu1  ;;  %v7569_v18 = vpop.f32.mrb[74].mxu0 }
 0x221   :  { %v7620_v62 = vadd.f32 %v7619_v2, %v7618_v52  ;;  %v7621_v7 = vpop.f32.mrb[74].mxu1  ;;  %v9911_v35 = vpop.permute.xlu0 %3163 }
 0x222   :  { %10927 = vst [vmem:[#allocation91_spill] sm:$0xff] %v9911_v35  ;;  %v2351_v27 = vadd.f32 %v7568_v53, %v9836_v0  ;;  %v9914_v29 = vpop.permute.xlu1 %3055  ;;  %v7570_v25 = vpop.f32.mrb[75].mxu0 }
 0x223   :  { %10928 = vst [vmem:[#allocation92_spill] sm:$0xff] %v9914_v29  ;;  %v7571_v63 = vadd.f32 %v7570_v25, %v7569_v18  ;;  %v7622_v1 = vpop.f32.mrb[75].mxu1 }
 0x224   :  { %v2432_v6 = vadd.f32 %v7620_v62, %v2351_v27  ;;  %v7623_v16 = vadd.f32 %v7622_v1, %v7621_v7 }
 0x225   :  { %v2354_v31 = vadd.f32 %v7571_v63, %v9839_v41  ;;  %v9923_v17 = vpop.permute.xlu0 %3221 }
 0x226   :  { %10929 = vst [vmem:[#allocation93_spill] sm:$0xff] %v9923_v17  ;;  %v2485_v52 = vmul.f32 %v9917_v14, %v2432_v6  ;;  %v9926_v2 = vpop.permute.xlu1 %3359  ;;  %v7572_v0 = vpop.f32.mrb[76].mxu0 }
 0x227   :  { %10930 = vst [vmem:[#allocation94_spill] sm:$0xff] %v9926_v2  ;;  %v2435_v53 = vadd.f32 %v7623_v16, %v2354_v31  ;;  %v7624_v35 = vpop.f32.mrb[76].mxu1  ;;  %v7573_v29 = vpop.f32.mrb[77].mxu0 }
 0x228   :  { %v2504_v49 = vadd.f32 %v9920_v26, %v2485_v52  ;;  %v7574_v18 = vadd.f32 %v7573_v29, %v7572_v0  ;;  %v7625_v25 = vpop.f32.mrb[77].mxu1  ;;  %v7575_v62 = vpop.f32.mrb[78].mxu0 }
 0x229   :  { %v2486_v7 = vmul.f32 %v9917_v14, %v2435_v53  ;;  %v7626_v27 = vadd.f32 %v7625_v25, %v7624_v35  ;;  %v7627_v1 = vpop.f32.mrb[78].mxu1  ;;  %v9930_v41 = vpop.permute.xlu0 %3236 }
 0x22a   :  { %10931 = vst [vmem:[#allocation95_spill] sm:$0xff] %v9930_v41  ;;  %v2516_v63 = vmax.f32 %v2504_v49, 0.0  ;;  %v2359_v6 = vadd.f32 %v7574_v18, %v9848_v24  ;;  %v9933_v17 = vpop.permute.xlu1 %3246  ;;  %v7576_v2 = vpop.f32.mrb[79].mxu0 }
 0x22b   :  { %10932 = vst [vmem:[#allocation96_spill] sm:$0xff] %v9933_v17  ;;  %v2505_v16 = vadd.f32 %v9920_v26, %v2486_v7  ;;  %v7577_v31 = vadd.f32 %v7576_v2, %v7575_v62  ;;  %v7628_v8 = vpop.f32.mrb[79].mxu1 }
 0x22c   :  { %2529 = vst [vmem:[#allocation2 + $0x8] sm:$0xff] %v2516_v63  ;;  %v2440_v29 = vadd.f32 %v7626_v27, %v2359_v6  ;;  %v7629_v52 = vadd.f32 %v7628_v8, %v7627_v1 }
 0x22d   :  { %v2517_v0 = vmax.f32 %v2505_v16, 0.0  ;;  %v2362_v53 = vadd.f32 %v7577_v31, %v9853_v55  ;;  %v9937_v35 = vpop.permute.xlu0 %3251 }
 0x22e   :  { %10933 = vst [vmem:[#allocation97_spill] sm:$0xff] %v9937_v35  ;;  %v2487_v25 = vmul.f32 %v9917_v14, %v2440_v29  ;;  %v9940_v49 = vpop.permute.xlu1 %3432  ;;  %v7578_v24 = vpop.f32.mrb[80].mxu0 }
 0x22f   :  { %2530 = vst [vmem:[#allocation2 + $0x10] sm:$0xff] %v2517_v0  ;;  %v2443_v18 = vadd.f32 %v7629_v52, %v2362_v53  ;;  %v7630_v17 = vpop.f32.mrb[80].mxu1  ;;  %v7579_v41 = vpop.f32.mrb[81].mxu0 }
 0x230   :  { %v2506_v2 = vadd.f32 %v9920_v26, %v2487_v25  ;;  %v7580_v62 = vadd.f32 %v7579_v41, %v7578_v24  ;;  %v7631_v7 = vpop.f32.mrb[81].mxu1  ;;  %v7581_v27 = vpop.f32.mrb[82].mxu0 }
 0x231   :  { %v2488_v8 = vmul.f32 %v9917_v14, %v2443_v18  ;;  %v7632_v1 = vadd.f32 %v7631_v7, %v7630_v17  ;;  %v7633_v55 = vpop.f32.mrb[82].mxu1  ;;  %v9944_v63 = vpop.permute.xlu0 %3354 }
 0x232   :  { %10934 = vst [vmem:[#allocation98_spill] sm:$0xff] %v9944_v63  ;;  %v2518_v6 = vmax.f32 %v2506_v2, 0.0  ;;  %v2367_v16 = vadd.f32 %v7580_v62, %v9860_v56  ;;  %v9947_v31 = vpop.permute.xlu1 %3437  ;;  %v7582_v29 = vpop.f32.mrb[83].mxu0 }
 0x233   :  { %v2507_v52 = vadd.f32 %v9920_v26, %v2488_v8  ;;  %v7583_v0 = vadd.f32 %v7582_v29, %v7581_v27  ;;  %v7634_v53 = vpop.f32.mrb[83].mxu1  ;;  %v2650_v25 = vld [vmem:[#allocation2 + $0x4] sm:$0xff] }
 0x234   :  { %v2866_v41 = vld [vmem:[#allocation2 + $0x7] sm:$0xff]  ;;  %2531 = vst [vmem:[#allocation2 + $0x18] sm:$0xff] %v2518_v6  ;;  %v2448_v35 = vadd.f32 %v7632_v1, %v2367_v16  ;;  %v7635_v18 = vadd.f32 %v7634_v53, %v7633_v55  ;;  %v2734_v29 = vmul.f32 %v9719_v59, %v2650_v25 }
 0x235   :  { %v2542_v24 = vld [vmem:[#allocation2 + $0x3] sm:$0xff]  ;;  %v2519_v7 = vmax.f32 %v2507_v52, 0.0  ;;  %v2370_v63 = vadd.f32 %v7583_v0, %v9867_v3  ;;  %v9951_v2 = vpop.permute.xlu0 %3369  ;;  %v2950_v1 = vmul.f32 %v9781_v38, %v2866_v41 }
 0x236   :  { %v2758_v17 = vld [vmem:[#allocation2 + $0x5] sm:$0xff]  ;;  %10935 = vst [vmem:[#allocation99_spill] sm:$0xff] %v9951_v2  ;;  %v3406_v56 = vld [vmem:[#allocation2 + $0xd] sm:$0xff]  ;;  %v2489_v62 = vmul.f32 %v9917_v14, %v2448_v35  ;;  %v9954_v51 = vpop.permute.xlu1 %3447  ;;  %v7584_v8 = vpop.f32.mrb[84].mxu0  ;;  %v2626_v55 = vmul.f32 %v9395_v46, %v2542_v24 }
 0x237   :  { %v9956_v27 = vld [vmem:[#allocation2 + $0xc] sm:$0xff]  ;;  %2532 = vst [vmem:[#allocation2 + $0x20] sm:$0xff] %v2519_v7  ;;  %v2451_v6 = vadd.f32 %v7635_v18, %v2370_v63  ;;  %v7636_v3 = vpop.f32.mrb[84].mxu1  ;;  %v7585_v16 = vpop.f32.mrb[85].mxu0  ;;  %v2842_v59 = vmul.f32 %v9493_v22, %v2758_v17  ;;  %v2843_v41 = vmul.f32 %v3406_v56, %v9817_v36  ;;  %v8533_v17 = vld [vmem:[%s8946_s25 + $0x100] sm:$0xff]  }
 0x238   :  { %10936 = vst [vmem:[#allocation100_spill] sm:$0xff] %v9956_v27  ;;  %v2867_v39 = vld [vmem:[#allocation2 + $0xf] sm:$0xff]  ;;  %v2735_v52 = vmul.f32 %v9729_v13, %v9956_v27  ;;  %v2508_v53 = vadd.f32 %v9920_v26, %v2489_v62  ;;  %v7586_v38 = vadd.f32 %v7585_v16, %v7584_v8  ;;  %v7637_v25 = vpop.f32.mrb[85].mxu1  ;;  %v7587_v46 = vpop.f32.mrb[86].mxu0  ;;  %v8539_v7 = vld [vmem:[%s8946_s25 + $0x180] sm:$0xff]  }
 0x239   :  { %v2951_v35 = vmul.f32 %v9480_v10, %v2867_v39  ;;  %v9964_v0 = vld [vmem:[#allocation2 + $0xb] sm:$0xff]  ;;  %v2490_v13 = vmul.f32 %v9917_v14, %v2451_v6  ;;  %v7638_v10 = vadd.f32 %v7637_v25, %v7636_v3  ;;  %v7639_v39 = vpop.f32.mrb[86].mxu1  ;;  %v9972_v24 = vpop.permute.xlu0 %3379  ;;  %v9982_v6 = vmul.f32 %v9940_v49, %v3406_v56 }
 0x23a   :  { %10937 = vst [vmem:[#allocation101_spill] sm:$0xff] %v9964_v0  ;;  %v2627_v63 = vmul.f32 %v9406_v57, %v9964_v0  ;;  %v2746_v18 = vpack.c.bf16 %v2735_v52, %v2734_v29  ;;  %v2520_v62 = vmax.f32 %v2508_v53, 0.0  ;;  %v2375_v8 = vadd.f32 %v7586_v38, %v9874_v44  ;;  %v9977_v16 = vpop.permute.xlu1 %3364  ;;  %v7588_v57 = vpop.f32.mrb[87].mxu0  ;;  %v8534_v36 = vld [vmem:[%s8946_s25 + $0x148] sm:$0xff]  }
 0x23b   :  { %v2962_v22 = vpack.c.bf16 %v2951_v35, %v2950_v1  ;;  %v2854_v0 = vpack.c.bf16 %v2843_v41, %v2842_v59  ;;  %v8542_v27 = vld [vmem:[%s8946_s25 + $0x1c8] sm:$0xff]   ;;  %v3407_v3 = vld [vmem:[#allocation2 + $0x15] sm:$0xff]  ;;  %v9985_v25 = vadd.f32 %v9920_v26, %v2490_v13  ;;  %v7589_v29 = vadd.f32 %v7588_v57, %v7587_v46  ;;  %v7640_v1 = vpop.f32.mrb[87].mxu1 }
 0x23c   :  { %v2638_v2 = vpack.c.bf16 %v2627_v63, %v2626_v55  ;;  %4176 = vmatprep.mubr.bf16.mxu0 %v2746_v18  ;;  %v9987_v44 = vld [vmem:[#allocation2 + $0x14] sm:$0xff]  ;;  %2533 = vst [vmem:[#allocation2 + $0x28] sm:$0xff] %v2520_v62  ;;  %v9990_v55 = vmul.f32 %v9947_v31, %v3407_v3  ;;  %v2456_v49 = vadd.f32 %v7638_v10, %v2375_v8  ;;  %v8535_v63 = vld [vmem:[%s8946_s25 + $0x108] sm:$0xff]  }
 0x23d   :  { %4257 = vmatprep.mubr.bf16.mxu1 %v2962_v22  ;;  %v2868_v52 = vld [vmem:[#allocation2 + $0x17] sm:$0xff]  ;;  %v7641_v56 = vadd.f32 %v7640_v1, %v7639_v39  ;;  %v10833_v59 = vmax.f32 %v9985_v25, 0.0  ;;  %v2378_v53 = vadd.f32 %v7589_v29, %v9881_v4  ;;  %v3443_v38 = vpop.permute.xlu0 %3442  ;;  %v2736_v46 = vmul.f32 %v9743_v20, %v9987_v44  ;;  %v8543_v31 = vld [vmem:[%s8946_s25 + $0x188] sm:$0xff]  }
 0x23e   :  { %4177 = vmatmul.mubr.bf16.vlgmr.msra.gmra.mrb[96].mxu0 %v2638_v2  ;;  %4258 = vmatmul.mubr.bf16.vlgmr.msra.gmra.mrb[96].mxu1 %v2854_v0  ;;  %v9992_v35 = vld [vmem:[#allocation2 + $0x13] sm:$0xff]  ;;  %v2491_v2 = vmul.f32 %v9917_v14, %v2456_v49  ;;  %v3408_v0 = vld [vmem:[#allocation2 + $0x1d] sm:$0xff]  ;;  %v10004_v10 = vpop.permute.xlu1 %3256  ;;  %v7590_v39 = vpop.f32.mrb[88].mxu0  ;;  %v2952_v22 = vmul.f32 %v9526_v61, %v2868_v52  ;;  %v2844_v29 = vmul.f32 %v3407_v3, %v9536_v5 }
 0x23f   :  { %7759 = vmatpush3.bf16.msra.mxu0 %v8533_v17  ;;  %v8536_v41 = vld [vmem:[%s8946_s25 + $0x150] sm:$0xff]   ;;  %7811 = vmatpush3.bf16.msra.mxu1 %v8539_v7  ;;  %v10006_v4 = vld [vmem:[#allocation2 + $0x1c] sm:$0xff]  ;;  %v2628_v20 = vmul.f32 %v9673_v40, %v9992_v35  ;;  %2534 = vst [vmem:[#allocation2 + $0x30] sm:$0xff] %v10833_v59  ;;  %v2459_v17 = vadd.f32 %v7641_v56, %v2378_v53  ;;  %v7642_v7 = vpop.f32.mrb[88].mxu1  ;;  %v7591_v62 = vpop.f32.mrb[89].mxu0 }
 0x240   :  { %7760 = vmatprep.subr.bf16.mxu0 %v8534_v36  ;;  %v2869_v18 = vld [vmem:[#allocation2 + $0x1f] sm:$0xff]  ;;  %v2737_v8 = vmul.f32 %v9419_v9, %v10006_v4  ;;  %7812 = vmatprep.subr.bf16.mxu1 %v8542_v27  ;;  %v10020_v61 = vadd.f32 %v9920_v26, %v2491_v2  ;;  %v7592_v40 = vadd.f32 %v7591_v62, %v7590_v39  ;;  %v7643_v1 = vpop.f32.mrb[89].mxu1  ;;  %v7593_v52 = vpop.f32.mrb[90].mxu0  ;;  %v8537_v2 = vld [vmem:[%s8946_s25 + $0x110] sm:$0xff]  }
 0x241   :  { %v2953_v57 = vmul.f32 %v9791_v19, %v2869_v18  ;;  %v10016_v36 = vld [vmem:[#allocation2 + $0x1b] sm:$0xff]  ;;  %v2845_v56 = vmul.f32 %v3408_v0, %v9544_v45  ;;  %v2492_v9 = vmul.f32 %v9917_v14, %v2459_v17  ;;  %v7644_v19 = vadd.f32 %v7643_v1, %v7642_v7  ;;  %v7645_v53 = vpop.f32.mrb[90].mxu1  ;;  %v7594_v5 = vpop.f32.mrb[91].mxu0  ;;  %v8545_v7 = vld [vmem:[%s8946_s25 + $0x1d0] sm:$0xff]  }
 0x242   :  { %v2629_v49 = vmul.f32 %v9428_v21, %v10016_v36  ;;  %v2747_v27 = vpack.c.bf16 %v2737_v8, %v2736_v46  ;;  %v10839_v39 = vmax.f32 %v10020_v61, 0.0  ;;  %v2383_v18 = vadd.f32 %v7592_v40, %v9888_v12  ;;  %v10029_v62 = vpop.permute.xlu1 %3261  ;;  %v7646_v45 = vpop.f32.mrb[91].mxu1  ;;  %v8540_v17 = vld [vmem:[%s8946_s25 + $0x158] sm:$0xff]   ;;  %v8547_v1 = vld [vmem:[%s8946_s25 + $0x190] sm:$0xff]  }
 0x243   :  { %v2963_v3 = vpack.c.bf16 %v2953_v57, %v2952_v22  ;;  %7761 = vmatpush3.bf16.msra.mxu0 %v8535_v63  ;;  %v7595_v21 = vadd.f32 %v7594_v5, %v7593_v52  ;;  %7813 = vmatpush3.bf16.msra.mxu1 %v8543_v31  ;;  %v3409_v59 = vld [vmem:[#allocation2 + $0x25] sm:$0xff]  ;;  %v10035_v46 = vadd.f32 %v9920_v26, %v2492_v9 }
 0x244   :  { %v2639_v13 = vpack.c.bf16 %v2629_v49, %v2628_v20  ;;  %7762 = vmatprep.subr.bf16.mxu0 %v8536_v41  ;;  %v7647_v63 = vadd.f32 %v7646_v45, %v7645_v53  ;;  %4184 = vmatprep.mubr.bf16.mxu0 %v2747_v27  ;;  %v2855_v22 = vpack.c.bf16 %v2845_v56, %v2844_v29  ;;  %v10037_v12 = vld [vmem:[#allocation2 + $0x24] sm:$0xff]  ;;  %v8548_v29 = vld [vmem:[%s8946_s25 + $0x1d8] sm:$0xff]   ;;  %v3453_v49 = vpop.permute.xlu0 %3452 }
 0x245   :  { %4265 = vmatprep.mubr.bf16.mxu1 %v2963_v3  ;;  %v2870_v8 = vld [vmem:[#allocation2 + $0x27] sm:$0xff]  ;;  %v10040_v20 = vmul.f32 %v9954_v51, %v3409_v59  ;;  %2535 = vst [vmem:[#allocation2 + $0x38] sm:$0xff] %v10839_v39  ;;  %v10044_v41 = vmul.f32 %v3443_v38, %v3408_v0  ;;  %v2464_v31 = vadd.f32 %v7644_v19, %v2383_v18  ;;  %v10838_v52 = vmax.f32 %v10035_v46, 0.0  ;;  %v8541_v0 = vld [vmem:[%s8946_s25 + $0x118] sm:$0xff]  }
 0x246   :  { %v2386_v57 = vadd.f32 %v7595_v21, %v9895_v28  ;;  %4185 = vmatmul.mubr.bf16.gmra.mrb[100].mxu0 %v2639_v13  ;;  %v10047_v40 = vld [vmem:[#allocation2 + $0x23] sm:$0xff]  ;;  %4266 = vmatmul.mubr.bf16.gmra.mrb[100].mxu1 %v2855_v22  ;;  %v2738_v51 = vmul.f32 %v9445_v23, %v10037_v12  ;;  %v2954_v56 = vmul.f32 %v9571_v42, %v2870_v8  ;;  %v3410_v53 = vld [vmem:[#allocation2 + $0x2d] sm:$0xff]  ;;  %v3458_v5 = vpop.permute.xlu1 %3457  ;;  %v7596_v27 = vpop.f32.mrb[92].mxu0 }
 0x247   :  { %10938 = vst [vmem:[#allocation102_spill] sm:$0xff] %v10044_v41  ;;  %7763 = vmatpush3.bf16.msra.mxu0 %v8537_v2  ;;  %v2630_v38 = vmul.f32 %v9456_v48, %v10047_v40  ;;  %v8544_v9 = vld [vmem:[%s8946_s25 + $0x160] sm:$0xff]   ;;  %v2493_v13 = vmul.f32 %v9917_v14, %v2464_v31  ;;  %v10061_v3 = vld [vmem:[#allocation2 + $0x2c] sm:$0xff]  ;;  %7814 = vmatprep.subr.bf16.mxu1 %v8545_v7  ;;  %2536 = vst [vmem:[#allocation2 + $0x40] sm:$0xff] %v10838_v52  ;;  %v7648_v23 = vpop.f32.mrb[92].mxu1  ;;  %v7597_v48 = vpop.f32.mrb[93].mxu0 }
 0x248   :  { %v2467_v19 = vadd.f32 %v7647_v63, %v2386_v57  ;;  %v2871_v2 = vld [vmem:[#allocation2 + $0x2f] sm:$0xff]  ;;  %7764 = vmatprep.subr.bf16.mxu0 %v8540_v17  ;;  %v2739_v42 = vmul.f32 %v9754_v47, %v10061_v3  ;;  %v2846_v45 = vmul.f32 %v3409_v59, %v9825_v15  ;;  %v2847_v63 = vmul.f32 %v3410_v53, %v9584_v50  ;;  %v7649_v8 = vpop.f32.mrb[93].mxu1  ;;  %v7599_v31 = vpop.f32.mrb[94].mxu0  ;;  %v8546_v28 = vld [vmem:[%s8946_s25 + $0x120] sm:$0xff]  }
 0x249   :  { %v2955_v18 = vmul.f32 %v9579_v43, %v2871_v2  ;;  %v10068_v21 = vld [vmem:[#allocation2 + $0x2b] sm:$0xff]  ;;  %7815 = vmatpush3.bf16.msra.mxu1 %v8547_v1  ;;  %v10073_v17 = vadd.f32 %v9920_v26, %v2493_v13  ;;  %v7598_v22 = vadd.f32 %v7597_v48, %v7596_v27  ;;  %v8549_v43 = vld [vmem:[%s8946_s25 + $0x198] sm:$0xff]   ;;  %v7650_v57 = vadd.f32 %v7649_v8, %v7648_v23  ;;  %v7651_v15 = vpop.f32.mrb[94].mxu1  ;;  %v7600_v59 = vpop.f32.mrb[95].mxu0 }
 0x24a   :  { %v2494_v7 = vmul.f32 %v9917_v14, %v2467_v19  ;;  %v2631_v47 = vmul.f32 %v9464_v58, %v10068_v21  ;;  %7816 = vmatprep.subr.bf16.mxu1 %v8548_v29  ;;  %v2748_v50 = vpack.c.bf16 %v2739_v42, %v2738_v51  ;;  %v2856_v2 = vpack.c.bf16 %v2847_v63, %v2846_v45  ;;  %v10084_v48 = vpop.permute.xlu1 %3462  ;;  %v7652_v29 = vpop.f32.mrb[95].mxu1  ;;  %v8550_v23 = vld [vmem:[%s8946_s25 + $0x168] sm:$0xff]  }
 0x24b   :  { %v2964_v1 = vpack.c.bf16 %v2955_v18, %v2954_v56  ;;  %7765 = vmatpush3.bf16.msra.mxu0 %v8541_v0  ;;  %v10837_v13 = vmax.f32 %v10073_v17, 0.0  ;;  %v2391_v27 = vadd.f32 %v7598_v22, %v9902_v32  ;;  %v7601_v58 = vadd.f32 %v7600_v59, %v7599_v31  ;;  %v8551_v8 = vld [vmem:[%s8946_s25 + $0x128] sm:$0xff]  }
 0x24c   :  { %v10081_v19 = vadd.f32 %v9920_v26, %v2494_v7  ;;  %7766 = vmatprep.subr.bf16.mxu0 %v8544_v9  ;;  %v10088_v51 = vmul.f32 %v3453_v49, %v3410_v53  ;;  %v3411_v56 = vld [vmem:[#allocation2 + $0x35] sm:$0xff]  ;;  %v7653_v0 = vadd.f32 %v7652_v29, %v7651_v15  ;;  %4192 = vmatprep.mubr.bf16.mxu0 %v2748_v50  ;;  %v8552_v53 = vld [vmem:[%s8946_s25 + $0x1e0] sm:$0xff]   ;;  %v8555_v31 = vld [vmem:[%s8946_s25 + $0x1e8] sm:$0xff]  }
 0x24d   :  { %4273 = vmatprep.mubr.bf16.mxu1 %v2964_v1  ;;  %v2640_v42 = vpack.c.bf16 %v2631_v47, %v2630_v38  ;;  %v10090_v18 = vld [vmem:[#allocation2 + $0x34] sm:$0xff]  ;;  %2537 = vst [vmem:[#allocation2 + $0x48] sm:$0xff] %v10837_v13  ;;  %v10095_v45 = vmul.f32 %v3458_v5, %v3411_v56  ;;  %v2472_v63 = vadd.f32 %v7650_v57, %v2391_v27  ;;  %v8553_v7 = vld [vmem:[%s8946_s25 + $0x1a0] sm:$0xff]  }
 0x24e   :  { %10939 = vst [vmem:[#allocation103_spill] sm:$0xff] %v10088_v51  ;;  %v2872_v32 = vld [vmem:[#allocation2 + $0x37] sm:$0xff]  ;;  %v10836_v9 = vmax.f32 %v10081_v19, 0.0  ;;  %v2394_v49 = vadd.f32 %v7601_v58, %v9909_v54  ;;  %7817 = vmatpush3.bf16.msra.mxu1 %v8549_v43  ;;  %v2740_v38 = vmul.f32 %v9504_v30, %v10090_v18  ;;  %v10111_v57 = vpop.permute.xlu1 %3374  ;;  %v2873_v30 = vld [vmem:[#allocation2 + $0x3f] sm:$0xff]  ;;  %v2848_v27 = vmul.f32 %v3411_v56, %v9611_v11  ;;  %v10965_v51 = vld [vmem:[#allocation47_spill] sm:$0xff] }
 0x24f   :  { %10940 = vst [vmem:[#allocation104_spill] sm:$0xff] %v10095_v45  ;;  %4193 = vmatmul.mubr.bf16.gmra.mrb[104].mxu0 %v2640_v42  ;;  %4274 = vmatmul.mubr.bf16.gmra.mrb[104].mxu1 %v2856_v2  ;;  %v10102_v22 = vld [vmem:[#allocation2 + $0x33] sm:$0xff]  ;;  %v2495_v54 = vmul.f32 %v9917_v14, %v2472_v63  ;;  %v3412_v47 = vld [vmem:[#allocation2 + $0x3d] sm:$0xff]  ;;  %v2956_v59 = vmul.f32 %v9801_v33, %v2872_v32 }
 0x250   :  { %2538 = vst [vmem:[#allocation2 + $0x50] sm:$0xff] %v10836_v9  ;;  %v2475_v43 = vadd.f32 %v7653_v0, %v2394_v49  ;;  %v10113_v15 = vld [vmem:[#allocation2 + $0x3c] sm:$0xff]  ;;  %7767 = vmatpush3.bf16.msra.mxu0 %v8546_v28  ;;  %v2957_v1 = vmul.f32 %v9607_v60, %v2873_v30  ;;  %v2849_v58 = vmul.f32 %v3412_v47, %v9832_v34  ;;  %v8554_v42 = vld [vmem:[%s8946_s25 + $0x170] sm:$0xff]  }
 0x251   :  { %v2741_v50 = vmul.f32 %v9513_v37, %v10113_v15  ;;  %v10119_v2 = vld [vmem:[#allocation2 + $0x3b] sm:$0xff]  ;;  %7768 = vmatprep.subr.bf16.mxu0 %v8550_v23  ;;  %v10124_v29 = vadd.f32 %v9920_v26, %v2495_v54  ;;  %7818 = vmatprep.subr.bf16.mxu1 %v8552_v53  ;;  %v8556_v49 = vld [vmem:[%s8946_s25 + $0x130] sm:$0xff]   ;;  %v8557_v54 = vld [vmem:[%s8946_s25 + $0x1a8] sm:$0xff]   ;;  %v3468_v53 = vpop.permute.xlu0 %3467 }
 0x252   :  { %v2496_v0 = vmul.f32 %v9917_v14, %v2475_v43  ;;  %v10941_v33 = vld [vmem:[#allocation53_spill] sm:$0xff]  ;;  %v2965_v56 = vpack.c.bf16 %v2957_v1, %v2956_v59  ;;  %v2857_v34 = vpack.c.bf16 %v2849_v58, %v2848_v27  ;;  %7819 = vmatpush3.bf16.msra.mxu1 %v8553_v7  ;;  %v10136_v14 = vpop.permute.xlu1 %3266  ;;  %v10945_v58 = vld [vmem:[#allocation60_spill] sm:$0xff] }
 0x253   :  { %v2632_v28 = vmul.f32 %v10941_v33, %v10102_v22  ;;  %v10942_v37 = vld [vmem:[#allocation41_spill] sm:$0xff]  ;;  %v2749_v11 = vpack.c.bf16 %v2741_v50, %v2740_v38  ;;  %v10835_v23 = vmax.f32 %v10124_v29, 0.0  ;;  %7820 = vmatprep.subr.bf16.mxu1 %v8555_v31  ;;  %v8558_v50 = vld [vmem:[%s8946_s25 + $0x1f0] sm:$0xff]  }
 0x254   :  { %v2633_v60 = vmul.f32 %v10942_v37, %v10119_v2  ;;  %v10134_v32 = vadd.f32 %v9920_v26, %v2496_v0  ;;  %7769 = vmatpush3.bf16.msra.mxu0 %v8551_v8  ;;  %v8560_v43 = vld [vmem:[%s8946_s25 + $0x178] sm:$0xff]   ;;  %v3413_v30 = vld [vmem:[#allocation2 + $0x45] sm:$0xff]  ;;  %4281 = vmatprep.mubr.bf16.mxu1 %v2965_v56  ;;  %v10146_v26 = vmul.f32 %v10084_v48, %v3412_v47 }
 0x255   :  { %4200 = vmatprep.mubr.bf16.mxu0 %v2749_v11  ;;  %v10141_v38 = vld [vmem:[#allocation2 + $0x44] sm:$0xff]  ;;  %2539 = vst [vmem:[#allocation2 + $0x58] sm:$0xff] %v10835_v23  ;;  %v10149_v31 = vmul.f32 %v3468_v53, %v3413_v30  ;;  %7770 = vmatprep.subr.bf16.mxu0 %v8554_v42  ;;  %v8559_v23 = vld [vmem:[%s8946_s25 + $0x1b0] sm:$0xff]   ;;  %v8562_v9 = vld [vmem:[%s8946_s25 + $0x1f8] sm:$0xff]   ;;  %v3473_v13 = vpop.permute.xlu0 %3472 }
 0x256   :  { %v2641_v63 = vpack.c.bf16 %v2633_v60, %v2632_v28  ;;  %v2874_v7 = vld [vmem:[#allocation2 + $0x47] sm:$0xff]  ;;  %10943 = vst [vmem:[#allocation53_spill] sm:$0xff] %v10146_v26  ;;  %v10834_v8 = vmax.f32 %v10134_v32, 0.0  ;;  %v2742_v0 = vmul.f32 %v10945_v58, %v10141_v38  ;;  %v10163_v37 = vpop.permute.xlu1 %3271  ;;  %v10952_v28 = vld [vmem:[#allocation52_spill] sm:$0xff]  ;;  %7821 = vmatpush3.bf16.msra.mxu1 %v8557_v54  ;;  %v8563_v54 = vld [vmem:[%s8946_s25 + $0x1b8] sm:$0xff]  }
 0x257   :  { %10944 = vst [vmem:[#allocation41_spill] sm:$0xff] %v10149_v31  ;;  %v10151_v59 = vld [vmem:[#allocation2 + $0x43] sm:$0xff]  ;;  %4282 = vmatmul.mubr.bf16.gmra.mrb[108].mxu1 %v2857_v34  ;;  %v3414_v1 = vld [vmem:[#allocation2 + $0x4d] sm:$0xff]  ;;  %7822 = vmatprep.subr.bf16.mxu1 %v8558_v50 }
 0x258   :  { %4201 = vmatmul.mubr.bf16.gmra.mrb[108].mxu0 %v2641_v63  ;;  %v10154_v27 = vld [vmem:[#allocation2 + $0x4c] sm:$0xff]  ;;  %v10946_v48 = vld [vmem:[#allocation50_spill] sm:$0xff]  ;;  %2540 = vst [vmem:[#allocation2 + $0x60] sm:$0xff] %v10834_v8  ;;  %v2851_v8 = vmul.f32 %v3414_v1, %v10952_v28 }
 0x259   :  { %v2875_v33 = vld [vmem:[#allocation2 + $0x4f] sm:$0xff]  ;;  %v2958_v47 = vmul.f32 %v10946_v48, %v2874_v7  ;;  %v10947_v60 = vld [vmem:[#allocation42_spill] sm:$0xff]  ;;  %7771 = vmatpush3.bf16.msra.mxu0 %v8556_v49 }
 0x25a   :  { %v2743_v42 = vmul.f32 %v10947_v60, %v10154_v27  ;;  %v10948_v11 = vld [vmem:[#allocation66_spill] sm:$0xff]  ;;  %v10168_v34 = vld [vmem:[#allocation2 + $0x4b] sm:$0xff]  ;;  %7772 = vmatprep.subr.bf16.mxu0 %v8560_v43  ;;  %v8561_v60 = vld [vmem:[%s8946_s25 + $0x138] sm:$0xff]   ;;  %v3478_v52 = vpop.permute.xlu1 %3477  ;;  %7823 = vmatpush3.bf16.msra.mxu1 %v8559_v23  ;;  %v10183_v43 = vmul.f32 %v3473_v13, %v3414_v1 }
 0x25b   :  { %v2959_v56 = vmul.f32 %v10948_v11, %v2875_v33  ;;  %v10949_v63 = vld [vmem:[#allocation43_spill] sm:$0xff]  ;;  %7824 = vmatprep.subr.bf16.mxu1 %v8562_v9  ;;  %v10957_v9 = vld [vmem:[#allocation44_spill] sm:$0xff] }
 0x25c   :  { %v2634_v53 = vmul.f32 %v10949_v63, %v10151_v59  ;;  %v10950_v7 = vld [vmem:[#allocation55_spill] sm:$0xff]  ;;  %v2750_v33 = vpack.c.bf16 %v2743_v42, %v2742_v0  ;;  %10953 = vst [vmem:[#allocation60_spill] sm:$0xff] %v10183_v43  ;;  %v10187_v0 = vld [vmem:[#allocation2 + $0x54] sm:$0xff]  ;;  %v10961_v43 = vld [vmem:[#allocation58_spill] sm:$0xff] }
 0x25d   :  { %v2635_v58 = vmul.f32 %v10950_v7, %v10168_v34  ;;  %v10951_v48 = vld [vmem:[#allocation51_spill] sm:$0xff]  ;;  %v2966_v11 = vpack.c.bf16 %v2959_v56, %v2958_v47  ;;  %v10180_v7 = vld [vmem:[%s8946_s25 + $0x200] sm:$0xff]   ;;  %7773 = vmatpush3.bf16.msra.mxu0 %v8561_v60  ;;  %v2876_v50 = vld [vmem:[#allocation2 + $0x57] sm:$0xff] }
 0x25e   :  { %v2850_v5 = vmul.f32 %v3413_v30, %v10951_v48  ;;  %4208 = vmatprep.mubr.bf16.mxu0 %v2750_v33  ;;  %v3415_v30 = vld [vmem:[#allocation2 + $0x55] sm:$0xff]  ;;  %v3082_v13 = vld [vmem:[#allocation2 + $0x9] sm:$0xff]  ;;  %8045 = vmatprep.subr.bf16.mxu0 %v10180_v7  ;;  %v10958_v60 = vld [vmem:[#allocation62_spill] sm:$0xff] }
 0x25f   :  { %v2642_v63 = vpack.c.bf16 %v2635_v58, %v2634_v53  ;;  %4289 = vmatprep.mubr.bf16.mxu1 %v2966_v11  ;;  %v3083_v48 = vld [vmem:[#allocation2 + $0x11] sm:$0xff]  ;;  %v10185_v28 = vmul.f32 %v3478_v52, %v3415_v30  ;;  %v10189_v47 = vld [vmem:[#allocation2 + $0x5c] sm:$0xff]  ;;  %v2744_v58 = vmul.f32 %v10957_v9, %v10187_v0  ;;  %v10960_v23 = vld [vmem:[#allocation71_spill] sm:$0xff]  ;;  %7825 = vmatpush3.bf16.msra.mxu1 %v8563_v54 }
 0x260   :  { %v2858_v49 = vpack.c.bf16 %v2851_v8, %v2850_v5  ;;  %v10191_v5 = vld [vmem:[#allocation2 + $0x5b] sm:$0xff]  ;;  %v10193_v8 = vld [vmem:[#allocation2 + $0x53] sm:$0xff]  ;;  %v2745_v33 = vmul.f32 %v10189_v47, %v10958_v60  ;;  %v2852_v39 = vmul.f32 %v3415_v30, %v10960_v23  ;;  %v10964_v26 = vld [vmem:[#allocation59_spill] sm:$0xff]  ;;  %v3166_v60 = vmul.f32 %v10965_v51, %v3082_v13 }
 0x261   :  { %10954 = vst [vmem:[#allocation50_spill] sm:$0xff] %v10185_v28  ;;  %4209 = vmatmul.mubr.bf16.gmra.mrb[112].mxu0 %v2642_v63  ;;  %v10197_v42 = vld [vmem:[#allocation2 + $0x5d] sm:$0xff]  ;;  %v10955_v52 = vld [vmem:[#allocation48_spill] sm:$0xff] }
 0x262   :  { %4290 = vmatmul.mubr.bf16.gmra.mrb[112].mxu1 %v2858_v49  ;;  %v3167_v1 = vmul.f32 %v10955_v52, %v3083_v48  ;;  %v10956_v56 = vld [vmem:[#allocation65_spill] sm:$0xff]  ;;  %v2853_v9 = vmul.f32 %v10197_v42, %v10964_v26  ;;  %v2751_v31 = vpack.c.bf16 %v2745_v33, %v2744_v58  ;;  %v2974_v26 = vld [vmem:[#allocation2 + $0x8] sm:$0xff]  ;;  %v10970_v13 = vld [vmem:[#allocation54_spill] sm:$0xff] }
 0x263   :  { %v3383_v53 = vmul.f32 %v10956_v56, %v9987_v44  ;;  %v2877_v11 = vld [vmem:[#allocation2 + $0x5f] sm:$0xff] }
 0x264   :  { %v10959_v63 = vld [vmem:[#allocation57_spill] sm:$0xff]  ;;  %v2961_v28 = vmul.f32 %v10961_v43, %v2877_v11  ;;  %v10963_v44 = vld [vmem:[#allocation46_spill] sm:$0xff]  ;;  %4216 = vmatprep.mubr.bf16.mxu0 %v2751_v31  ;;  %v2975_v43 = vld [vmem:[#allocation2 + $0x10] sm:$0xff]  ;;  %v3178_v23 = vpack.c.bf16 %v3167_v1, %v3166_v60  ;;  %v10971_v31 = vmax.f32 %v10020_v61, 0.0 }
 0x265   :  { %v2960_v49 = vmul.f32 %v10959_v63, %v2876_v50  ;;  %v10962_v48 = vld [vmem:[#allocation45_spill] sm:$0xff]  ;;  %v2637_v56 = vmul.f32 %v10191_v5, %v10963_v44  ;;  %v2859_v50 = vpack.c.bf16 %v2853_v9, %v2852_v39  ;;  %v10966_v63 = vld [vmem:[#allocation100_spill] sm:$0xff]  ;;  %v10975_v44 = vld [vmem:[#allocation75_spill] sm:$0xff] }
 0x266   :  { %v2636_v52 = vmul.f32 %v10962_v48, %v10193_v8  ;;  %v10967_v30 = vld [vmem:[#allocation73_spill] sm:$0xff]  ;;  %v3085_v48 = vld [vmem:[#allocation2 + $0x21] sm:$0xff] }
 0x267   :  { %v2967_v45 = vpack.c.bf16 %v2961_v28, %v2960_v49  ;;  %v3382_v54 = vmul.f32 %v10967_v30, %v10966_v63  ;;  %v10968_v58 = vld [vmem:[#allocation49_spill] sm:$0xff]  ;;  %v3169_v49 = vmul.f32 %v10970_v13, %v3085_v48 }
 0x268   :  { %v2643_v41 = vpack.c.bf16 %v2637_v56, %v2636_v52  ;;  %v3059_v33 = vmul.f32 %v10968_v58, %v2975_v43  ;;  %v3084_v51 = vld [vmem:[#allocation2 + $0x19] sm:$0xff]  ;;  %v3385_v56 = vmul.f32 %v10975_v44, %v10037_v12  ;;  %v10980_v43 = vld [vmem:[#allocation72_spill] sm:$0xff]  ;;  %v10983_v12 = vmax.f32 %v10081_v19, 0.0  ;;  %v10984_v58 = vld [vmem:[#allocation83_spill] sm:$0xff] }
 0x269   :  { %4297 = vmatprep.mubr.bf16.mxu1 %v2967_v45  ;;  %v3394_v11 = vpack.c.bf16 %v3383_v53, %v3382_v54  ;;  %v10969_v28 = vld [vmem:[#allocation93_spill] sm:$0xff]  ;;  %v10974_v53 = vld [vmem:[#allocation70_spill] sm:$0xff]  ;;  %v10988_v19 = vld [vmem:[#allocation92_spill] sm:$0xff] }
 0x26a   :  { %4217 = vmatmul.mubr.bf16.gmra.mrb[116].mxu0 %v2643_v41  ;;  %4298 = vmatmul.mubr.bf16.gmra.mrb[116].mxu1 %v2859_v50  ;;  %v3275_v39 = vmul.f32 %v10969_v28, %v9992_v35  ;;  %v10972_v45 = vld [vmem:[#allocation81_spill] sm:$0xff]  ;;  %v10973_v41 = vmax.f32 %v10035_v46, 0.0  ;;  %v10978_v35 = vld [vmem:[#allocation67_spill] sm:$0xff]  ;;  %v10981_v46 = vmax.f32 %v10073_v17, 0.0  ;;  %v10986_v17 = vld [vmem:[#allocation90_spill] sm:$0xff] }
 0x26b   :  { %4338 = vmatprep.mubr.bf16.mxu0 %v3178_v23  ;;  %4419 = vmatprep.mubr.bf16.mxu1 %v3394_v11  ;;  %v10226_v1 = vmul.f32 %v10972_v45, %v10971_v31  ;;  %v10976_v9 = vld [vmem:[#allocation77_spill] sm:$0xff]  ;;  %v3384_v23 = vmul.f32 %v10980_v43, %v10006_v4  ;;  %v10982_v11 = vld [vmem:[#allocation80_spill] sm:$0xff]  ;;  %v8565_v45 = vld [vmem:[%s8946_s25 + $0x208] sm:$0xff]   ;;  %v10985_v4 = vmax.f32 %v10124_v29, 0.0 }
 0x26c   :  { %v10231_v52 = vmul.f32 %v10974_v53, %v10973_v41  ;;  %v3058_v60 = vmul.f32 %v10976_v9, %v2974_v26  ;;  %v10977_v50 = vld [vmem:[#allocation101_spill] sm:$0xff]  ;;  %v10246_v48 = vmul.f32 %v10982_v11, %v10981_v46  ;;  %v10251_v26 = vmul.f32 %v10984_v58, %v10983_v12  ;;  %v2977_v41 = vld [vmem:[#allocation2 + $0x20] sm:$0xff]  ;;  %v10989_v29 = vld [vmem:[#allocation79_spill] sm:$0xff] }
 0x26d   :  { %v3274_v63 = vmul.f32 %v10978_v35, %v10977_v50  ;;  %v10979_v30 = vld [vmem:[#allocation85_spill] sm:$0xff]  ;;  %v10259_v44 = vmul.f32 %v10986_v17, %v10985_v4  ;;  %v10987_v9 = vmax.f32 %v10134_v32, 0.0  ;;  %v3086_v35 = vld [vmem:[#allocation2 + $0x29] sm:$0xff]  ;;  %v10994_v12 = vld [vmem:[#allocation74_spill] sm:$0xff] }
 0x26e   :  { %v3168_v54 = vmul.f32 %v10979_v30, %v3084_v51  ;;  %v3073_v61 = vpack.c.bf16 %v10231_v52, %v10226_v1  ;;  %v3070_v28 = vpack.c.bf16 %v3059_v33, %v3058_v60  ;;  %v3395_v51 = vpack.c.bf16 %v3385_v56, %v3384_v23  ;;  %v3087_v33 = vld [vmem:[#allocation2 + $0x31] sm:$0xff]  ;;  %v2978_v17 = vld [vmem:[#allocation2 + $0x28] sm:$0xff] }
 0x26f   :  { %v3286_v13 = vpack.c.bf16 %v3275_v39, %v3274_v63  ;;  %v3074_v53 = vpack.c.bf16 %v10251_v26, %v10246_v48  ;;  %v10264_v50 = vmul.f32 %v10988_v19, %v10987_v9  ;;  %v2976_v39 = vld [vmem:[#allocation2 + $0x18] sm:$0xff]  ;;  %v3061_v56 = vmul.f32 %v10989_v29, %v2977_v41  ;;  %v10990_v60 = vld [vmem:[#allocation76_spill] sm:$0xff]  ;;  %v10991_v63 = vld [vmem:[#allocation87_spill] sm:$0xff]  ;;  %v3488_v48 = vpop.permute.xlu0 %3487 }
 0x270   :  { %v3179_v31 = vpack.c.bf16 %v3169_v49, %v3168_v54  ;;  %v3277_v32 = vmul.f32 %v10990_v60, %v10047_v40  ;;  %v3171_v30 = vmul.f32 %v10991_v63, %v3087_v33  ;;  %v10992_v54 = vld [vmem:[#allocation84_spill] sm:$0xff]  ;;  %v3276_v58 = vmul.f32 %v10994_v12, %v10016_v36  ;;  %v3089_v9 = vld [vmem:[#allocation2 + $0x41] sm:$0xff] }
 0x271   :  { %v3075_v49 = vpack.c.bf16 %v10264_v50, %v10259_v44  ;;  %v3387_v43 = vmul.f32 %v10992_v54, %v10090_v18  ;;  %v8566_v23 = vld [vmem:[%s8946_s25 + $0x210] sm:$0xff]   ;;  %v8567_v18 = vld [vmem:[%s8946_s25 + $0x218] sm:$0xff]   ;;  %v10997_v36 = vld [vmem:[#allocation63_spill] sm:$0xff]  ;;  %v3282_v1 = vmul.f32 %v10004_v10, %v10168_v34  ;;  %v11013_v34 = vpack.c.bf16 %v9990_v55, %v9982_v6 }
 0x272   :  { %4339 = vmatmul.mubr.bf16.vlgmr.msra.gmra.mrb[120].mxu0 %v3070_v28  ;;  %4420 = vmatmul.mubr.bf16.vlgmr.msra.gmra.mrb[120].mxu1 %v3286_v13  ;;  %v10993_v46 = vld [vmem:[#allocation56_spill] sm:$0xff]  ;;  %v10996_v13 = vld [vmem:[#allocation82_spill] sm:$0xff]  ;;  %v3062_v19 = vmul.f32 %v10997_v36, %v2978_v17  ;;  %v11003_v54 = vld [vmem:[#allocation95_spill] sm:$0xff] }
 0x273   :  { %4346 = vmatprep.mubr.bf16.mxu0 %v3179_v31  ;;  %4427 = vmatprep.mubr.bf16.mxu1 %v3395_v51  ;;  %v3060_v11 = vmul.f32 %v10993_v46, %v2976_v39  ;;  %v3386_v31 = vmul.f32 %v10996_v13, %v10061_v3  ;;  %v3287_v51 = vpack.c.bf16 %v3277_v32, %v3276_v58  ;;  %v10998_v33 = vld [vmem:[#allocation86_spill] sm:$0xff]  ;;  %v10999_v39 = vld [vmem:[#allocation69_spill] sm:$0xff]  ;;  %v11002_v63 = vld [vmem:[#allocation64_spill] sm:$0xff] }
 0x274   :  { %8046 = vmatpush3.bf16.msra.mxu0 %v10180_v7  ;;  %v10995_v7 = vld [vmem:[#allocation61_spill] sm:$0xff]  ;;  %v3279_v3 = vmul.f32 %v10998_v33, %v10102_v22  ;;  %v3173_v29 = vmul.f32 %v10999_v39, %v3089_v9  ;;  %v8568_v32 = vld [vmem:[%s8946_s25 + $0x220] sm:$0xff]   ;;  %v11009_v17 = vld [vmem:[#allocation96_spill] sm:$0xff] }
 0x275   :  { %8047 = vmatprep.subr.bf16.mxu0 %v8565_v45  ;;  %v3170_v28 = vmul.f32 %v10995_v7, %v3086_v35  ;;  %v3071_v40 = vpack.c.bf16 %v3061_v56, %v3060_v11  ;;  %v3396_v4 = vpack.c.bf16 %v3387_v43, %v3386_v31  ;;  %v11000_v56 = vld [vmem:[#allocation94_spill] sm:$0xff]  ;;  %v11001_v35 = vmax.f32 %v9985_v25, 0.0  ;;  %v3091_v25 = vld [vmem:[#allocation2 + $0x51] sm:$0xff]  ;;  %v3090_v31 = vld [vmem:[#allocation2 + $0x49] sm:$0xff] }
 0x276   :  { %v3389_v60 = vmul.f32 %v11000_v56, %v10141_v38  ;;  %v3278_v43 = vmul.f32 %v11003_v54, %v10068_v21  ;;  %v11005_v22 = vld [vmem:[#allocation98_spill] sm:$0xff]  ;;  %v11006_v21 = vld [vmem:[#allocation97_spill] sm:$0xff]  ;;  %v11011_v56 = vld [vmem:[#allocation88_spill] sm:$0xff] }
 0x277   :  { %v3180_v41 = vpack.c.bf16 %v3171_v30, %v3170_v28  ;;  %v3063_v30 = vmul.f32 %v11002_v63, %v11001_v35  ;;  %v3388_v11 = vmul.f32 %v11005_v22, %v10113_v15  ;;  %v8569_v28 = vld [vmem:[%s8946_s25 + $0x228] sm:$0xff]   ;;  %v3281_v13 = vmul.f32 %v11006_v21, %v10151_v59  ;;  %v11007_v15 = vld [vmem:[#allocation78_spill] sm:$0xff]  ;;  %v11010_v9 = vld [vmem:[#allocation89_spill] sm:$0xff] }
 0x278   :  { %8048 = vmatpush3.bf16.msra.mxu0 %v8565_v45  ;;  %v3088_v45 = vld [vmem:[#allocation2 + $0x39] sm:$0xff]  ;;  %v3288_v58 = vpack.c.bf16 %v3279_v3, %v3278_v43  ;;  %v3174_v36 = vmul.f32 %v11010_v9, %v3090_v31  ;;  %v3309_v39 = vld [vmem:[#allocation2 + $0x64] sm:$0xff]  ;;  %v11023_v55 = vld [vmem:[#allocation60_spill] sm:$0xff] }
 0x279   :  { %8049 = vmatprep.subr.bf16.mxu0 %v8566_v23  ;;  %v3072_v12 = vpack.c.bf16 %v3063_v30, %v3062_v19  ;;  %v3397_v38 = vpack.c.bf16 %v3389_v60, %v3388_v11  ;;  %v3390_v19 = vmul.f32 %v9977_v16, %v10154_v27  ;;  %v3392_v16 = vmul.f32 %v10111_v57, %v10189_v47  ;;  %v3201_v63 = vld [vmem:[#allocation2 + $0x63] sm:$0xff]  ;;  %v11019_v44 = vld [vmem:[#allocation41_spill] sm:$0xff] }
 0x27a   :  { %4347 = vmatmul.mubr.bf16.gmra.mrb[124].mxu0 %v3071_v40  ;;  %4428 = vmatmul.mubr.bf16.gmra.mrb[124].mxu1 %v3287_v51  ;;  %v3175_v40 = vmul.f32 %v11007_v15, %v3091_v25  ;;  %v11008_v51 = vld [vmem:[#allocation99_spill] sm:$0xff]  ;;  %v3393_v27 = vmul.f32 %v9972_v24, %v3309_v39  ;;  %v3284_v24 = vmul.f32 %v10136_v14, %v10191_v5  ;;  %v11014_v47 = vld [vmem:[#allocation102_spill] sm:$0xff]  ;;  %v11016_v14 = vld [vmem:[#allocation104_spill] sm:$0xff] }
 0x27b   :  { %4354 = vmatprep.mubr.bf16.mxu0 %v3180_v41  ;;  %4435 = vmatprep.mubr.bf16.mxu1 %v3396_v4  ;;  %v3391_v41 = vmul.f32 %v11008_v51, %v10187_v0  ;;  %v8570_v4 = vld [vmem:[%s8946_s25 + $0x230] sm:$0xff]   ;;  %v3092_v0 = vld [vmem:[#allocation2 + $0x59] sm:$0xff]  ;;  %v3285_v10 = vmul.f32 %v10163_v37, %v3201_v63  ;;  %v11017_v5 = vld [vmem:[#allocation103_spill] sm:$0xff] }
 0x27c   :  { %8050 = vmatpush3.bf16.msra.mxu0 %v8566_v23  ;;  %v11004_v23 = vld [vmem:[#allocation68_spill] sm:$0xff]  ;;  %v3182_v59 = vpack.c.bf16 %v3175_v40, %v3174_v36  ;;  %v3176_v60 = vmul.f32 %v11011_v56, %v3092_v0  ;;  %v11018_v37 = vpack.c.bf16 %v11016_v14, %v11017_v5  ;;  %v3417_v26 = vld [vmem:[#allocation2 + $0x65] sm:$0xff]  ;;  %v11020_v50 = vld [vmem:[#allocation53_spill] sm:$0xff] }
 0x27d   :  { %8051 = vmatprep.subr.bf16.mxu0 %v8567_v18  ;;  %v3172_v46 = vmul.f32 %v11004_v23, %v3088_v45  ;;  %v3398_v3 = vpack.c.bf16 %v3391_v41, %v3390_v19  ;;  %v8571_v45 = vld [vmem:[%s8946_s25 + $0x238] sm:$0xff]   ;;  %v3291_v57 = vpack.c.bf16 %v3285_v10, %v3284_v24  ;;  %v11022_v6 = vld [vmem:[#allocation50_spill] sm:$0xff]  ;;  %v8574_v11 = vld [vmem:[%s8961_s8 + $0x48] sm:$0xff]   ;;  %s11030_s25 = sld [smem:[#allocation22_spill]] }
 0x27e   :  { %v11024_v54 = vpack.c.bf16 %v11022_v6, %v11023_v55  ;;  %v8573_v22 = vld [vmem:[%s8961_s8] sm:$0xff]  }
 0x27f   :  { %v3181_v7 = vpack.c.bf16 %v3173_v29, %v3172_v46  ;;  %v3093_v29 = vld [vmem:[#allocation2 + $0x61] sm:$0xff] }
 0x280   :  { %8052 = vmatpush3.bf16.msra.mxu0 %v8567_v18  ;;  %v3280_v18 = vmul.f32 %v11009_v17, %v10119_v2  ;;  %v3283_v2 = vmul.f32 %v10029_v62, %v10193_v8  ;;  %v10323_v62 = vld [vmem:[#allocation2] sm:$0xff]  ;;  %v11015_v8 = vpack.c.bf16 %v10040_v20, %v11014_v47  ;;  %v3501_v20 = vmul.f32 %v3488_v48, %v3417_v26 }
 0x281   :  { %8053 = vmatprep.subr.bf16.mxu0 %v8568_v32  ;;  %v8572_v46 = vld [vmem:[%s8961_s8 + $0x40] sm:$0xff]  }
 0x282   :  { %4355 = vmatmul.mubr.bf16.gmra.mrb[128].mxu0 %v3072_v12  ;;  %4436 = vmatmul.mubr.bf16.gmra.mrb[128].mxu1 %v3288_v58  ;;  %v3289_v33 = vpack.c.bf16 %v3281_v13, %v3280_v18  ;;  %v3290_v52 = vpack.c.bf16 %v3283_v2, %v3282_v1  ;;  %v8575_v12 = vld [vmem:[%s8961_s8 + $0x8] sm:$0xff]   ;;  %v8576_v58 = vld [vmem:[%s8961_s8 + $0x50] sm:$0xff]   ;;  %v8581_v25 = vld [vmem:[%s8961_s8 + $0x60] sm:$0xff]  }
 0x283   :  { %4362 = vmatprep.mubr.bf16.mxu0 %v3181_v7  ;;  %4443 = vmatprep.mubr.bf16.mxu1 %v3397_v38  ;;  %v8577_v7 = vld [vmem:[%s8961_s8 + $0x10] sm:$0xff]   ;;  %v8578_v38 = vld [vmem:[%s8961_s8 + $0x58] sm:$0xff]   ;;  %v8582_v40 = vld [vmem:[%s8961_s8 + $0x20] sm:$0xff]  }
 0x284   :  { %8054 = vmatpush3.bf16.msra.mxu0 %v8568_v32  ;;  %v11012_v32 = vld [vmem:[#allocation91_spill] sm:$0xff]  ;;  %7876 = vmatprep.subr.bf16.mxu1 %v8572_v46  ;;  %v8590_v26 = vld [vmem:[%s8961_s8 + $0xa0] sm:$0xff]  }
 0x285   :  { %8055 = vmatprep.subr.bf16.mxu0 %v8569_v28  ;;  %v3177_v35 = vmul.f32 %v11012_v32, %v3093_v29  ;;  %7877 = vmatpush3.bf16.msra.mxu1 %v8573_v22  ;;  %v8584_v29 = vld [vmem:[%s8961_s8 + $0x68] sm:$0xff]   ;;  %v8588_v32 = vld [vmem:[%s8961_s8 + $0x70] sm:$0xff]  }
 0x286   :  { %7878 = vmatprep.subr.bf16.mxu1 %v8574_v11  ;;  %v8586_v2 = vld [vmem:[%s8961_s8 + $0x28] sm:$0xff]  }
 0x287   :  { %v3183_v30 = vpack.c.bf16 %v3177_v35, %v3176_v60  ;;  %v8585_v60 = vld [vmem:[%s8961_s8 + $0x90] sm:$0xff]  }
 0x288   :  { %8056 = vmatpush3.bf16.msra.mxu0 %v8569_v28  ;;  %v8580_v28 = vld [vmem:[%s8961_s8 + $0x80] sm:$0xff]  }
 0x289   :  { %8057 = vmatprep.subr.bf16.mxu0 %v8570_v4  ;;  %7879 = vmatpush3.bf16.msra.mxu1 %v8575_v12 }
 0x28a   :  { %4363 = vmatmul.mubr.bf16.gmra.mrb[132].mxu0 %v3073_v61  ;;  %4444 = vmatmul.mubr.bf16.gmra.mrb[132].mxu1 %v3289_v33  ;;  %v3399_v61 = vpack.c.bf16 %v3393_v27, %v3392_v16 }
 0x28b   :  { %4370 = vmatprep.mubr.bf16.mxu0 %v3182_v59  ;;  %4451 = vmatprep.mubr.bf16.mxu1 %v3398_v3 }
 0x28c   :  { %8058 = vmatpush3.bf16.msra.mxu0 %v8570_v4  ;;  %7880 = vmatprep.subr.bf16.mxu1 %v8576_v58 }
 0x28d   :  { %8059 = vmatprep.subr.bf16.mxu0 %v8571_v45  ;;  %7881 = vmatpush3.bf16.msra.mxu1 %v8577_v7  ;;  %v8594_v7 = vld [vmem:[%s8961_s8 + $0xb0] sm:$0xff]  }
 0x28e   :  { %7882 = vmatprep.subr.bf16.mxu1 %v8578_v38 }
 0x290   :  { %8060 = vmatpush3.bf16.msra.mxu0 %v8571_v45  ;;  %v8583_v45 = vld [vmem:[%s8961_s8 + $0x88] sm:$0xff]  }
 0x291   :  { %8073 = vmatprep.subr.bf16.mxu0 %v10323_v62 }
 0x292   :  { %4371 = vmatmul.mubr.bf16.gmra.mrb[136].mxu0 %v3074_v53  ;;  %4452 = vmatmul.mubr.bf16.gmra.mrb[136].mxu1 %v3290_v52  ;;  %v3483_v53 = vpop.permute.xlu1 %3482 }
 0x293   :  { %4378 = vmatprep.mubr.bf16.mxu0 %v3183_v30  ;;  %4459 = vmatprep.mubr.bf16.mxu1 %v3399_v61  ;;  %v3500_v43 = vmul.f32 %v3483_v53, %v10197_v42  ;;  %v8579_v42 = vld [vmem:[%s8961_s8 + $0x18] sm:$0xff]   ;;  %v8589_v30 = vld [vmem:[%s8961_s8 + $0x30] sm:$0xff]  }
 0x294   :  { %7883 = vmatpush3.bf16.msra.mxu1 %v8579_v42 }
 0x295   :  { %v3507_v23 = vpack.c.bf16 %v3501_v20, %v3500_v43  ;;  %7884 = vmatprep.subr.bf16.mxu1 %v8581_v25 }
 0x298   :  { %7885 = vmatpush3.bf16.msra.mxu1 %v8582_v40 }
 0x299   :  { %7886 = vmatprep.subr.bf16.mxu1 %v8584_v29 }
 0x29a   :  { %4379 = vmatmul.mubr.bf16.gmra.mrb[140].mxu0 %v3075_v49  ;;  %4460 = vmatmul.mubr.bf16.gmra.mrb[140].mxu1 %v3291_v57  ;;  %v11021_v49 = vpack.c.bf16 %v11019_v44, %v11020_v50  ;;  %v8591_v57 = vld [vmem:[%s8961_s8 + $0x78] sm:$0xff]  }
 0x29b   :  { %8061 = vmatprep.mubr.bf16.mxu0 %v11013_v34  ;;  %v8587_v34 = vld [vmem:[%s8961_s8 + $0x98] sm:$0xff]  }
 0x29c   :  { %7887 = vmatpush3.bf16.msra.mxu1 %v8586_v2 }
 0x29d   :  { %7888 = vmatprep.subr.bf16.mxu1 %v8588_v32 }
 0x2a0   :  { %7889 = vmatpush3.bf16.msra.mxu1 %v8589_v30 }
 0x2a1   :  { %7890 = vmatprep.subr.bf16.mxu1 %v8591_v57 }
 0x2a2   :  { %8062 = vmatmul.mubr.bf16.vlgmr.msra.gmra.mrb[144].mxu0 %v11015_v8  ;;  %v8593_v8 = vld [vmem:[%s8961_s8 + $0x38] sm:$0xff]  }
 0x2a3   :  { %8065 = vmatprep.mubr.bf16.mxu0 %v11018_v37  ;;  %8074 = vmatpush3.bf16.msra.mxu0 %v8580_v28 }
 0x2a4   :  { %8075 = vmatprep.subr.bf16.mxu0 %v10323_v62  ;;  %7891 = vmatpush3.bf16.msra.mxu1 %v8593_v8 }
 0x2a5   :  { %8093 = vmatprep.subr.bf16.mxu1 %v10323_v62 }
 0x2a7   :  { %8076 = vmatpush3.bf16.msra.mxu0 %v8583_v45 }
 0x2a8   :  { %8077 = vmatprep.subr.bf16.mxu0 %v10323_v62 }
 0x2aa   :  { %8066 = vmatmul.mubr.bf16.gmra.mrb[148].mxu0 %v11021_v49 }
 0x2ab   :  { %8069 = vmatprep.mubr.bf16.mxu0 %v11024_v54  ;;  %8078 = vmatpush3.bf16.msra.mxu0 %v8585_v60 }
 0x2ac   :  { %8079 = vmatprep.subr.bf16.mxu0 %v10323_v62 }
 0x2af   :  { %8080 = vmatpush3.bf16.msra.mxu0 %v8587_v34 }
 0x2b0   :  { %8081 = vmatprep.subr.bf16.mxu0 %v10323_v62 }
 0x2b2   :  { %8070 = vmatmul.mubr.bf16.gmra.mrb[152].mxu0 %v3507_v23  ;;  %v8592_v23 = vld [vmem:[%s8961_s8 + $0xa8] sm:$0xff]  }
 0x2b3   :  { %8089 = vmatprep.mubr.msk.bf16.mxu0 %vm8912_vm0, %v10323_v62  ;;  %8082 = vmatpush3.bf16.msra.mxu0 %v8590_v26 }
 0x2b4   :  { %8083 = vmatprep.subr.bf16.mxu0 %v10323_v62 }
 0x2b7   :  { %8084 = vmatpush3.bf16.msra.mxu0 %v8592_v23 }
 0x2b8   :  { %8085 = vmatprep.subr.bf16.mxu0 %v10323_v62 }
 0x2bb   :  { %8086 = vmatpush3.bf16.msra.mxu0 %v8594_v7 }
 0x2bc   :  { %8087 = vmatprep.subr.bf16.mxu0 %v10323_v62 }
 0x311   :  { %v7670_v21 = vpop.f32.mrb[96].mxu0  ;;  %v7722_v13 = vpop.f32.mrb[96].mxu1 }
 0x312   :  { %v7671_v31 = vpop.f32.mrb[97].mxu0  ;;  %v7723_v15 = vpop.f32.mrb[97].mxu1 }
 0x313   :  { %v7672_v51 = vadd.f32 %v7671_v31, %v7670_v21  ;;  %v7724_v41 = vadd.f32 %v7723_v15, %v7722_v13  ;;  %v7673_v4 = vpop.f32.mrb[98].mxu0  ;;  %v7725_v17 = vpop.f32.mrb[98].mxu1 }
 0x314   :  { %v7674_v18 = vpop.f32.mrb[99].mxu0  ;;  %v7726_v9 = vpop.f32.mrb[99].mxu1 }
 0x315   :  { %v10363_v36 = vadd.f32 %v7724_v41, %v7672_v51  ;;  %v7675_v19 = vadd.f32 %v7674_v18, %v7673_v4  ;;  %v7727_v33 = vadd.f32 %v7726_v9, %v7725_v17  ;;  %v8595_v51 = vld [vmem:[%s8961_s8 + $0xb8] sm:$0xff]   ;;  %s11033_s8 = sld [smem:[#allocation20_spill]] }
 0x316   :  { %8088 = vmatpush3.bf16.msra.mxu0 %v8595_v51 }
 0x317   :  { %v10365_v59 = vadd.f32 %v7727_v33, %v7675_v19  ;;  %8113 = vmatprep.subr.bf16.mxu0 %v10323_v62 }
 0x319   :  { %v7676_v3 = vpop.f32.mrb[100].mxu0  ;;  %v7728_v39 = vpop.f32.mrb[100].mxu1 }
 0x31a   :  { %v7677_v0 = vpop.f32.mrb[101].mxu0  ;;  %v7729_v27 = vpop.f32.mrb[101].mxu1 }
 0x31b   :  { %v7678_v16 = vadd.f32 %v7677_v0, %v7676_v3  ;;  %v7679_v56 = vpop.f32.mrb[102].mxu0  ;;  %v7730_v35 = vadd.f32 %v7729_v27, %v7728_v39  ;;  %v7731_v1 = vpop.f32.mrb[102].mxu1 }
 0x31c   :  { %v7680_v52 = vpop.f32.mrb[103].mxu0  ;;  %v7732_v63 = vpop.f32.mrb[103].mxu1 }
 0x31d   :  { %v7681_v61 = vadd.f32 %v7680_v52, %v7679_v56  ;;  %v10376_v24 = vadd.f32 %v7730_v35, %v7678_v16  ;;  %v7733_v10 = vadd.f32 %v7732_v63, %v7731_v1 }
 0x31f   :  { %v10380_v47 = vadd.f32 %v7733_v10, %v7681_v61 }
 0x322   :  { %v7682_v14 = vpop.f32.mrb[104].mxu0  ;;  %v7734_v5 = vpop.f32.mrb[104].mxu1 }
 0x323   :  { %v7683_v37 = vpop.f32.mrb[105].mxu0  ;;  %v7735_v48 = vpop.f32.mrb[105].mxu1 }
 0x324   :  { %v7684_v53 = vadd.f32 %v7683_v37, %v7682_v14  ;;  %v7736_v44 = vadd.f32 %v7735_v48, %v7734_v5  ;;  %v7685_v50 = vpop.f32.mrb[106].mxu0  ;;  %v7737_v49 = vpop.f32.mrb[106].mxu1 }
 0x325   :  { %v7686_v6 = vpop.f32.mrb[107].mxu0  ;;  %v7738_v55 = vpop.f32.mrb[107].mxu1 }
 0x326   :  { %v10386_v54 = vadd.f32 %v7736_v44, %v7684_v53  ;;  %v7687_v20 = vadd.f32 %v7686_v6, %v7685_v50  ;;  %v7739_v43 = vadd.f32 %v7738_v55, %v7737_v49 }
 0x328   :  { %v10390_v46 = vadd.f32 %v7739_v43, %v7687_v20 }
 0x32a   :  { %v7740_v11 = vpop.f32.mrb[108].mxu1 }
 0x32b   :  { %v7688_v22 = vpop.f32.mrb[108].mxu0  ;;  %v7741_v58 = vpop.f32.mrb[109].mxu1 }
 0x32c   :  { %v7689_v12 = vpop.f32.mrb[109].mxu0  ;;  %v7742_v42 = vadd.f32 %v7741_v58, %v7740_v11  ;;  %v7743_v25 = vpop.f32.mrb[110].mxu1 }
 0x32d   :  { %v7690_v38 = vadd.f32 %v7689_v12, %v7688_v22  ;;  %v7691_v28 = vpop.f32.mrb[110].mxu0  ;;  %v7744_v13 = vpop.f32.mrb[111].mxu1 }
 0x32e   :  { %v7692_v21 = vpop.f32.mrb[111].mxu0  ;;  %v7745_v40 = vadd.f32 %v7744_v13, %v7743_v25 }
 0x32f   :  { %v10395_v31 = vadd.f32 %v7742_v42, %v7690_v38  ;;  %v7693_v15 = vadd.f32 %v7692_v21, %v7691_v28 }
 0x331   :  { %v10398_v41 = vadd.f32 %v7745_v40, %v7693_v15 }
 0x334   :  { %v7694_v4 = vpop.f32.mrb[112].mxu0 }
 0x335   :  { %v7746_v17 = vpop.f32.mrb[112].mxu1  ;;  %v7695_v18 = vpop.f32.mrb[113].mxu0 }
 0x336   :  { %v7747_v9 = vpop.f32.mrb[113].mxu1  ;;  %v7696_v19 = vadd.f32 %v7695_v18, %v7694_v4  ;;  %v7697_v3 = vpop.f32.mrb[114].mxu0 }
 0x337   :  { %v7748_v33 = vadd.f32 %v7747_v9, %v7746_v17  ;;  %v7749_v45 = vpop.f32.mrb[114].mxu1  ;;  %v7698_v39 = vpop.f32.mrb[115].mxu0 }
 0x338   :  { %v7750_v0 = vpop.f32.mrb[115].mxu1  ;;  %v7699_v2 = vadd.f32 %v7698_v39, %v7697_v3 }
 0x339   :  { %v10402_v29 = vadd.f32 %v7748_v33, %v7696_v19  ;;  %v7751_v16 = vadd.f32 %v7750_v0, %v7749_v45 }
 0x33b   :  { %v10404_v27 = vadd.f32 %v7751_v16, %v7699_v2 }
 0x33d   :  { %v7700_v56 = vpop.f32.mrb[116].mxu0  ;;  %v7752_v60 = vpop.f32.mrb[116].mxu1 }
 0x33e   :  { %v7701_v32 = vpop.f32.mrb[117].mxu0  ;;  %v7753_v35 = vpop.f32.mrb[117].mxu1 }
 0x33f   :  { %v7702_v1 = vadd.f32 %v7701_v32, %v7700_v56  ;;  %v7754_v52 = vadd.f32 %v7753_v35, %v7752_v60  ;;  %v7703_v61 = vpop.f32.mrb[118].mxu0  ;;  %v7755_v63 = vpop.f32.mrb[118].mxu1 }
 0x340   :  { %v7704_v30 = vpop.f32.mrb[119].mxu0  ;;  %v7756_v10 = vpop.f32.mrb[119].mxu1 }
 0x341   :  { %v10406_v57 = vadd.f32 %v7754_v52, %v7702_v1  ;;  %v7705_v34 = vadd.f32 %v7704_v30, %v7703_v61  ;;  %v7757_v8 = vadd.f32 %v7756_v10, %v7755_v63 }
 0x343   :  { %v10408_v14 = vadd.f32 %v7757_v8, %v7705_v34 }
 0x345   :  { %v7774_v5 = vpop.f32.mrb[120].mxu0  ;;  %v7826_v37 = vpop.f32.mrb[120].mxu1 }
 0x346   :  { %v7775_v48 = vpop.f32.mrb[121].mxu0  ;;  %v7827_v26 = vpop.f32.mrb[121].mxu1 }
 0x347   :  { %v7776_v53 = vadd.f32 %v7775_v48, %v7774_v5  ;;  %v7828_v44 = vadd.f32 %v7827_v26, %v7826_v37  ;;  %v7777_v50 = vpop.f32.mrb[122].mxu0  ;;  %v7829_v49 = vpop.f32.mrb[122].mxu1 }
 0x348   :  { %v7778_v6 = vpop.f32.mrb[123].mxu0  ;;  %v7830_v55 = vpop.f32.mrb[123].mxu1 }
 0x349   :  { %v4341_v20 = vadd.f32 %v7776_v53, %v10363_v36  ;;  %v7779_v43 = vadd.f32 %v7778_v6, %v7777_v50  ;;  %v7831_v23 = vadd.f32 %v7830_v55, %v7829_v49 }
 0x34b   :  { %v4344_v22 = vadd.f32 %v7779_v43, %v10365_v59  ;;  %v10412_v11 = vadd.f32 %v7828_v44, %v4341_v20 }
 0x34d   :  { %v7780_v12 = vpop.f32.mrb[124].mxu0  ;;  %v7832_v58 = vpop.f32.mrb[124].mxu1  ;;  %v10414_v7 = vadd.f32 %v7831_v23, %v4344_v22 }
 0x34e   :  { %v7781_v38 = vpop.f32.mrb[125].mxu0  ;;  %v7833_v42 = vpop.f32.mrb[125].mxu1 }
 0x34f   :  { %v7782_v28 = vadd.f32 %v7781_v38, %v7780_v12  ;;  %v7834_v25 = vadd.f32 %v7833_v42, %v7832_v58  ;;  %v7783_v21 = vpop.f32.mrb[126].mxu0  ;;  %v7835_v13 = vpop.f32.mrb[126].mxu1 }
 0x350   :  { %v7784_v15 = vpop.f32.mrb[127].mxu0  ;;  %v7836_v40 = vpop.f32.mrb[127].mxu1 }
 0x351   :  { %v4349_v36 = vadd.f32 %v7782_v28, %v10376_v24  ;;  %v7785_v51 = vadd.f32 %v7784_v15, %v7783_v21  ;;  %v7837_v4 = vadd.f32 %v7836_v40, %v7835_v13 }
 0x353   :  { %v4352_v59 = vadd.f32 %v7785_v51, %v10380_v47  ;;  %v10418_v17 = vadd.f32 %v7834_v25, %v4349_v36 }
 0x355   :  { %v7786_v18 = vpop.f32.mrb[128].mxu0  ;;  %v7838_v9 = vpop.f32.mrb[128].mxu1  ;;  %v10420_v19 = vadd.f32 %v7837_v4, %v4352_v59 }
 0x356   :  { %v7787_v33 = vpop.f32.mrb[129].mxu0  ;;  %v7839_v3 = vpop.f32.mrb[129].mxu1 }
 0x357   :  { %v7788_v45 = vadd.f32 %v7787_v33, %v7786_v18  ;;  %v7840_v39 = vadd.f32 %v7839_v3, %v7838_v9  ;;  %v7789_v0 = vpop.f32.mrb[130].mxu0  ;;  %v7841_v2 = vpop.f32.mrb[130].mxu1 }
 0x358   :  { %v7790_v16 = vpop.f32.mrb[131].mxu0  ;;  %v7842_v56 = vpop.f32.mrb[131].mxu1 }
 0x359   :  { %v4357_v24 = vadd.f32 %v7788_v45, %v10386_v54  ;;  %v7791_v60 = vadd.f32 %v7790_v16, %v7789_v0  ;;  %v7843_v32 = vadd.f32 %v7842_v56, %v7841_v2  ;;  %v10439_v2 = vld [vmem:[%s8951_s29] ss:$0 sm:$0xff]  ;;  %s11031_s29 = sld [smem:[#allocation23_spill]] }
 0x35b   :  { %v4360_v47 = vadd.f32 %v7791_v60, %v10390_v46  ;;  %v10424_v35 = vadd.f32 %v7840_v39, %v4357_v24  ;;  %v10443_v60 = vld [vmem:[%s8956_s3] ss:$0 sm:$0xff]  ;;  %s11032_s3 = sld [smem:[#allocation24_spill]] }
 0x35d   :  { %v7792_v1 = vpop.f32.mrb[132].mxu0  ;;  %v7844_v52 = vpop.f32.mrb[132].mxu1  ;;  %v10426_v61 = vadd.f32 %v7843_v32, %v4360_v47 }
 0x35e   :  { %v7793_v63 = vpop.f32.mrb[133].mxu0  ;;  %v7845_v30 = vpop.f32.mrb[133].mxu1 }
 0x35f   :  { %v7794_v10 = vadd.f32 %v7793_v63, %v7792_v1  ;;  %v7846_v34 = vadd.f32 %v7845_v30, %v7844_v52  ;;  %v7795_v8 = vpop.f32.mrb[134].mxu0  ;;  %v7847_v5 = vpop.f32.mrb[134].mxu1 }
 0x360   :  { %v7796_v37 = vpop.f32.mrb[135].mxu0  ;;  %v7848_v48 = vpop.f32.mrb[135].mxu1 }
 0x361   :  { %v4365_v54 = vadd.f32 %v7794_v10, %v10395_v31  ;;  %v7797_v26 = vadd.f32 %v7796_v37, %v7795_v8  ;;  %v7849_v53 = vadd.f32 %v7848_v48, %v7847_v5 }
 0x363   :  { %v4368_v46 = vadd.f32 %v7797_v26, %v10398_v41  ;;  %v4446_v44 = vadd.f32 %v7846_v34, %v4365_v54 }
 0x365   :  { %v7798_v50 = vpop.f32.mrb[136].mxu0  ;;  %v7850_v49 = vpop.f32.mrb[136].mxu1  ;;  %v4449_v6 = vadd.f32 %v7849_v53, %v4368_v46 }
 0x366   :  { %v7799_v55 = vpop.f32.mrb[137].mxu0  ;;  %v7851_v20 = vpop.f32.mrb[137].mxu1 }
 0x367   :  { %v7800_v43 = vadd.f32 %v7799_v55, %v7798_v50  ;;  %v7852_v23 = vadd.f32 %v7851_v20, %v7850_v49  ;;  %v7801_v22 = vpop.f32.mrb[138].mxu0  ;;  %v7853_v12 = vpop.f32.mrb[138].mxu1 }
 0x368   :  { %v7802_v58 = vpop.f32.mrb[139].mxu0  ;;  %v7854_v38 = vpop.f32.mrb[139].mxu1 }
 0x369   :  { %v4373_v42 = vadd.f32 %v7800_v43, %v10402_v29  ;;  %v7803_v28 = vadd.f32 %v7802_v58, %v7801_v22  ;;  %v7855_v31 = vadd.f32 %v7854_v38, %v7853_v12 }
 0x36b   :  { %v4376_v25 = vadd.f32 %v7803_v28, %v10404_v27  ;;  %v10432_v21 = vadd.f32 %v7852_v23, %v4373_v42 }
 0x36d   :  { %v7804_v41 = vpop.f32.mrb[140].mxu0  ;;  %v7856_v13 = vpop.f32.mrb[140].mxu1  ;;  %v10434_v15 = vadd.f32 %v7855_v31, %v4376_v25 }
 0x36e   :  { %v7805_v40 = vpop.f32.mrb[141].mxu0  ;;  %v7857_v36 = vpop.f32.mrb[141].mxu1 }
 0x36f   :  { %v7806_v51 = vadd.f32 %v7805_v40, %v7804_v41  ;;  %v7858_v4 = vadd.f32 %v7857_v36, %v7856_v13  ;;  %v7807_v59 = vpop.f32.mrb[142].mxu0  ;;  %v7859_v18 = vpop.f32.mrb[142].mxu1 }
 0x370   :  { %v7808_v9 = vpop.f32.mrb[143].mxu0  ;;  %v7860_v29 = vpop.f32.mrb[143].mxu1 }
 0x371   :  { %v4381_v33 = vadd.f32 %v7806_v51, %v10406_v57  ;;  %v7809_v3 = vadd.f32 %v7808_v9, %v7807_v59  ;;  %v7861_v27 = vadd.f32 %v7860_v29, %v7859_v18 }
 0x373   :  { %v4384_v45 = vadd.f32 %v7809_v3, %v10408_v14  ;;  %v4462_v39 = vadd.f32 %v7858_v4, %v4381_v33 }
 0x375   :  { %v8063_v0 = vpop.f32.mrb[144].mxu0  ;;  %v4465_v16 = vadd.f32 %v7861_v27, %v4384_v45 }
 0x376   :  { %v4511_v56 = vadd.f32 %v8063_v0, %v10418_v17  ;;  %v4502_v24 = vpop.f32.mrb[145].mxu0 }
 0x377   :  { %v4503_v32 = vadd.f32 %v4502_v24, %v10412_v11  ;;  %v8064_v47 = vpop.f32.mrb[146].mxu0 }
 0x378   :  { %v4558_v1 = vmul.f32 %v10439_v2, %v4511_v56  ;;  %v4514_v57 = vadd.f32 %v8064_v47, %v10420_v19  ;;  %v4505_v52 = vpop.f32.mrb[147].mxu0 }
 0x379   :  { %v4556_v14 = vmul.f32 %v10439_v2, %v4503_v32  ;;  %v4506_v63 = vadd.f32 %v4505_v52, %v10414_v7 }
 0x37a   :  { %v4577_v30 = vadd.f32 %v10443_v60, %v4558_v1  ;;  %v4559_v10 = vmul.f32 %v10439_v2, %v4514_v57 }
 0x37b   :  { %v4575_v17 = vadd.f32 %v10443_v60, %v4556_v14  ;;  %v4557_v34 = vmul.f32 %v10439_v2, %v4506_v63 }
 0x37c   :  { %v4578_v11 = vadd.f32 %v10443_v60, %v4559_v10  ;;  %v4589_v37 = vmax.f32 %v4577_v30, 0.0 }
 0x37d   :  { %v4576_v8 = vadd.f32 %v10443_v60, %v4557_v34  ;;  %v8067_v5 = vpop.f32.mrb[148].mxu0  ;;  %v4587_v26 = vmax.f32 %v4575_v17, 0.0 }
 0x37e   :  { %v4590_v19 = vmax.f32 %v4578_v11, 0.0  ;;  %v4527_v48 = vadd.f32 %v8067_v5, %v4446_v44  ;;  %v4518_v54 = vpop.f32.mrb[149].mxu0 }
 0x37f   :  { %v4588_v53 = vmax.f32 %v4576_v8, 0.0  ;;  %v4519_v7 = vadd.f32 %v4518_v54, %v10424_v35  ;;  %v8068_v46 = vpop.f32.mrb[150].mxu0 }
 0x380   :  { %v4606_v50 = vmax.f32 %v4589_v37, %v4590_v19  ;;  %v4562_v49 = vmul.f32 %v10439_v2, %v4527_v48  ;;  %v4530_v55 = vadd.f32 %v8068_v46, %v4449_v6  ;;  %v4521_v20 = vpop.f32.mrb[151].mxu0 }
 0x381   :  { %v4599_v43 = vmax.f32 %v4587_v26, %v4588_v53  ;;  %v4560_v23 = vmul.f32 %v10439_v2, %v4519_v7  ;;  %v4522_v22 = vadd.f32 %v4521_v20, %v10426_v61 }
 0x382   :  { %v4607_v12 = vrot.slane %v4606_v50, 4  ;;  %v4581_v58 = vadd.f32 %v10443_v60, %v4562_v49  ;;  %v4563_v44 = vmul.f32 %v10439_v2, %v4530_v55 }
 0x383   :  { %v4600_v38 = vrot.slane %v4599_v43, 4  ;;  %v4579_v42 = vadd.f32 %v10443_v60, %v4560_v23  ;;  %v4561_v35 = vmul.f32 %v10439_v2, %v4522_v22 }
 0x384   :  { %v4608_v28 = vmax.f32 %v4606_v50, %v4607_v12  ;;  %v4582_v31 = vadd.f32 %v10443_v60, %v4563_v44  ;;  %v4593_v40 = vmax.f32 %v4581_v58, 0.0 }
 0x385   :  { %v4601_v6 = vmax.f32 %v4599_v43, %v4600_v38  ;;  %v4580_v25 = vadd.f32 %v10443_v60, %v4561_v35  ;;  %v8071_v41 = vpop.f32.mrb[152].mxu0  ;;  %v4591_v59 = vmax.f32 %v4579_v42, 0.0  ;;  %v8596_v35 = vld [vmem:[%s8971_s19] sm:$0xff]  }
 0x386   :  { %v4609_v13 = vrot.slane %v4608_v28, 2  ;;  %v4594_v61 = vmax.f32 %v4582_v31, 0.0  ;;  %v4543_v36 = vadd.f32 %v8071_v41, %v4462_v39  ;;  %v4534_v51 = vpop.f32.mrb[153].mxu0 }
 0x387   :  { %v4602_v4 = vrot.slane %v4601_v6, 2  ;;  %v4592_v18 = vmax.f32 %v4580_v25, 0.0  ;;  %v4535_v9 = vadd.f32 %v4534_v51, %v10432_v21  ;;  %v8072_v29 = vpop.f32.mrb[154].mxu0  ;;  %v8598_v51 = vld [vmem:[%s8971_s19 + $0x10] sm:$0xff]  }
 0x388   :  { %v4620_v33 = vmax.f32 %v4593_v40, %v4594_v61  ;;  %v4566_v3 = vmul.f32 %v10439_v2, %v4543_v36  ;;  %v4546_v27 = vadd.f32 %v8072_v29, %v4465_v16  ;;  %v4537_v45 = vpop.f32.mrb[155].mxu0  ;;  %v4610_v0 = vmax.f32 %v4608_v28, %v4609_v13  ;;  %v8597_v13 = vld [vmem:[%s8971_s19 + $0x8] sm:$0xff]   ;;  %v8603_v29 = vld [vmem:[%s8971_s19 + $0x38] sm:$0xff]  }
 0x389   :  { %v4613_v56 = vmax.f32 %v4591_v59, %v4592_v18  ;;  %v4564_v24 = vmul.f32 %v10439_v2, %v4535_v9  ;;  %v4538_v32 = vadd.f32 %v4537_v45, %v10434_v15  ;;  %v4603_v47 = vmax.f32 %v4601_v6, %v4602_v4  ;;  %v8599_v4 = vld [vmem:[%s8971_s19 + $0x18] sm:$0xff]   ;;  %v8600_v59 = vld [vmem:[%s8971_s19 + $0x20] sm:$0xff]   ;;  %v8601_v18 = vld [vmem:[%s8971_s19 + $0x28] sm:$0xff]  }
 0x38a   :  { %v4621_v39 = vrot.slane %v4620_v33, 4  ;;  %v4585_v1 = vadd.f32 %v10443_v60, %v4566_v3  ;;  %v4567_v57 = vmul.f32 %v10439_v2, %v4546_v27  ;;  %v4611_v30 = vrot.slane %v4610_v0, 1  ;;  %v8602_v9 = vld [vmem:[%s8971_s19 + $0x30] sm:$0xff]   ;;  %s11035_s19 = sld [smem:[#allocation31_spill]] }
 0x38b   :  { %v4614_v52 = vrot.slane %v4613_v56, 4  ;;  %v4583_v21 = vadd.f32 %v10443_v60, %v4564_v24  ;;  %v4565_v14 = vmul.f32 %v10439_v2, %v4538_v32  ;;  %v4604_v34 = vrot.slane %v4603_v47, 1 }
 0x38c   :  { %v4622_v63 = vmax.f32 %v4620_v33, %v4621_v39  ;;  %v4586_v16 = vadd.f32 %v10443_v60, %v4567_v57  ;;  %v4597_v11 = vmax.f32 %v4585_v1, 0.0  ;;  %v10476_v7 = vmax.f32 %v4610_v0, %v4611_v30  ;;  %v8608_v30 = vld [vmem:[%s8991_s12 + $0x20] sm:$0xff]  }
 0x38d   :  { %v4615_v10 = vmax.f32 %v4613_v56, %v4614_v52  ;;  %v4584_v17 = vadd.f32 %v10443_v60, %v4565_v14  ;;  %v4595_v37 = vmax.f32 %v4583_v21, 0.0  ;;  %v10478_v2 = vmax.f32 %v4603_v47, %v4604_v34  ;;  %v7062_v56 = vld [vmem:[%s8966_s14] ss:$0 sm:$0xff]  ;;  %v8605_v14 = vld [vmem:[%s8991_s12 + $0x8] sm:$0xff]   ;;  %v8611_v34 = vld [vmem:[%s8991_s12 + $0x38] sm:$0xff]   ;;  %s11034_s14 = sld [smem:[#allocation30_spill]] }
 0x38e   :  { %v4623_v15 = vrot.slane %v4622_v63, 2  ;;  %v4598_v8 = vmax.f32 %v4586_v16, 0.0  ;;  %v8604_v21 = vld [vmem:[%s8991_s12] sm:$0xff]   ;;  %v8607_v16 = vld [vmem:[%s8991_s12 + $0x18] sm:$0xff]  }
 0x38f   :  { %v4616_v5 = vrot.slane %v4615_v10, 2  ;;  %v4596_v19 = vmax.f32 %v4584_v17, 0.0  ;;  %v10487_v12 = vsel %vm4643_vm1, %v10476_v7, %v10478_v2  ;;  %v8610_v17 = vld [vmem:[%s8991_s12 + $0x30] sm:$0xff]  }
 0x390   :  { %v4624_v48 = vmax.f32 %v4622_v63, %v4623_v15  ;;  %v4634_v54 = vmax.f32 %v4597_v11, %v4598_v8  ;;  %v4654_v31 = vpack.c.bf16 %v10487_v12, %v10487_v12  ;;  %v8606_v63 = vld [vmem:[%s8991_s12 + $0x10] sm:$0xff]   ;;  %v5937_v15 = vlaneseq }
 0x391   :  { %v4617_v26 = vmax.f32 %v4615_v10, %v4616_v5  ;;  %v4627_v53 = vmax.f32 %v4595_v37, %v4596_v19  ;;  %v8609_v10 = vld [vmem:[%s8991_s12 + $0x28] sm:$0xff]   ;;  %v10552_v5 = vld [vmem:[%s11025_s5] sm:$0x3f]  ;;  %s11037_s12 = sld [smem:[#allocation40_spill]] }
 0x392   :  { %v4625_v46 = vrot.slane %v4624_v48, 1  ;;  %v4635_v50 = vrot.slane %v4634_v54, 4  ;;  %v10548_v11 = vshrl.u32 %v5937_v15, 7  ;;  %v10558_v19 = vld [vmem:[%s11026_s9] sm:$0x3f] }
 0x393   :  { %v4618_v49 = vrot.slane %v4617_v26, 1  ;;  %v4628_v60 = vrot.slane %v4627_v53, 4  ;;  %v7099_v15 = vld [vmem:[%s11028_s17] ss:$0 sm:$0xff] }
 0x394   :  { %v4636_v55 = vmax.f32 %v4634_v54, %v4635_v50  ;;  %v10480_v20 = vmax.f32 %v4624_v48, %v4625_v46  ;;  %v5947_v8 = vsub.s32 2, %v10548_v11  ;;  %v5951_v54 = vsub.s32 3, %v10548_v11 }
 0x395   :  { %v4629_v43 = vmax.f32 %v4627_v53, %v4628_v60  ;;  %v10482_v23 = vmax.f32 %v4617_v26, %v4618_v49  ;;  %v7087_v53 = vld [vmem:[%s11027_s13] ss:$0 sm:$0xff] }
 0x396   :  { %v4637_v22 = vrot.slane %v4636_v55, 2  ;;  %v10555_v37 = vrot.slane %v10552_v5, %v5947_v8  ;;  %v10561_v48 = vrot.slane %v10558_v19, %v5947_v8  ;;  %v10565_v26 = vrot.slane %v10552_v5, %v5951_v54 }
 0x397   :  { %v4630_v58 = vrot.slane %v4629_v43, 2  ;;  %v10492_v44 = vsel %vm4643_vm1, %v10480_v20, %v10482_v23 }
 0x398   :  { %v4638_v38 = vmax.f32 %v4636_v55, %v4637_v22  ;;  %v4655_v42 = vpack.c.bf16 %v10492_v44, %v10492_v44 }
 0x399   :  { %v4631_v28 = vmax.f32 %v4629_v43, %v4630_v58 }
 0x39a   :  { %v4639_v6 = vrot.slane %v4638_v38, 1  ;;  %4888 = vmatprep.mubr.bf16.mxu1 %v4655_v42 }
 0x39b   :  { %v4632_v25 = vrot.slane %v4631_v28, 1  ;;  %4889 = vmatmul.mubr.bf16.vlgmr.msra.gmra.mrb[144].mxu1 %v4654_v31 }
 0x39c   :  { %v10499_v41 = vmax.f32 %v4638_v38, %v4639_v6  ;;  %8094 = vmatpush3.bf16.msra.mxu1 %v8596_v35  ;;  %8109 = vmatprep.mubr.msk.bf16.mxu1 %vm8912_vm0, %v10323_v62 }
 0x39d   :  { %v10504_v40 = vmax.f32 %v4631_v28, %v4632_v25  ;;  %8095 = vmatprep.subr.bf16.mxu1 %v10323_v62 }
 0x39f   :  { %v10510_v61 = vsel %vm4643_vm1, %v10499_v41, %v10504_v40 }
 0x3a0   :  { %v4656_v36 = vpack.c.bf16 %v10510_v61, %v10510_v61  ;;  %8096 = vmatpush3.bf16.msra.mxu1 %v8597_v13 }
 0x3a1   :  { %8097 = vmatprep.subr.bf16.mxu1 %v10323_v62 }
 0x3a2   :  { %8090 = vmatmul.mubr.bf16.vlgmr.msra.gmra.mrb[156].mxu0 %v4656_v36 }
 0x3a3   :  { %8129 = vmatprep.mubr.msk.bf16.mxu0 %vm8912_vm0, %v10323_v62  ;;  %8114 = vmatpush3.bf16.msra.mxu0 %v8604_v21 }
 0x3a4   :  { %8098 = vmatpush3.bf16.msra.mxu1 %v8598_v51  ;;  %8115 = vmatprep.subr.bf16.mxu0 %v10323_v62  ;;  %v5955_v51 = vsub.s32 4, %v10548_v11 }
 0x3a5   :  { %8099 = vmatprep.subr.bf16.mxu1 %v10323_v62 }
 0x3a7   :  { %8116 = vmatpush3.bf16.msra.mxu0 %v8605_v14 }
 0x3a8   :  { %8100 = vmatpush3.bf16.msra.mxu1 %v8599_v4  ;;  %8117 = vmatprep.subr.bf16.mxu0 %v10323_v62 }
 0x3a9   :  { %8101 = vmatprep.subr.bf16.mxu1 %v10323_v62 }
 0x3ab   :  { %8118 = vmatpush3.bf16.msra.mxu0 %v8606_v63 }
 0x3ac   :  { %8102 = vmatpush3.bf16.msra.mxu1 %v8600_v59  ;;  %8119 = vmatprep.subr.bf16.mxu0 %v10323_v62 }
 0x3ad   :  { %8103 = vmatprep.subr.bf16.mxu1 %v10323_v62 }
 0x3af   :  { %8120 = vmatpush3.bf16.msra.mxu0 %v8607_v16 }
 0x3b0   :  { %8104 = vmatpush3.bf16.msra.mxu1 %v8601_v18  ;;  %8121 = vmatprep.subr.bf16.mxu0 %v10323_v62 }
 0x3b1   :  { %8105 = vmatprep.subr.bf16.mxu1 %v10323_v62 }
 0x3b3   :  { %8122 = vmatpush3.bf16.msra.mxu0 %v8608_v30 }
 0x3b4   :  { %8106 = vmatpush3.bf16.msra.mxu1 %v8602_v9  ;;  %8123 = vmatprep.subr.bf16.mxu0 %v10323_v62 }
 0x3b5   :  { %8107 = vmatprep.subr.bf16.mxu1 %v10323_v62 }
 0x3b7   :  { %8124 = vmatpush3.bf16.msra.mxu0 %v8609_v10 }
 0x3b8   :  { %8108 = vmatpush3.bf16.msra.mxu1 %v8603_v29  ;;  %8125 = vmatprep.subr.bf16.mxu0 %v10323_v62 }
 0x3b9   :  { %8133 = vmatprep.subr.bf16.mxu1 %v10323_v62 }
 0x3bb   :  { %8126 = vmatpush3.bf16.msra.mxu0 %v8610_v17 }
 0x3bc   :  { %8127 = vmatprep.subr.bf16.mxu0 %v10323_v62 }
 0x3bf   :  { %8128 = vmatpush3.bf16.msra.mxu0 %v8611_v34 }
 0x3c0   :  { %8153 = vmatprep.subr.bf16.mxu0 %v10323_v62 }
 0x46e   :  { %v7892_v33 = vpop.f32.mrb[144].mxu1 }
 0x46f   :  { %v7893_v3 = vpop.f32.mrb[145].mxu1 }
 0x470   :  { %v7894_v27 = vadd.f32 %v7893_v3, %v7892_v33  ;;  %v7895_v45 = vpop.f32.mrb[146].mxu1 }
 0x471   :  { %v7896_v0 = vpop.f32.mrb[147].mxu1 }
 0x472   :  { %v4891_v24 = vadd.f32 %v7894_v27, %v7062_v56  ;;  %v5956_v27 = vrot.slane %v10552_v5, %v5955_v51 }
 0x475   :  { %v4930_v32 = vpop.f32.mrb[156].mxu0 }
 0x476   :  { %v4931_v47 = vadd.f32 %v4930_v32, %v4891_v24  ;;  %v8091_v39 = vpop.f32.mrb[157].mxu0 }
 0x477   :  { %v4933_v1 = vpop.f32.mrb[158].mxu0  ;;  %v5994_v39 = vrot.slane %v10558_v19, %v5955_v51 }
 0x478   :  { %v4936_v57 = vpack.c.bf16 %v4931_v47, %v4931_v47  ;;  %v8092_v52 = vpop.f32.mrb[159].mxu0 }
 0x47a   :  { %8110 = vmatmul.mubr.bf16.vlgmr.msra.gmra.mrb[148].mxu1 %v4936_v57 }
 0x47b   :  { %8149 = vmatprep.mubr.msk.bf16.mxu1 %vm8912_vm0, %v10323_v62  ;;  %v10568_v62 = vrot.slane %v10558_v19, %v5951_v54 }
 0x54d   :  { %v5042_v46 = vpop.f32.mrb[148].mxu1 }
 0x54e   :  { %v5043_v50 = vadd.f32 %v7087_v53, %v5042_v46  ;;  %v8111_v49 = vpop.f32.mrb[149].mxu1 }
 0x54f   :  { %v5045_v60 = vpop.f32.mrb[150].mxu1 }
 0x550   :  { %v5048_v55 = vmul.f32 %v5043_v50, %v10487_v12  ;;  %v5056_v43 = vmul.f32 %v5043_v50, %v10492_v44  ;;  %v5064_v22 = vmul.f32 %v5043_v50, %v10510_v61  ;;  %v8112_v58 = vpop.f32.mrb[151].mxu1  ;;  %v7100_v50 = vld [vmem:[%s11029_s21] ss:$0 sm:$0xff] }
 0x552   :  { %v7096_v38 = vmul.f32 -1.442695, %v5048_v55  ;;  %v7097_v42 = vmul.f32 -1.442695, %v5056_v43  ;;  %v7098_v35 = vmul.f32 -1.442695, %v5064_v22 }
 0x554   :  { %8708 = vpow2.f32 %v7096_v38 }
 0x555   :  { %8710 = vpow2.f32 %v7097_v42 }
 0x556   :  { %8712 = vpow2.f32 %v7098_v35 }
 0x55e   :  { %v8709_v28 = vpop.eup %8708 }
 0x55f   :  { %v8711_v31 = vpop.eup %8710  ;;  %v5052_v6 = vadd.f32 1.0, %v8709_v28 }
 0x560   :  { %v8713_v25 = vpop.eup %8712  ;;  %v5060_v13 = vadd.f32 1.0, %v8711_v31 }
 0x561   :  { %8714 = vrcp.f32 %v5052_v6  ;;  %v5068_v36 = vadd.f32 1.0, %v8713_v25 }
 0x562   :  { %8716 = vrcp.f32 %v5060_v13 }
 0x563   :  { %8718 = vrcp.f32 %v5068_v36 }
 0x56b   :  { %v8715_v4 = vpop.eup %8714 }
 0x56c   :  { %v8717_v59 = vpop.eup %8716  ;;  %v5055_v18 = vmul.f32 %v8715_v4, %v10487_v12 }
 0x56d   :  { %v8719_v9 = vpop.eup %8718  ;;  %v5063_v29 = vmul.f32 %v8717_v59, %v10492_v44 }
 0x56e   :  { %v5071_v33 = vmul.f32 %v8719_v9, %v10510_v61  ;;  %v5087_v3 = vrot.slane %v5055_v18, 1  ;;  %v5095_v56 = vadd.f32 %v5055_v18, %v10504_v40 }
 0x56f   :  { %v5074_v45 = vrot.slane %v5063_v29, 1  ;;  %v5077_v0 = vadd.f32 %v5063_v29, %v10478_v2  ;;  %v5085_v22 = vadd.f32 %v5063_v29, %v10492_v44 }
 0x570   :  { %v5080_v24 = vrot.slane %v5071_v33, 1  ;;  %v5091_v32 = vadd.f32 %v5087_v3, %v10480_v20  ;;  %v5094_v47 = vadd.f32 %v5071_v33, %v10510_v61  ;;  %v5096_v52 = vadd.f32 %v5087_v3, %v10499_v41  ;;  %v10624_v3 = vld [vmem:[#allocation2] sm:$0xff] }
 0x571   :  { %v5078_v1 = vadd.f32 %v5074_v45, %v10476_v7  ;;  %v5083_v57 = vadd.f32 %v5077_v0, %v5071_v33  ;;  %v5097_v21 = vadd.f32 %v5095_v56, %v5063_v29  ;;  %v5090_v20 = vadd.f32 %v5055_v18, %v10482_v23  ;;  %v8614_v0 = vld [vmem:[%s11032_s3 + $0x10] sm:$0xff]  }
 0x572   :  { %v5971_v14 = vmul.f32 %v5956_v27, %v5094_v47  ;;  %v5093_v2 = vadd.f32 %v5091_v32, %v5080_v24  ;;  %v5098_v40 = vadd.f32 %v5096_v52, %v5074_v45  ;;  %v10590_v41 = vadd.f32 %v5055_v18, %v10487_v12  ;;  %v8661_v45 = vld [vmem:[%s11033_s8 + $0x8] sm:$0xff]   ;;  %v8616_v32 = vld [vmem:[%s11032_s3 + $0x20] sm:$0xff]  }
 0x573   :  { %v5084_v63 = vadd.f32 %v5080_v24, %v5078_v1  ;;  %v5101_v16 = vrot.slane %v5083_v57, 6  ;;  %v5653_v61 = vrot.slane %v5097_v21, 6  ;;  %v5092_v55 = vadd.f32 %v5090_v20, %v5071_v33  ;;  %v8613_v33 = vld [vmem:[%s11032_s3 + $0x8] sm:$0xff]   ;;  %v8615_v24 = vld [vmem:[%s11032_s3 + $0x18] sm:$0xff]  }
 0x574   :  { %v10587_v30 = vadd.f32 %v5994_v39, %v5971_v14  ;;  %v5654_v7 = vrot.slane %v5098_v40, 5  ;;  %v5932_v34 = vrot.slane %v5098_v40, 7  ;;  %v5929_v46 = vrot.slane %v5093_v2, 7 }
 0x575   :  { %v5102_v10 = vrot.slane %v5084_v63, 5  ;;  %v5926_v17 = vrot.slane %v5084_v63, 7  ;;  %v5969_v28 = vmul.f32 %v10555_v37, %v5085_v22  ;;  %v5379_v31 = vrot.slane %v5093_v2, 5  ;;  %v7124_v37 = vld [vmem:[%s11031_s29] ss:$0 sm:$0xff]  ;;  %v8619_v63 = vld [vmem:[%s11032_s3 + $0x38] sm:$0xff]  }
 0x576   :  { %v5655_v54 = vsel %vm5103_vm2, %v5654_v7, %v5653_v61  ;;  %v10605_v12 = vsel %vm4643_vm1, %v5932_v34, %v5097_v21  ;;  %v5930_v58 = vsel %vm4643_vm1, %v5929_v46, %v5092_v55  ;;  %v5378_v44 = vrot.slane %v5092_v55, 6  ;;  %v7147_v21 = vld [vmem:[%s11034_s14] ss:$0 sm:$0xff] }
 0x577   :  { %v5104_v8 = vsel %vm5103_vm2, %v5102_v10, %v5101_v16  ;;  %v10596_v53 = vsel %vm4643_vm1, %v5926_v17, %v5083_v57  ;;  %v10602_v49 = vsel %vm5106_vm3, %v5094_v47, %v5655_v54  ;;  %v5970_v42 = vmul.f32 %v10565_v26, %v5930_v58  ;;  %v7123_v26 = vld [vmem:[%s11030_s25] ss:$0 sm:$0xff]  ;;  %v8617_v47 = vld [vmem:[%s11032_s3 + $0x28] sm:$0xff]   ;;  %v8618_v57 = vld [vmem:[%s11032_s3 + $0x30] sm:$0xff]  }
 0x578   :  { %v5107_v23 = vsel %vm5106_vm3, %v10590_v41, %v5104_v8  ;;  %v10615_v25 = vadd.f32 %v10561_v48, %v5969_v28  ;;  %v5380_v13 = vsel %vm5103_vm2, %v5379_v31, %v5378_v44  ;;  %v8660_v48 = vld [vmem:[%s11033_s8] sm:$0xff]   ;;  %v5943_v39 = vsub.s32 1, %v10548_v11  ;;  %v8627_v44 = vld [vmem:[%s11036_s24 + $0x38] sm:$0xff]  }
 0x579   :  { %v5115_v60 = vmul.f32 %v7099_v15, %v5107_v23  ;;  %v10612_v6 = vadd.f32 %v10568_v62, %v5970_v42  ;;  %v5382_v36 = vsel %vm5106_vm3, %v5085_v22, %v5380_v13  ;;  %v8612_v62 = vld [vmem:[%s11032_s3] sm:$0xff]   ;;  %8134 = vmatpush3.bf16.msra.mxu1 %v8660_v48  ;;  %v5665_v2 = vmul.f32 %v7147_v21, %v10602_v49  ;;  %v8621_v15 = vld [vmem:[%s11036_s24 + $0x8] sm:$0xff]   ;;  %v8641_v21 = vld [vmem:[%s11037_s12 + $0x30] sm:$0xff]  }
 0x57a   :  { %v5390_v4 = vmul.f32 %v7123_v26, %v5382_v36  ;;  %8135 = vmatprep.subr.bf16.mxu1 %v10624_v3  ;;  %v5944_v14 = vrot.slane %v10552_v5, %v5943_v39  ;;  %v7148_v16 = vld [vmem:[%s11035_s19] ss:$0 sm:$0xff]  ;;  %v5982_v61 = vrot.slane %v10558_v19, %v5943_v39  ;;  %v5939_v55 = vsub.s32 0, %v10548_v11  ;;  %v8639_v39 = vld [vmem:[%s11037_s12 + $0x28] sm:$0xff]  }
 0x57b   :  { %v5123_v43 = vadd.f32 %v7100_v50, %v5115_v60  ;;  %v8620_v10 = vld [vmem:[%s11036_s24] sm:$0xff]   ;;  %v5673_v17 = vadd.f32 %v7148_v16, %v5665_v2  ;;  %v8623_v50 = vld [vmem:[%s11036_s24 + $0x18] sm:$0xff]   ;;  %v8625_v60 = vld [vmem:[%s11036_s24 + $0x28] sm:$0xff]   ;;  %vm6015_vm10 = vcmp.gt.f32.partialorder %v10587_v30, 0.0  ;;  %vm6014_vm13 = vcmp.gt.f32.partialorder %v10612_v6, 0.0 }
 0x57c   :  { %v5398_v29 = vadd.f32 %v7124_v37, %v5390_v4  ;;  %v5968_v20 = vmul.f32 %v5944_v14, %v10596_v53  ;;  %v8622_v53 = vld [vmem:[%s11036_s24 + $0x10] sm:$0xff]   ;;  %v8624_v49 = vld [vmem:[%s11036_s24 + $0x20] sm:$0xff]   ;;  %v5940_v42 = vrot.slane %v10552_v5, %v5939_v55  ;;  %v5978_v36 = vrot.slane %v10558_v19, %v5939_v55  ;;  %v8642_v14 = vld [vmem:[%s11037_s12 + $0x78] sm:$0xff]  }
 0x57d   :  { %v5125_v38 = vmin.f32 %v5123_v43, 0.0  ;;  %vm5124_vm4 = vcmp.gt.f32.partialorder %v5123_v43, 0.0  ;;  %8136 = vmatpush3.bf16.msra.mxu1 %v8661_v45  ;;  %v5675_v8 = vmin.f32 %v5673_v17, 0.0  ;;  %vm5674_vm6 = vcmp.gt.f32.partialorder %v5673_v17, 0.0  ;;  %v8644_v16 = vld [vmem:[%s11037_s12 + $0x140] sm:$0xff]   ;;  %v8665_v55 = vld [vmem:[%s11033_s8 + $0x28] sm:$0xff]  }
 0x57e   :  { %v5400_v27 = vmin.f32 %v5398_v29, 0.0  ;;  %8137 = vmatprep.subr.bf16.mxu1 %v10624_v3  ;;  %vm5399_vm5 = vcmp.gt.f32.partialorder %v5398_v29, 0.0  ;;  %v6006_v34 = vadd.f32 %v5982_v61, %v5968_v20  ;;  %v5967_v13 = vmul.f32 %v5940_v42, %v10590_v41  ;;  %v8654_v42 = vld [vmem:[%s11037_s12 + $0x168] sm:$0xff]  }
 0x57f   :  { %v5126_v35 = vmul.f32 1.442695, %v5125_v38  ;;  %v5676_v46 = vmul.f32 1.442695, %v5675_v8  ;;  %v8626_v38 = vld [vmem:[%s11036_s24 + $0x30] sm:$0xff]   ;;  %v8663_v8 = vld [vmem:[%s11033_s8 + $0x18] sm:$0xff]  }
 0x580   :  { %v5401_v56 = vmul.f32 1.442695, %v5400_v27  ;;  %v6018_v54 = vmin.f32 %v6006_v34, 0.0  ;;  %vm6012_vm7 = vcmp.gt.f32.partialorder %v6006_v34, 0.0  ;;  %v8634_v27 = vld [vmem:[%s11037_s12 + $0x58] sm:$0xff]   ;;  %vm6013_vm15 = vcmp.gt.f32.partialorder %v10615_v25, 0.0 }
 0x581   :  { %8720 = vpow2.f32 %v5126_v35  ;;  %vm6707_vm1 = vcmask 64512   ;;  %vm6709_vm3 = vcmask 62464  }
 0x582   :  { %8722 = vpow2.f32 %v5401_v56  ;;  %v6025_v23 = vmul.f32 1.442695, %v6018_v54  ;;  %v8635_v56 = vld [vmem:[%s11037_s12 + $0x18] sm:$0xff]   ;;  %v8647_v54 = vld [vmem:[%s11037_s12 + $0x108] sm:$0xff]  }
 0x583   :  { %8724 = vpow2.f32 %v5676_v46  ;;  %v6021_v46 = vmin.f32 %v10587_v30, 0.0 }
 0x584   :  { %8726 = vpow2.f32 %v6025_v23  ;;  %v8664_v23 = vld [vmem:[%s11033_s8 + $0x20] sm:$0xff]  }
 0x58b   :  { %v8721_v51 = vpop.eup %8720 }
 0x58c   :  { %v7101_v59 = vadd.f32 -1.0, %v8721_v51  ;;  %v8723_v1 = vpop.eup %8722 }
 0x58d   :  { %v7125_v52 = vadd.f32 -1.0, %v8723_v1  ;;  %v8725_v22 = vpop.eup %8724  ;;  %v8640_v1 = vld [vmem:[%s11037_s12 + $0x70] sm:$0xff]  }
 0x58e   :  { %v5129_v18 = vsel %vm5124_vm4, %v5123_v43, %v7101_v59  ;;  %v5959_v43 = vsub.s32 5, %v10548_v11  ;;  %v8727_v58 = vpop.eup %8726  ;;  %v7149_v35 = vadd.f32 -1.0, %v8725_v22  ;;  %v8628_v11 = vld [vmem:[%s11037_s12 + $0x40] sm:$0xff]  }
 0x58f   :  { %v5130_v9 = vpack.c.bf16 %v5129_v18, %v5129_v18  ;;  %v5404_v40 = vsel %vm5399_vm5, %v5398_v29, %v7125_v52  ;;  %v7172_v31 = vadd.f32 -1.0, %v8727_v58  ;;  %v8629_v59 = vld [vmem:[%s11037_s12] sm:$0xff]   ;;  %v8630_v18 = vld [vmem:[%s11037_s12 + $0x48] sm:$0xff]   ;;  %v8632_v29 = vld [vmem:[%s11037_s12 + $0x50] sm:$0xff]  }
 0x590   :  { %v5405_v7 = vpack.c.bf16 %v5404_v40, %v5404_v40  ;;  %v5960_v28 = vrot.slane %v10552_v5, %v5959_v43  ;;  %v5679_v26 = vsel %vm5674_vm6, %v5673_v17, %v7149_v35  ;;  %v5998_v5 = vrot.slane %v10558_v19, %v5959_v43  ;;  %v8643_v40 = vld [vmem:[%s11037_s12 + $0x38] sm:$0xff]   ;;  %v8646_v17 = vld [vmem:[%s11037_s12 + $0x148] sm:$0xff]   ;;  %v8652_v22 = vld [vmem:[%s11037_s12 + $0x160] sm:$0xff]  }
 0x591   :  { %8130 = vmatmul.mubr.bf16.vlgmr.msra.gmra.mrb[160].mxu0 %v5130_v9  ;;  %v6042_v4 = vsel %vm6012_vm7, %v6006_v34, %v7172_v31  ;;  %v5680_v37 = vpack.c.bf16 %v5679_v26, %v5679_v26  ;;  %v8662_v34 = vld [vmem:[%s11033_s8 + $0x10] sm:$0xff]   ;;  %v8651_v43 = vld [vmem:[%s11037_s12 + $0x118] sm:$0xff]  }
 0x592   :  { %8154 = vmatpush3.bf16.msra.mxu0 %v8612_v62  ;;  %8169 = vmatprep.mubr.msk.bf16.mxu0 %vm8912_vm0, %v10624_v3  ;;  %v5972_v51 = vmul.f32 %v5960_v28, %v10605_v12  ;;  %v6005_v62 = vadd.f32 %v5978_v36, %v5967_v13  ;;  %v6048_v41 = vpack.c.bf16 %v6042_v4, %v6042_v4  ;;  %v8631_v12 = vld [vmem:[%s11037_s12 + $0x8] sm:$0xff]   ;;  %v8666_v58 = vld [vmem:[%s11033_s8 + $0x30] sm:$0xff]   ;;  %v8667_v35 = vld [vmem:[%s11033_s8 + $0x38] sm:$0xff]  }
 0x593   :  { %8155 = vmatprep.subr.bf16.mxu0 %v10624_v3  ;;  %8138 = vmatpush3.bf16.msra.mxu1 %v8662_v34  ;;  %v8655_v28 = vld [vmem:[%s11037_s12 + $0x128] sm:$0xff]   ;;  %v8656_v31 = vld [vmem:[%s11037_s12 + $0x170] sm:$0xff]   ;;  %v8658_v13 = vld [vmem:[%s11037_s12 + $0x178] sm:$0xff]  }
 0x594   :  { %v6010_v9 = vadd.f32 %v5998_v5, %v5972_v51  ;;  %v6017_v19 = vmin.f32 %v6005_v62, 0.0  ;;  %vm6011_vm8 = vcmp.gt.f32.partialorder %v6005_v62, 0.0  ;;  %8139 = vmatprep.subr.bf16.mxu1 %v10624_v3  ;;  %v8659_v26 = vld [vmem:[%s11037_s12 + $0x138] sm:$0xff]   ;;  %v7102_v4 = vld [vmem:[%s11038_s4] ss:$0 sm:$0xff] }
 0x595   :  { %v8675_v34 = vld [vmem:[%s11041_s15 + $0x38] sm:$0xff]  }
 0x596   :  { %8156 = vmatpush3.bf16.msra.mxu0 %v8613_v33  ;;  %v6022_v48 = vmin.f32 %v6010_v9, 0.0  ;;  %v8633_v33 = vld [vmem:[%s11037_s12 + $0x10] sm:$0xff]   ;;  %v6023_v45 = vmul.f32 1.442695, %v6017_v19  ;;  %vm6016_vm9 = vcmp.gt.f32.partialorder %v6010_v9, 0.0 }
 0x597   :  { %8157 = vmatprep.subr.bf16.mxu0 %v10624_v3  ;;  %8140 = vmatpush3.bf16.msra.mxu1 %v8663_v8 }
 0x598   :  { %8728 = vpow2.f32 %v6023_v45  ;;  %8141 = vmatprep.subr.bf16.mxu1 %v10624_v3 }
 0x59a   :  { %8158 = vmatpush3.bf16.msra.mxu0 %v8614_v0  ;;  %v6033_v0 = vmul.f32 1.442695, %v6022_v48 }
 0x59b   :  { %8159 = vmatprep.subr.bf16.mxu0 %v10624_v3  ;;  %8142 = vmatpush3.bf16.msra.mxu1 %v8664_v23  ;;  %v8677_v23 = vld [vmem:[%s11045_s30 + $0x8] sm:$0xff]  }
 0x59c   :  { %8730 = vpow2.f32 %v6033_v0  ;;  %8143 = vmatprep.subr.bf16.mxu1 %v10624_v3  ;;  %v8668_v0 = vld [vmem:[%s11041_s15] sm:$0xff]  }
 0x59e   :  { %8160 = vmatpush3.bf16.msra.mxu0 %v8615_v24  ;;  %v8636_v24 = vld [vmem:[%s11037_s12 + $0x60] sm:$0xff]  }
 0x59f   :  { %8161 = vmatprep.subr.bf16.mxu0 %v10624_v3  ;;  %8144 = vmatpush3.bf16.msra.mxu1 %v8665_v55  ;;  %v7159_v55 = vld [vmem:[%s11047_s26] ss:$0 sm:$0xff] }
 0x5a0   :  { %8145 = vmatprep.subr.bf16.mxu1 %v10624_v3 }
 0x5a2   :  { %8162 = vmatpush3.bf16.msra.mxu0 %v8616_v32  ;;  %v8637_v32 = vld [vmem:[%s11037_s12 + $0x20] sm:$0xff]  }
 0x5a3   :  { %8163 = vmatprep.subr.bf16.mxu0 %v10624_v3  ;;  %8146 = vmatpush3.bf16.msra.mxu1 %v8666_v58 }
 0x5a4   :  { %8147 = vmatprep.subr.bf16.mxu1 %v10624_v3 }
 0x5a6   :  { %8164 = vmatpush3.bf16.msra.mxu0 %v8617_v47  ;;  %v8638_v47 = vld [vmem:[%s11037_s12 + $0x68] sm:$0xff]  }
 0x5a7   :  { %8165 = vmatprep.subr.bf16.mxu0 %v10624_v3  ;;  %8148 = vmatpush3.bf16.msra.mxu1 %v8667_v35 }
 0x5a8   :  { %8173 = vmatprep.subr.bf16.mxu1 %v10624_v3 }
 0x5aa   :  { %8166 = vmatpush3.bf16.msra.mxu0 %v8618_v57  ;;  %v8729_v57 = vpop.eup %8728 }
 0x5ab   :  { %8167 = vmatprep.subr.bf16.mxu0 %v10624_v3  ;;  %v8731_v52 = vpop.eup %8730 }
 0x5ac   :  { %v7176_v2 = vadd.f32 -1.0, %v8731_v52 }
 0x5ae   :  { %8168 = vmatpush3.bf16.msra.mxu0 %v8619_v63  ;;  %v7171_v63 = vadd.f32 -1.0, %v8729_v57  ;;  %v6046_v61 = vsel %vm6016_vm9, %v6010_v9, %v7176_v2 }
 0x5af   :  { %8193 = vmatprep.subr.bf16.mxu0 %v10624_v3 }
 0x5b0   :  { %v6041_v20 = vsel %vm6011_vm8, %v6005_v62, %v7171_v63 }
 0x5b1   :  { %8170 = vmatmul.mubr.bf16.vlgmr.msra.gmra.mrb[164].mxu0 %v5405_v7  ;;  %v6047_v7 = vpack.c.bf16 %v6041_v20, %v6041_v20 }
 0x5b2   :  { %8194 = vmatpush3.bf16.msra.mxu0 %v8620_v10  ;;  %8209 = vmatprep.mubr.msk.bf16.mxu0 %vm8912_vm0, %v10624_v3  ;;  %v8645_v10 = vld [vmem:[%s11037_s12 + $0x100] sm:$0xff]  }
 0x5b3   :  { %8195 = vmatprep.subr.bf16.mxu0 %v10624_v3 }
 0x5b6   :  { %8196 = vmatpush3.bf16.msra.mxu0 %v8621_v15  ;;  %v6052_v15 = vpack.c.bf16 %v6046_v61, %v6046_v61  ;;  %v8672_v61 = vld [vmem:[%s11041_s15 + $0x20] sm:$0xff]  }
 0x5b7   :  { %8197 = vmatprep.subr.bf16.mxu0 %v10624_v3 }
 0x5ba   :  { %8198 = vmatpush3.bf16.msra.mxu0 %v8622_v53  ;;  %v8648_v53 = vld [vmem:[%s11037_s12 + $0x150] sm:$0xff]  }
 0x5bb   :  { %8199 = vmatprep.subr.bf16.mxu0 %v10624_v3 }
 0x5be   :  { %8200 = vmatpush3.bf16.msra.mxu0 %v8623_v50  ;;  %v8649_v50 = vld [vmem:[%s11037_s12 + $0x110] sm:$0xff]  }
 0x5bf   :  { %8201 = vmatprep.subr.bf16.mxu0 %v10624_v3 }
 0x5c2   :  { %8202 = vmatpush3.bf16.msra.mxu0 %v8624_v49  ;;  %v8650_v49 = vld [vmem:[%s11037_s12 + $0x158] sm:$0xff]  }
 0x5c3   :  { %8203 = vmatprep.subr.bf16.mxu0 %v10624_v3 }
 0x5c6   :  { %8204 = vmatpush3.bf16.msra.mxu0 %v8625_v60  ;;  %v6031_v60 = vmul.f32 1.442695, %v6021_v46 }
 0x5c7   :  { %8205 = vmatprep.subr.bf16.mxu0 %v10624_v3 }
 0x5c8   :  { %8732 = vpow2.f32 %v6031_v60 }
 0x5ca   :  { %8206 = vmatpush3.bf16.msra.mxu0 %v8626_v38  ;;  %v8653_v38 = vld [vmem:[%s11037_s12 + $0x120] sm:$0xff]  }
 0x5cb   :  { %8207 = vmatprep.subr.bf16.mxu0 %v10624_v3 }
 0x5ce   :  { %8208 = vmatpush3.bf16.msra.mxu0 %v8627_v44 }
 0x5cf   :  { %7970 = vmatprep.subr.bf16.mxu0 %v8628_v11  ;;  %v8657_v11 = vld [vmem:[%s11037_s12 + $0x130] sm:$0xff]  }
 0x5d1   :  { %8210 = vmatmul.mubr.bf16.vlgmr.msra.gmra.mrb[168].mxu0 %v5680_v37  ;;  %v7111_v37 = vld [vmem:[%s11039_s11] ss:$0 sm:$0xff] }
 0x5d2   :  { %7971 = vmatpush3.bf16.msra.mxu0 %v8629_v59  ;;  %6476 = vmatprep.mubr.bf16.mxu0 %v6048_v41  ;;  %v8733_v44 = vpop.eup %8732  ;;  %v7112_v41 = vld [vmem:[%s11040_s0] ss:$0 sm:$0xff] }
 0x5d3   :  { %7972 = vmatprep.subr.bf16.mxu0 %v8630_v18  ;;  %v7175_v36 = vadd.f32 -1.0, %v8733_v44  ;;  %v8679_v44 = vld [vmem:[%s11045_s30 + $0x18] sm:$0xff]  }
 0x5d5   :  { %v6045_v51 = vsel %vm6015_vm10, %v10587_v30, %v7175_v36  ;;  %v8680_v36 = vld [vmem:[%s11045_s30 + $0x20] sm:$0xff]  }
 0x5d6   :  { %7973 = vmatpush3.bf16.msra.mxu0 %v8631_v12  ;;  %v6051_v5 = vpack.c.bf16 %v6045_v51, %v6045_v51  ;;  %v8681_v51 = vld [vmem:[%s11045_s30 + $0x28] sm:$0xff]  }
 0x5d7   :  { %7974 = vmatprep.subr.bf16.mxu0 %v8632_v29 }
 0x5da   :  { %7975 = vmatpush3.bf16.msra.mxu0 %v8633_v33 }
 0x5db   :  { %7976 = vmatprep.subr.bf16.mxu0 %v8634_v27 }
 0x5de   :  { %7977 = vmatpush3.bf16.msra.mxu0 %v8635_v56 }
 0x5df   :  { %7978 = vmatprep.subr.bf16.mxu0 %v8636_v24  ;;  %v8669_v24 = vld [vmem:[%s11041_s15 + $0x8] sm:$0xff]  }
 0x5e2   :  { %7979 = vmatpush3.bf16.msra.mxu0 %v8637_v32  ;;  %v7126_v32 = vld [vmem:[%s11042_s16] ss:$0 sm:$0xff] }
 0x5e3   :  { %7980 = vmatprep.subr.bf16.mxu0 %v8638_v47 }
 0x5e6   :  { %7981 = vmatpush3.bf16.msra.mxu0 %v8639_v39  ;;  %v7135_v39 = vld [vmem:[%s11043_s18] ss:$0 sm:$0xff] }
 0x5e7   :  { %7982 = vmatprep.subr.bf16.mxu0 %v8640_v1  ;;  %v8670_v1 = vld [vmem:[%s11041_s15 + $0x10] sm:$0xff]  }
 0x5ea   :  { %7983 = vmatpush3.bf16.msra.mxu0 %v8641_v21  ;;  %v7136_v21 = vld [vmem:[%s11044_s22] ss:$0 sm:$0xff] }
 0x5eb   :  { %7984 = vmatprep.subr.bf16.mxu0 %v8642_v14 }
 0x5ee   :  { %7985 = vmatpush3.bf16.msra.mxu0 %v8643_v40  ;;  %v8671_v40 = vld [vmem:[%s11041_s15 + $0x18] sm:$0xff]  }
 0x5ef   :  { %8014 = vmatprep.subr.bf16.mxu0 %v8644_v16 }
 0x5f1   :  { %6477 = vmatmul.mubr.bf16.vlgmr.msra.gmra.mrb[172].mxu0 %v6047_v7  ;;  %v8673_v7 = vld [vmem:[%s11041_s15 + $0x28] sm:$0xff]  }
 0x5f2   :  { %8015 = vmatpush3.bf16.msra.mxu0 %v8645_v10  ;;  %6556 = vmatprep.mubr.bf16.mxu0 %v6052_v15 }
 0x5f3   :  { %8016 = vmatprep.subr.bf16.mxu0 %v8646_v17  ;;  %v8674_v17 = vld [vmem:[%s11041_s15 + $0x30] sm:$0xff]  }
 0x5f6   :  { %8017 = vmatpush3.bf16.msra.mxu0 %v8647_v54 }
 0x5f7   :  { %8018 = vmatprep.subr.bf16.mxu0 %v8648_v53  ;;  %v8676_v53 = vld [vmem:[%s11045_s30] sm:$0xff]  }
 0x5fa   :  { %8019 = vmatpush3.bf16.msra.mxu0 %v8649_v50  ;;  %v7150_v50 = vld [vmem:[%s11046_s23] ss:$0 sm:$0xff] }
 0x5fb   :  { %8020 = vmatprep.subr.bf16.mxu0 %v8650_v49  ;;  %v6020_v49 = vmin.f32 %v10612_v6, 0.0 }
 0x5fd   :  { %v6029_v35 = vmul.f32 1.442695, %v6020_v49  ;;  %v8704_v49 = vld [vmem:[%s9131_s6 + $0x20] sm:$0xff]  }
 0x5fe   :  { %8021 = vmatpush3.bf16.msra.mxu0 %v8651_v43  ;;  %v8678_v43 = vld [vmem:[%s11045_s30 + $0x10] sm:$0xff]  }
 0x5ff   :  { %8022 = vmatprep.subr.bf16.mxu0 %v8652_v22 }
 0x602   :  { %8023 = vmatpush3.bf16.msra.mxu0 %v8653_v38  ;;  %v7160_v38 = vld [vmem:[%s11048_s28] ss:$0 sm:$0xff] }
 0x603   :  { %8024 = vmatprep.subr.bf16.mxu0 %v8654_v42 }
 0x606   :  { %8025 = vmatpush3.bf16.msra.mxu0 %v8655_v28 }
 0x607   :  { %8026 = vmatprep.subr.bf16.mxu0 %v8656_v31 }
 0x60a   :  { %8027 = vmatpush3.bf16.msra.mxu0 %v8657_v11 }
 0x60b   :  { %8028 = vmatprep.subr.bf16.mxu0 %v8658_v13 }
 0x60e   :  { %8029 = vmatpush3.bf16.msra.mxu0 %v8659_v26 }
 0x611   :  { %6557 = vmatmul.mubr.bf16.vlgmr.msra.gmra.mrb[176].mxu0 %v6051_v5 }
 0x664   :  { %v5236_v59 = vpop.f32.mrb[160].mxu0 }
 0x665   :  { %v5237_v18 = vadd.f32 %v7102_v4, %v5236_v59  ;;  %v8131_v62 = vpop.f32.mrb[161].mxu0  ;;  %v8682_v4 = vld [vmem:[%s11045_s30 + $0x30] sm:$0xff]  }
 0x666   :  { %v5239_v9 = vpop.f32.mrb[162].mxu0  ;;  %v8684_v62 = vld [vmem:[%s11037_s12 + $0xc0] sm:$0xff]  }
 0x667   :  { %v5249_v12 = vmul.f32 %v7111_v37, %v5237_v18  ;;  %v8132_v29 = vpop.f32.mrb[163].mxu0  ;;  %v8683_v37 = vld [vmem:[%s11045_s30 + $0x38] sm:$0xff]  }
 0x668   :  { %v8685_v29 = vld [vmem:[%s11037_s12 + $0x80] sm:$0xff]  }
 0x669   :  { %v5257_v19 = vadd.f32 %v7112_v41, %v5249_v12 }
 0x66b   :  { %v5259_v48 = vmin.f32 %v5257_v19, 0.0  ;;  %vm5258_vm11 = vcmp.gt.f32.partialorder %v5257_v19, 0.0 }
 0x66d   :  { %v5260_v33 = vmul.f32 1.442695, %v5259_v48  ;;  %v8686_v48 = vld [vmem:[%s11037_s12 + $0xc8] sm:$0xff]  }
 0x66f   :  { %8734 = vpow2.f32 %v5260_v33 }
 0x679   :  { %v8735_v30 = vpop.eup %8734 }
 0x67a   :  { %v7113_v27 = vadd.f32 -1.0, %v8735_v30  ;;  %v8687_v30 = vld [vmem:[%s11037_s12 + $0x88] sm:$0xff]  }
 0x67c   :  { %v5263_v45 = vsel %vm5258_vm11, %v5257_v19, %v7113_v27  ;;  %v8688_v27 = vld [vmem:[%s11037_s12 + $0xd0] sm:$0xff]  }
 0x67d   :  { %v5264_v56 = vpack.c.bf16 %v5263_v45, %v5263_v45  ;;  %v6019_v45 = vmin.f32 %v10615_v25, 0.0 }
 0x67f   :  { %8150 = vmatmul.mubr.bf16.vlgmr.msra.gmra.mrb[152].mxu1 %v5264_v56 }
 0x680   :  { %8174 = vmatpush3.bf16.msra.mxu1 %v8668_v0  ;;  %8189 = vmatprep.mubr.msk.bf16.mxu1 %vm8912_vm0, %v10624_v3  ;;  %v8689_v0 = vld [vmem:[%s11037_s12 + $0x90] sm:$0xff]  }
 0x681   :  { %8175 = vmatprep.subr.bf16.mxu1 %v10624_v3 }
 0x684   :  { %v5511_v47 = vpop.f32.mrb[164].mxu0  ;;  %8176 = vmatpush3.bf16.msra.mxu1 %v8669_v24  ;;  %v8690_v24 = vld [vmem:[%s11037_s12 + $0xd8] sm:$0xff]  }
 0x685   :  { %v5512_v57 = vadd.f32 %v7126_v32, %v5511_v47  ;;  %v8171_v52 = vpop.f32.mrb[165].mxu0  ;;  %8177 = vmatprep.subr.bf16.mxu1 %v10624_v3  ;;  %v6027_v32 = vmul.f32 1.442695, %v6019_v45 }
 0x686   :  { %v5514_v14 = vpop.f32.mrb[166].mxu0  ;;  %v8692_v52 = vld [vmem:[%s11037_s12 + $0xe0] sm:$0xff]  }
 0x687   :  { %v5524_v63 = vmul.f32 %v7135_v39, %v5512_v57  ;;  %v8172_v2 = vpop.f32.mrb[167].mxu0  ;;  %v8691_v57 = vld [vmem:[%s11037_s12 + $0x98] sm:$0xff]   ;;  %v8694_v14 = vld [vmem:[%s11037_s12 + $0xe8] sm:$0xff]  }
 0x688   :  { %8178 = vmatpush3.bf16.msra.mxu1 %v8670_v1  ;;  %v8696_v2 = vld [vmem:[%s11037_s12 + $0xf0] sm:$0xff]  }
 0x689   :  { %v5532_v16 = vadd.f32 %v7136_v21, %v5524_v63  ;;  %8179 = vmatprep.subr.bf16.mxu1 %v10624_v3  ;;  %v8693_v21 = vld [vmem:[%s11037_s12 + $0xa0] sm:$0xff]   ;;  %v8695_v63 = vld [vmem:[%s11037_s12 + $0xa8] sm:$0xff]  }
 0x68b   :  { %v5534_v20 = vmin.f32 %v5532_v16, 0.0  ;;  %vm5533_vm12 = vcmp.gt.f32.partialorder %v5532_v16, 0.0 }
 0x68c   :  { %8180 = vmatpush3.bf16.msra.mxu1 %v8671_v40 }
 0x68d   :  { %v5535_v10 = vmul.f32 1.442695, %v5534_v20  ;;  %8181 = vmatprep.subr.bf16.mxu1 %v10624_v3  ;;  %v8698_v20 = vld [vmem:[%s11037_s12 + $0xf8] sm:$0xff]  }
 0x68f   :  { %8736 = vpow2.f32 %v5535_v10  ;;  %v8699_v10 = vld [vmem:[%s11037_s12 + $0xb8] sm:$0xff]  }
 0x690   :  { %8182 = vmatpush3.bf16.msra.mxu1 %v8672_v61  ;;  %8738 = vpow2.f32 %v6029_v35  ;;  %v7138_v35 = vld [vmem:[%s11049_s1] ss:$0 sm:$0xff] }
 0x691   :  { %8183 = vmatprep.subr.bf16.mxu1 %v10624_v3 }
 0x694   :  { %8184 = vmatpush3.bf16.msra.mxu1 %v8673_v7 }
 0x695   :  { %8185 = vmatprep.subr.bf16.mxu1 %v10624_v3 }
 0x698   :  { %8186 = vmatpush3.bf16.msra.mxu1 %v8674_v17 }
 0x699   :  { %v8737_v15 = vpop.eup %8736  ;;  %8187 = vmatprep.subr.bf16.mxu1 %v10624_v3 }
 0x69a   :  { %v7137_v8 = vadd.f32 -1.0, %v8737_v15  ;;  %v8739_v5 = vpop.eup %8738 }
 0x69b   :  { %v7174_v59 = vadd.f32 -1.0, %v8739_v5 }
 0x69c   :  { %8188 = vmatpush3.bf16.msra.mxu1 %v8675_v34  ;;  %v5538_v54 = vsel %vm5533_vm12, %v5532_v16, %v7137_v8  ;;  %v8697_v16 = vld [vmem:[%s11037_s12 + $0xb0] sm:$0xff]  }
 0x69d   :  { %v5539_v46 = vpack.c.bf16 %v5538_v54, %v5538_v54  ;;  %8213 = vmatprep.subr.bf16.mxu1 %v10624_v3  ;;  %v6044_v9 = vsel %vm6014_vm13, %v10612_v6, %v7174_v59 }
 0x69e   :  { %v6050_v33 = vpack.c.bf16 %v6044_v9, %v6044_v9 }
 0x69f   :  { %8190 = vmatmul.mubr.bf16.vlgmr.msra.gmra.mrb[156].mxu1 %v5539_v46  ;;  %v8700_v46 = vld [vmem:[%s9131_s6] sm:$0xff]  }
 0x6a0   :  { %8214 = vmatpush3.bf16.msra.mxu1 %v8676_v53  ;;  %8229 = vmatprep.mubr.msk.bf16.mxu1 %vm8912_vm0, %v10624_v3 }
 0x6a1   :  { %8215 = vmatprep.subr.bf16.mxu1 %v10624_v3 }
 0x6a4   :  { %v5786_v60 = vpop.f32.mrb[168].mxu0  ;;  %8216 = vmatpush3.bf16.msra.mxu1 %v8677_v23  ;;  %v8702_v23 = vld [vmem:[%s9131_s6 + $0x10] sm:$0xff]  }
 0x6a5   :  { %v5787_v22 = vadd.f32 %v7150_v50, %v5786_v60  ;;  %v8211_v58 = vpop.f32.mrb[169].mxu0  ;;  %8217 = vmatprep.subr.bf16.mxu1 %v10624_v3  ;;  %v8703_v50 = vld [vmem:[%s9131_s6 + $0x18] sm:$0xff]  }
 0x6a6   :  { %v5789_v42 = vpop.f32.mrb[170].mxu0 }
 0x6a7   :  { %v5799_v28 = vmul.f32 %v7159_v55, %v5787_v22  ;;  %v8212_v31 = vpop.f32.mrb[171].mxu0  ;;  %v8705_v22 = vld [vmem:[%s9131_s6 + $0x28] sm:$0xff]   ;;  %v8707_v42 = vld [vmem:[%s9131_s6 + $0x38] sm:$0xff]  }
 0x6a8   :  { %8218 = vmatpush3.bf16.msra.mxu1 %v8678_v43 }
 0x6a9   :  { %v5807_v11 = vadd.f32 %v7160_v38, %v5799_v28  ;;  %8219 = vmatprep.subr.bf16.mxu1 %v10624_v3  ;;  %v8706_v38 = vld [vmem:[%s9131_s6 + $0x30] sm:$0xff]   ;;  %v7114_v28 = vld [vmem:[%s11050_s2] ss:$0 sm:$0xff] }
 0x6ab   :  { %v5809_v13 = vmin.f32 %v5807_v11, 0.0  ;;  %vm5808_vm14 = vcmp.gt.f32.partialorder %v5807_v11, 0.0 }
 0x6ac   :  { %8220 = vmatpush3.bf16.msra.mxu1 %v8679_v44 }
 0x6ad   :  { %v5810_v26 = vmul.f32 1.442695, %v5809_v13  ;;  %8221 = vmatprep.subr.bf16.mxu1 %v10624_v3 }
 0x6af   :  { %8740 = vpow2.f32 %v5810_v26 }
 0x6b0   :  { %8222 = vmatpush3.bf16.msra.mxu1 %v8680_v36  ;;  %8742 = vpow2.f32 %v6027_v32 }
 0x6b1   :  { %8223 = vmatprep.subr.bf16.mxu1 %v10624_v3 }
 0x6b4   :  { %8224 = vmatpush3.bf16.msra.mxu1 %v8681_v51 }
 0x6b5   :  { %8225 = vmatprep.subr.bf16.mxu1 %v10624_v3 }
 0x6b8   :  { %8226 = vmatpush3.bf16.msra.mxu1 %v8682_v4 }
 0x6b9   :  { %v8741_v18 = vpop.eup %8740  ;;  %8227 = vmatprep.subr.bf16.mxu1 %v10624_v3 }
 0x6ba   :  { %v7161_v41 = vadd.f32 -1.0, %v8741_v18  ;;  %v8743_v40 = vpop.eup %8742 }
 0x6bb   :  { %v7173_v61 = vadd.f32 -1.0, %v8743_v40 }
 0x6bc   :  { %8228 = vmatpush3.bf16.msra.mxu1 %v8683_v37  ;;  %v5813_v12 = vsel %vm5808_vm14, %v5807_v11, %v7161_v41 }
 0x6bd   :  { %v5814_v19 = vpack.c.bf16 %v5813_v12, %v5813_v12  ;;  %7992 = vmatprep.subr.bf16.mxu1 %v8684_v62  ;;  %v6043_v7 = vsel %vm6013_vm15, %v10615_v25, %v7173_v61  ;;  %v8701_v25 = vld [vmem:[%s9131_s6 + $0x8] sm:$0xff]   ;;  %s11051_s6 = sld [smem:[#allocation37_spill]] }
 0x6be   :  { %v6049_v17 = vpack.c.bf16 %v6043_v7, %v6043_v7 }
 0x6bf   :  { %8230 = vmatmul.mubr.bf16.vlgmr.msra.gmra.mrb[160].mxu1 %v5814_v19 }
 0x6c0   :  { %7993 = vmatpush3.bf16.msra.mxu1 %v8685_v29  ;;  %6516 = vmatprep.mubr.bf16.mxu1 %v6050_v33  ;;  %v7226_v33 = vld [vmem:[#allocation6] ss:$0 sm:$0xff] }
 0x6c1   :  { %7994 = vmatprep.subr.bf16.mxu1 %v8686_v48 }
 0x6c4   :  { %v7986_v6 = vpop.f32.mrb[172].mxu0  ;;  %7995 = vmatpush3.bf16.msra.mxu1 %v8687_v30 }
 0x6c5   :  { %v7987_v56 = vpop.f32.mrb[173].mxu0  ;;  %7996 = vmatprep.subr.bf16.mxu1 %v8688_v27  ;;  %v7227_v27 = vld [vmem:[#allocation8] ss:$0 sm:$0xff] }
 0x6c6   :  { %v10779_v47 = vadd.f32 %v7987_v56, %v7986_v6  ;;  %v7989_v39 = vpop.f32.mrb[174].mxu0 }
 0x6c7   :  { %v7990_v1 = vpop.f32.mrb[175].mxu0 }
 0x6c8   :  { %7997 = vmatpush3.bf16.msra.mxu1 %v8689_v0 }
 0x6c9   :  { %7998 = vmatprep.subr.bf16.mxu1 %v8690_v24 }
 0x6cc   :  { %7999 = vmatpush3.bf16.msra.mxu1 %v8691_v57  ;;  %v7162_v57 = vld [vmem:[%s11051_s6] ss:$0 sm:$0xff] }
 0x6cd   :  { %8000 = vmatprep.subr.bf16.mxu1 %v8692_v52 }
 0x6d0   :  { %8001 = vmatpush3.bf16.msra.mxu1 %v8693_v21 }
 0x6d1   :  { %8002 = vmatprep.subr.bf16.mxu1 %v8694_v14 }
 0x6d4   :  { %8003 = vmatpush3.bf16.msra.mxu1 %v8695_v63 }
 0x6d5   :  { %8004 = vmatprep.subr.bf16.mxu1 %v8696_v2 }
 0x6d8   :  { %8005 = vmatpush3.bf16.msra.mxu1 %v8697_v16 }
 0x6d9   :  { %8006 = vmatprep.subr.bf16.mxu1 %v8698_v20 }
 0x6dc   :  { %8007 = vmatpush3.bf16.msra.mxu1 %v8699_v10 }
 0x6dd   :  { %8233 = vmatprep.subr.bf16.mxu1 %v10624_v3 }
 0x6df   :  { %6517 = vmatmul.mubr.bf16.vlgmr.msra.gmra.mrb[164].mxu1 %v6049_v17 }
 0x6e0   :  { %8249 = vmatprep.mubr.msk.bf16.mxu1 %vm8912_vm0, %v10624_v3  ;;  %8234 = vmatpush3.bf16.msra.mxu1 %v8700_v46  ;;  %vm6704_vm0 = vcmask 1043456  }
 0x6e1   :  { %8235 = vmatprep.subr.bf16.mxu1 %v10624_v3 }
 0x6e4   :  { %v8030_v34 = vpop.f32.mrb[176].mxu0  ;;  %8236 = vmatpush3.bf16.msra.mxu1 %v8701_v25 }
 0x6e5   :  { %v8031_v15 = vpop.f32.mrb[177].mxu0  ;;  %8237 = vmatprep.subr.bf16.mxu1 %v10624_v3 }
 0x6e6   :  { %v8032_v8 = vadd.f32 %v8031_v15, %v8030_v34  ;;  %v8033_v54 = vpop.f32.mrb[178].mxu0 }
 0x6e7   :  { %v8034_v53 = vpop.f32.mrb[179].mxu0 }
 0x6e8   :  { %8238 = vmatpush3.bf16.msra.mxu1 %v8702_v23 }
 0x6e9   :  { %8239 = vmatprep.subr.bf16.mxu1 %v10624_v3 }
 0x6ec   :  { %8240 = vmatpush3.bf16.msra.mxu1 %v8703_v50 }
 0x6ed   :  { %8241 = vmatprep.subr.bf16.mxu1 %v10624_v3 }
 0x6f0   :  { %8242 = vmatpush3.bf16.msra.mxu1 %v8704_v49 }
 0x6f1   :  { %8243 = vmatprep.subr.bf16.mxu1 %v10624_v3 }
 0x6f4   :  { %8244 = vmatpush3.bf16.msra.mxu1 %v8705_v22 }
 0x6f5   :  { %8245 = vmatprep.subr.bf16.mxu1 %v10624_v3 }
 0x6f8   :  { %8246 = vmatpush3.bf16.msra.mxu1 %v8706_v38 }
 0x6f9   :  { %8247 = vmatprep.subr.bf16.mxu1 %v10624_v3  ;;  %v7177_v3 = vld [vmem:[#allocation4] ss:$0 sm:$0xff] }
 0x6fa   :  { %v6479_v9 = vadd.f32 %v10779_v47, %v7177_v3  ;;  %v7229_v47 = vld [vmem:[#allocation9] ss:$0 sm:$0xff] }
 0x6fc   :  { %8248 = vmatpush3.bf16.msra.mxu1 %v8707_v42 }
 0x752   :  { %v5370_v60 = vpop.f32.mrb[152].mxu1 }
 0x753   :  { %v8151_v55 = vpop.f32.mrb[153].mxu1  ;;  %v5371_v36 = vadd.f32 %v7114_v28, %v5370_v60 }
 0x754   :  { %v5373_v43 = vpop.f32.mrb[154].mxu1 }
 0x755   :  { %v8152_v58 = vpop.f32.mrb[155].mxu1 }
 0x772   :  { %v5645_v31 = vpop.f32.mrb[156].mxu1 }
 0x773   :  { %v5646_v44 = vadd.f32 %v7138_v35, %v5645_v31  ;;  %v8191_v11 = vpop.f32.mrb[157].mxu1 }
 0x774   :  { %v5648_v13 = vpop.f32.mrb[158].mxu1 }
 0x775   :  { %v6699_v26 = vrot.slane %v5646_v44, 4  ;;  %v8192_v51 = vpop.f32.mrb[159].mxu1 }
 0x777   :  { %v6705_v5 = vsel %vm6704_vm0, %v5371_v36, %v6699_v26 }
 0x778   :  { %6708 = vst.msk [vmem:[%s9141_s27] sm:$0xff] %vm6707_vm1, %v6705_v5 }
 0x792   :  { %v5920_v4 = vpop.f32.mrb[160].mxu1 }
 0x793   :  { %v8231_v59 = vpop.f32.mrb[161].mxu1  ;;  %v5921_v2 = vadd.f32 %v7162_v57, %v5920_v4 }
 0x794   :  { %v5923_v37 = vpop.f32.mrb[162].mxu1 }
 0x795   :  { %v8232_v18 = vpop.f32.mrb[163].mxu1 }
 0x7b2   :  { %v8008_v62 = vpop.f32.mrb[164].mxu1 }
 0x7b3   :  { %v8009_v41 = vpop.f32.mrb[165].mxu1 }
 0x7b4   :  { %v8010_v12 = vadd.f32 %v8009_v41, %v8008_v62  ;;  %v8011_v29 = vpop.f32.mrb[166].mxu1 }
 0x7b5   :  { %v8012_v19 = vpop.f32.mrb[167].mxu1 }
 0x7b6   :  { %v6519_v48 = vadd.f32 %v8010_v12, %v6479_v9 }
 0x7b8   :  { %v6559_v30 = vadd.f32 %v8032_v8, %v6519_v48 }
 0x7ba   :  { %v6571_v45 = vmul.f32 %v7226_v33, %v6559_v30 }
 0x7bc   :  { %v6579_v6 = vadd.f32 %v7227_v27, %v6571_v45 }
 0x7be   :  { %v6581_v0 = vmin.f32 %v6579_v6, 0.0  ;;  %vm6580_vm2 = vcmp.gt.f32.partialorder %v6579_v6, 0.0 }
 0x7c0   :  { %v6582_v56 = vmul.f32 1.442695, %v6581_v0 }
 0x7c2   :  { %8744 = vpow2.f32 %v6582_v56 }
 0x7cc   :  { %v8745_v24 = vpop.eup %8744 }
 0x7cd   :  { %v7228_v32 = vadd.f32 -1.0, %v8745_v24 }
 0x7cf   :  { %v6585_v39 = vsel %vm6580_vm2, %v6579_v6, %v7228_v32 }
 0x7d0   :  { %v6586_v1 = vpack.c.bf16 %v6585_v39, %v6585_v39 }
 0x7d2   :  { %8250 = vmatmul.mubr.bf16.vlgmr.msra.gmra.mrb[168].mxu1 %v6586_v1 }
 0x8a5   :  { %v6692_v52 = vpop.f32.mrb[168].mxu1 }
 0x8a6   :  { %v6693_v21 = vadd.f32 %v7229_v47, %v6692_v52  ;;  %v8251_v14 = vpop.f32.mrb[169].mxu1 }
 0x8a7   :  { %v6695_v63 = vpop.f32.mrb[170].mxu1 }
 0x8a8   :  { %v6702_v40 = vrot.slane %v6693_v21, 4  ;;  %v8252_v16 = vpop.f32.mrb[171].mxu1 }
 0x8aa   :  { %v6706_v20 = vsel %vm6704_vm0, %v5921_v2, %v6702_v40 }
 0x8ab   :  { %6710 = vst.msk [vmem:[%s9141_s27 + $0x8] sm:$0x3f] %vm6709_vm3, %v6706_v20 }
 0x8ac   :  { %6715 = vsyncpa [#allocation5], 1 }
 0x8ad   :  { %6716 = vsyncpa [#allocation7], 1 }
 0x8ae   :  { %6717 = vsyncpa [#allocation10], 1 }

</bundles_post_ra>
